<compile_context>
chip_gen: v6e
topology: v6e:2x2x1
jax: 0.10.0
libtpu: 0.0.40
codegen_flags: <defaults>
</compile_context>

<pallas_src>
import functools

import numpy as np
import jax
import jax.numpy as jnp
from jax import lax
from jax.experimental import pallas as pl
from jax.experimental.pallas import tpu as pltpu

BN_EPS = 1e-5
LN_EPS = 1e-5


def _full_spec(shape):
    nd = len(shape)
    return pl.BlockSpec(shape, lambda i, _nd=nd: (0,) * _nd)


# --------------------------------------------------------------------------
# Backbone conv kernel (lane-dense): y = relu(W @ patches + b)
# --------------------------------------------------------------------------

def _wx_bias_relu_kernel(w_ref, x_ref, b_ref, o_ref):
    o_ref[...] = jnp.maximum(
        jnp.dot(w_ref[...], x_ref[...], preferred_element_type=jnp.float32)
        + b_ref[...], 0.0)


def conv_matmul_t(w, patches, b):
    """w: (Cout, k*k*Cin), patches: (k*k*Cin, M), b: (Cout, 1) -> (Cout, M)."""
    N = w.shape[0]
    M = patches.shape[1]
    return pl.pallas_call(
        _wx_bias_relu_kernel,
        out_shape=jax.ShapeDtypeStruct((N, M), jnp.float32),
        grid=(1,),
        in_specs=[_full_spec(w.shape), _full_spec(patches.shape),
                  _full_spec(b.shape)],
        out_specs=_full_spec((N, M)),
        compiler_params=pltpu.CompilerParams(
            dimension_semantics=("arbitrary",)),
    )(w, patches, b)


# --------------------------------------------------------------------------
# Fused CLC blocks + mlp head kernel
# --------------------------------------------------------------------------

def _clc_head_kernel(x_ref, tapm_ref,
                     c1w_ref, c1b_ref,
                     ln1g_ref, ln1b_ref,
                     l1w_ref, l1b_ref, l2w_ref, l2b_ref,
                     ln2g_ref, ln2b_ref,
                     c2w_ref, c2b_ref,
                     seg_ref, hw_ref, hb_ref,
                     out_ref, state_ref,
                     *, taps_off, eps):
    """Activation layout is (C, M) with M = B*H*W, p = (b*H + h)*W + w.

    One grid step = one CLC block.  3x3 pad-1 convs are 9 lane rolls + 0/1
    boundary masks + a single (C, 9C) @ (9C, M) matmul.  On the last grid
    step the mlp head (LN over dim_mlp folded into the linear) is computed
    and the logits written.
    """
    C, M = state_ref.shape
    B = seg_ref.shape[0]
    HW = M // B
    blk = pl.program_id(0)

    @pl.when(blk == 0)
    def _():
        state_ref[...] = x_ref[...]

    x0 = state_ref[...]                                   # (C, M)

    def conv_bn_relu(z, w_ref, b_ref):
        parts = []
        for t, off in enumerate(taps_off):
            zt = z if off == 0 else pltpu.roll(z, shift=(-off) % M, axis=1)
            parts.append(zt * tapm_ref[t])                # mask padding rows
        zs = jnp.concatenate(parts, axis=0)               # (9C, M)
        y = jnp.dot(w_ref[...], zs, preferred_element_type=jnp.float32)
        return jnp.maximum(y + b_ref[...], 0.0)

    def layernorm_c(z, g_ref, b_ref):                     # LN over channels
        mu = jnp.mean(z, axis=0, keepdims=True)
        zc = z - mu
        var = jnp.mean(zc * zc, axis=0, keepdims=True)
        return zc * lax.rsqrt(var + eps) * g_ref[...] + b_ref[...]

    # conv1 + BN + ReLU
    a = conv_bn_relu(x0, c1w_ref, c1b_ref)
    # TransLinear (NetB: num_layers == 0 -> NormLinear clones never run)
    z1 = layernorm_c(a, ln1g_ref, ln1b_ref)
    h = jnp.maximum(
        jnp.dot(l1w_ref[...], z1, preferred_element_type=jnp.float32)
        + l1b_ref[...], 0.0)                              # lin1 + ReLU
    h = jnp.dot(l2w_ref[...], h, preferred_element_type=jnp.float32) \
        + l2b_ref[...]                                    # lin2
    z2 = layernorm_c(h + z1, ln2g_ref, ln2b_ref)          # residual + norm2
    # conv2 + BN + ReLU, block residual
    y = conv_bn_relu(z2, c2w_ref, c2b_ref) + x0
    state_ref[...] = y

    @pl.when(blk == pl.num_programs(0) - 1)
    def _():
        # mlp head: per-batch LayerNorm over dim_mlp (= C*HW), affine folded
        # into hw_ref / hb_ref; flatten order 'b (c h w)' is the row order of
        # hw_ref, so no transpose is needed.
        inv_n = 1.0 / float(C * HW)
        rows = []
        for b in range(B):
            m = seg_ref[b]                                # (1, M) batch mask
            zm = y * m
            mu = jnp.sum(jnp.sum(zm, axis=1, keepdims=True),
                         axis=0, keepdims=True) * inv_n
            zc = (y - mu) * m
            var = jnp.sum(jnp.sum(zc * zc, axis=1, keepdims=True),
                          axis=0, keepdims=True) * inv_n
            zn = zc * lax.rsqrt(var + eps)                # (C, M), 0 off-batch
            rows.append(jnp.concatenate(
                [zn[c:c + 1, :] for c in range(C)], axis=1))   # (1, C*M)
        zs = jnp.concatenate(rows, axis=0)                # (B, C*M)
        out_ref[...] = jnp.dot(zs, hw_ref[...],
                               preferred_element_type=jnp.float32) + hb_ref[...]


def clc_and_head(z0, prep, num_blocks, pooled_w):
    assert num_blocks >= 1
    C, M = z0.shape
    B = prep["seg"].shape[0]
    K = prep["head_b"].shape[1]
    offs = tuple((kh - 1) * pooled_w + (kw - 1)
                 for kh in range(3) for kw in range(3))
    args = (z0, prep["tap_mask"],
            prep["c1_w"], prep["c1_b"],
            prep["ln1_g"], prep["ln1_b"],
            prep["l1_w"], prep["l1_b"], prep["l2_w"], prep["l2_b"],
            prep["ln2_g"], prep["ln2_b"],
            prep["c2_w"], prep["c2_b"],
            prep["seg"], prep["head_w"], prep["head_b"])
    return pl.pallas_call(
        functools.partial(_clc_head_kernel, taps_off=offs, eps=LN_EPS),
        out_shape=jax.ShapeDtypeStruct((B, K), jnp.float32),
        grid=(num_blocks,),
        in_specs=[_full_spec(a.shape) for a in args],
        out_specs=_full_spec((B, K)),
        scratch_shapes=[pltpu.VMEM((C, M), jnp.float32)],
        compiler_params=pltpu.CompilerParams(
            dimension_semantics=("arbitrary",)),
    )(*args)


# --------------------------------------------------------------------------
# Jitted XLA glue: channel-major im2col, maxpool, NetB forward
# --------------------------------------------------------------------------

def im2col_cm(x, k):
    """x: (Cin, B, H, W) channel-major -> (k*k*Cin, B*Ho*Wo);
    rows ordered (kh, kw, ci), columns ordered (b, ho, wo)."""
    Cin, B, H, W = x.shape
    Ho, Wo = H - k + 1, W - k + 1
    blocks = [x[:, :, i:i + Ho, j:j + Wo].reshape(Cin, B * Ho * Wo)
              for i in range(k) for j in range(k)]
    return jnp.concatenate(blocks, axis=0), Ho, Wo


def netb_forward(x_nchw, prep, *, num_blocks):
    """NetB.forward, size == 8 branch, eval mode."""
    B = x_nchw.shape[0]
    C = prep["bb1_w"].shape[0]

    xc = jnp.transpose(x_nchw, (1, 0, 2, 3))              # channel-major once
    p1, Ho, Wo = im2col_cm(xc, 5)
    y = conv_matmul_t(prep["bb1_w"], p1, prep["bb1_b"]).reshape(C, B, Ho, Wo)
    p2, Ho, Wo = im2col_cm(y, 5)
    y = conv_matmul_t(prep["bb2_w"], p2, prep["bb2_b"]).reshape(C, B, Ho, Wo)
    # MaxPool2d((3,3)) stride 3 (XLA; a Pallas kernel here is lane-sparse
    # launch overhead).
    Hp, Wp = Ho // 3, Wo // 3
    y = y.reshape(C, B, Hp, 3, Wp, 3).max(axis=(3, 5))    # (C, B, 8, 8)
    z0 = y.reshape(C, B * Hp * Wp)                        # (C, M), lane-dense
    return clc_and_head(z0, prep, num_blocks, Wp)


# --------------------------------------------------------------------------
# One-time parameter preparation (BN fold, layouts, masks)
# --------------------------------------------------------------------------

def _fold_bn(p):
    s = p["gamma"] / jnp.sqrt(p["var"] + BN_EPS)
    w = p["w"] * s[:, None, None, None]                   # (Cout,Cin,k,k)
    b = (p["b"] - p["mean"]) * s + p["beta"]
    return w, b


def _conv_as_matmul_t(p, k):
    w, b = _fold_bn(p)
    cout, cin = w.shape[0], w.shape[1]
    w_mat = jnp.transpose(w, (0, 2, 3, 1)).reshape(cout, k * k * cin)
    return w_mat, b.reshape(cout, 1)


def _tap_masks(B, H, W, k):
    """(k*k, 1, B*H*W) 0/1: tap t valid at position p (padding rows are 0)."""
    pad = (k - 1) // 2
    m = np.zeros((k * k, 1, B * H * W), np.float32)
    for b in range(B):
        for h in range(H):
            for w in range(W):
                p = (b * H + h) * W + w
                for kh in range(k):
                    for kw in range(k):
                        hs, ws = h + kh - pad, w + kw - pad
                        if 0 <= hs < H and 0 <= ws < W:
                            m[kh * k + kw, 0, p] = 1.0
    return jnp.asarray(m)


def _seg_masks(B, HW):
    s = np.zeros((B, 1, B * HW), np.float32)
    for b in range(B):
        s[b, 0, b * HW:(b + 1) * HW] = 1.0
    return jnp.asarray(s)


def prepare_params(params, batch, size):
    blk = params["block"]
    tr = blk["trans"]
    C = blk["conv1"]["w"].shape[0]
    HW = size * size
    K = params["mlp_w"].shape[0]

    prep = {}
    prep["bb1_w"], prep["bb1_b"] = _conv_as_matmul_t(params["bb_conv1"], 5)
    prep["bb2_w"], prep["bb2_b"] = _conv_as_matmul_t(params["bb_conv2"], 5)
    prep["c1_w"], prep["c1_b"] = _conv_as_matmul_t(blk["conv1"], 3)
    prep["c2_w"], prep["c2_b"] = _conv_as_matmul_t(blk["conv2"], 3)
    prep["ln1_g"] = tr["n1_g"].reshape(C, 1)
    prep["ln1_b"] = tr["n1_b"].reshape(C, 1)
    prep["ln2_g"] = tr["n2_g"].reshape(C, 1)
    prep["ln2_b"] = tr["n2_b"].reshape(C, 1)
    prep["l1_w"] = tr["lin1_w"]
    prep["l1_b"] = tr["lin1_b"].reshape(-1, 1)
    prep["l2_w"] = tr["lin2_w"]
    prep["l2_b"] = tr["lin2_b"].reshape(-1, 1)

    # mlp head: fold the LayerNorm affine into the Linear; lay the weights out
    # as rows (c, b, h, w) so the kernel's (C, M) activation contracts against
    # them directly (PyTorch 'b (c h w)' flatten order needs no transpose).
    gamma = params["mlp_ln_g"]
    beta = params["mlp_ln_b"]
    w_fold = params["mlp_w"].T * gamma[:, None]            # (C*HW, K)
    w_tiled = jnp.tile(w_fold.reshape(C, HW, K), (1, batch, 1))
    prep["head_w"] = w_tiled.reshape(C * batch * HW, K)    # (C*M, K)
    prep["head_b"] = (params["mlp_b"] + beta @ params["mlp_w"].T).reshape(1, K)

    prep["tap_mask"] = _tap_masks(batch, size, size, 3)
    prep["seg"] = _seg_masks(batch, HW)
    return prep


# --------------------------------------------------------------------------
# Deterministic synthetic parameters (shapes from NetB.__init__)
# --------------------------------------------------------------------------

def init_params(key, C, num_class, size):
    keys = iter(jax.random.split(key, 64))

    def rnd(shape, scale=0.1):
        return scale * jax.random.normal(next(keys), shape, dtype=jnp.float32)

    def conv_bn(cin, cout, k):
        return dict(
            w=rnd((cout, cin, k, k)), b=rnd((cout,)),
            gamma=1.0 + rnd((cout,)), beta=rnd((cout,)),
            mean=rnd((cout,)),
            var=1.0 + 0.25 * jax.random.uniform(next(keys), (cout,),
                                                dtype=jnp.float32),
        )

    block = dict(
        conv1=conv_bn(C, C, 3),
        trans=dict(
            # NetB builds CLC_block with num_layers=0, so the NormLinear
            # clones exist in the torch module but never run in forward.
            n1_g=1.0 + rnd((C,)), n1_b=rnd((C,)),
            n2_g=1.0 + rnd((C,)), n2_b=rnd((C,)),
            lin1_w=rnd((C, C)), lin1_b=rnd((C,)),
            lin2_w=rnd((C, C)), lin2_b=rnd((C,)),
        ),
        conv2=conv_bn(C, C, 3),
    )
    dim_mlp = C * size * size
    return dict(
        bb_conv1=conv_bn(3, C, 5),
        bb_conv2=conv_bn(C, C, 5),
        block=block,
        mlp_ln_g=1.0 + rnd((dim_mlp,)), mlp_ln_b=rnd((dim_mlp,)),
        mlp_w=rnd((num_class, dim_mlp)), mlp_b=rnd((num_class,)),
    )


# --------------------------------------------------------------------------
# Pure-JAX reference of the same forward (for correctness verification)
# --------------------------------------------------------------------------

def _ref_convbnrelu(x, p, padding):
    y = lax.conv_general_dilated(x, p["w"], (1, 1), padding,
                                 dimension_numbers=("NCHW", "OIHW", "NCHW"))
    y = y + p["b"][None, :, None, None]
    s = p["gamma"] / jnp.sqrt(p["var"] + BN_EPS)
    y = (y - p["mean"][None, :, None, None]) * s[None, :, None, None] \
        + p["beta"][None, :, None, None]
    return jnp.maximum(y, 0.0)


def _ref_ln(v, g, b):
    mu = v.mean(-1, keepdims=True)
    var = ((v - mu) ** 2).mean(-1, keepdims=True)
    return (v - mu) / jnp.sqrt(var + LN_EPS) * g + b


def reference_forward(x, params, *, num_blocks):
    x = _ref_convbnrelu(x, params["bb_conv1"], "VALID")
    x = _ref_convbnrelu(x, params["bb_conv2"], "VALID")
    B, C, H, W = x.shape
    x = x.reshape(B, C, H // 3, 3, W // 3, 3).max(axis=(3, 5))
    blk = params["block"]
    tr = blk["trans"]
    for _ in range(num_blocks):
        tmp = x
        y = _ref_convbnrelu(x, blk["conv1"], [(1, 1), (1, 1)])
        Bb, Cc, Hh, Ww = y.shape
        z = y.reshape(Bb, Cc, Hh * Ww).transpose(0, 2, 1)
        z = _ref_ln(z, tr["n1_g"], tr["n1_b"])
        tmp2 = z
        h = jnp.maximum(z @ tr["lin1_w"].T + tr["lin1_b"], 0.0)
        h = h @ tr["lin2_w"].T + tr["lin2_b"]
        z = _ref_ln(h + tmp2, tr["n2_g"], tr["n2_b"])
        y = z.transpose(0, 2, 1).reshape(Bb, Cc, Hh, Ww)
        y = _ref_convbnrelu(y, blk["conv2"], [(1, 1), (1, 1)])
        x = y + tmp
    x = x.reshape(x.shape[0], -1)                          # b (c h w)
    z = _ref_ln(x, params["mlp_ln_g"], params["mlp_ln_b"])
    return z @ params["mlp_w"].T + params["mlp_b"]


# --------------------------------------------------------------------------

if __name__ == "__main__":
    # NetB(size=8, num_class=10, num_channel=8, num_blocks=2, dropout=0.1)
    # size==8 branch needs 32x32 RGB: two valid 5x5 convs + 3x3/3 maxpool -> 8x8.
    SIZE, NUM_CLASS, NUM_CHANNEL, NUM_BLOCKS = 8, 10, 8, 2
    B = 2

    key = jax.random.PRNGKey(0)
    pkey, xkey = jax.random.split(key)
    params = init_params(pkey, NUM_CHANNEL, NUM_CLASS, SIZE)
    x = jax.random.normal(xkey, (B, 3, 32, 32), dtype=jnp.float32)

    prep = prepare_params(params, B, SIZE)   # one-time BN fold / layouts / masks
    fwd = jax.jit(functools.partial(netb_forward, num_blocks=NUM_BLOCKS))

    out = jax.block_until_ready(fwd(x, prep))
    assert out.shape == (B, NUM_CLASS), out.shape

    # Correctness: compare against a pure-JAX/XLA reference of the same module.
    with jax.default_matmul_precision("highest"):
        ref = reference_forward(x, params, num_blocks=NUM_BLOCKS)
    err = float(jnp.max(jnp.abs(out - ref)))
    assert err < 5e-2, f"max |kernel - reference| = {err}"
    print("KERNEL_OK")
</pallas_src>

<mosaic_0001>
module attributes {stable_mosaic.version = 11 : i64} {
  func.func @_wx_bias_relu_kernel(%arg0: i32, %arg1: memref<8x75xf32, #tpu.memory_space<vmem>>, %arg2: memref<75x1568xf32, #tpu.memory_space<vmem>>, %arg3: memref<8x1xf32, #tpu.memory_space<vmem>>, %arg4: memref<8x1568xf32, #tpu.memory_space<vmem>>) attributes {dimension_semantics = [#tpu.dimension_semantics<arbitrary>], iteration_bounds = array<i64: 1>, scalar_prefetch = 0 : i64, scratch_operands = 0 : i64, tpu.core_type = #tpu.core_type<tc>, window_params = [{pipeline_mode = #tpu.pipeline_mode<synchronous>, transform_indices = @transform_0, window_bounds = array<i64: 8, 75>}, {pipeline_mode = #tpu.pipeline_mode<synchronous>, transform_indices = @transform_1, window_bounds = array<i64: 75, 1568>}, {pipeline_mode = #tpu.pipeline_mode<synchronous>, transform_indices = @transform_2, window_bounds = array<i64: 8, 1>}, {pipeline_mode = #tpu.pipeline_mode<synchronous>, transform_indices = @transform_3, window_bounds = array<i64: 8, 1568>}]} {
    %c0 = arith.constant 0 : index
    %c0_0 = arith.constant 0 : index
    %0 = vector.load %arg1[%c0, %c0_0] : memref<8x75xf32, #tpu.memory_space<vmem>>, vector<8x75xf32>
    %c0_1 = arith.constant 0 : index
    %c0_2 = arith.constant 0 : index
    %1 = vector.load %arg2[%c0_1, %c0_2] : memref<75x1568xf32, #tpu.memory_space<vmem>>, vector<75x1568xf32>
    %cst = arith.constant dense<0.000000e+00> : vector<8x1568xf32>
    %2 = tpu.matmul %0, %1, %cst {dimension_numbers = #tpu.dot_dimension_numbers<[1], [0], [0], [1], [0, 0, 1, 1], [], []>} : vector<8x75xf32>, vector<75x1568xf32>, vector<8x1568xf32> -> vector<8x1568xf32>
    %c0_3 = arith.constant 0 : index
    %c0_4 = arith.constant 0 : index
    %3 = vector.load %arg3[%c0_3, %c0_4] : memref<8x1xf32, #tpu.memory_space<vmem>>, vector<8x1xf32>
    %4 = vector.broadcast %3 : vector<8x1xf32> to vector<8x1568xf32>
    %5 = arith.addf %2, %4 : vector<8x1568xf32>
    %cst_5 = arith.constant 0.000000e+00 : f32
    %6 = vector.broadcast %cst_5 : f32 to vector<8x1568xf32>
    %7 = arith.maximumf %5, %6 : vector<8x1568xf32>
    %c0_6 = arith.constant 0 : index
    %c0_7 = arith.constant 0 : index
    %8 = vector.load %arg4[%c0_6, %c0_7] : memref<8x1568xf32, #tpu.memory_space<vmem>>, vector<8x1568xf32>
    tpu.vector_store %arg4[%c0_6, %c0_7], %7 {strides = array<i32>} : memref<8x1568xf32, #tpu.memory_space<vmem>>, vector<8x1568xf32>,
    return
  }
  func.func @transform_0(%arg0: i32) -> (i32, i32) {
    %c0_i32 = arith.constant 0 : i32
    %c0_i32_0 = arith.constant 0 : i32
    %c0_i32_1 = arith.constant 0 : i32
    return %c0_i32, %c0_i32_0 : i32, i32
  }
  func.func @transform_1(%arg0: i32) -> (i32, i32) {
    %c0_i32 = arith.constant 0 : i32
    %c0_i32_0 = arith.constant 0 : i32
    %c0_i32_1 = arith.constant 0 : i32
    return %c0_i32, %c0_i32_0 : i32, i32
  }
  func.func @transform_2(%arg0: i32) -> (i32, i32) {
    %c0_i32 = arith.constant 0 : i32
    %c0_i32_0 = arith.constant 0 : i32
    %c0_i32_1 = arith.constant 0 : i32
    return %c0_i32, %c0_i32_0 : i32, i32
  }
  func.func @transform_3(%arg0: i32) -> (i32, i32) {
    %c0_i32 = arith.constant 0 : i32
    %c0_i32_0 = arith.constant 0 : i32
    %c0_i32_1 = arith.constant 0 : i32
    return %c0_i32, %c0_i32_0 : i32, i32
  }
}

module attributes {stable_mosaic.version = 11 : i64} {
  func.func @_wx_bias_relu_kernel(%arg0: i32, %arg1: memref<8x200xf32, #tpu.memory_space<vmem>>, %arg2: memref<200x1152xf32, #tpu.memory_space<vmem>>, %arg3: memref<8x1xf32, #tpu.memory_space<vmem>>, %arg4: memref<8x1152xf32, #tpu.memory_space<vmem>>) attributes {dimension_semantics = [#tpu.dimension_semantics<arbitrary>], iteration_bounds = array<i64: 1>, scalar_prefetch = 0 : i64, scratch_operands = 0 : i64, tpu.core_type = #tpu.core_type<tc>, window_params = [{pipeline_mode = #tpu.pipeline_mode<synchronous>, transform_indices = @transform_0, window_bounds = array<i64: 8, 200>}, {pipeline_mode = #tpu.pipeline_mode<synchronous>, transform_indices = @transform_1, window_bounds = array<i64: 200, 1152>}, {pipeline_mode = #tpu.pipeline_mode<synchronous>, transform_indices = @transform_2, window_bounds = array<i64: 8, 1>}, {pipeline_mode = #tpu.pipeline_mode<synchronous>, transform_indices = @transform_3, window_bounds = array<i64: 8, 1152>}]} {
    %c0 = arith.constant 0 : index
    %c0_0 = arith.constant 0 : index
    %0 = vector.load %arg1[%c0, %c0_0] : memref<8x200xf32, #tpu.memory_space<vmem>>, vector<8x200xf32>
    %c0_1 = arith.constant 0 : index
    %c0_2 = arith.constant 0 : index
    %1 = vector.load %arg2[%c0_1, %c0_2] : memref<200x1152xf32, #tpu.memory_space<vmem>>, vector<200x1152xf32>
    %cst = arith.constant dense<0.000000e+00> : vector<8x1152xf32>
    %2 = tpu.matmul %0, %1, %cst {dimension_numbers = #tpu.dot_dimension_numbers<[1], [0], [0], [1], [0, 0, 1, 1], [], []>} : vector<8x200xf32>, vector<200x1152xf32>, vector<8x1152xf32> -> vector<8x1152xf32>
    %c0_3 = arith.constant 0 : index
    %c0_4 = arith.constant 0 : index
    %3 = vector.load %arg3[%c0_3, %c0_4] : memref<8x1xf32, #tpu.memory_space<vmem>>, vector<8x1xf32>
    %4 = vector.broadcast %3 : vector<8x1xf32> to vector<8x1152xf32>
    %5 = arith.addf %2, %4 : vector<8x1152xf32>
    %cst_5 = arith.constant 0.000000e+00 : f32
    %6 = vector.broadcast %cst_5 : f32 to vector<8x1152xf32>
    %7 = arith.maximumf %5, %6 : vector<8x1152xf32>
    %c0_6 = arith.constant 0 : index
    %c0_7 = arith.constant 0 : index
    %8 = vector.load %arg4[%c0_6, %c0_7] : memref<8x1152xf32, #tpu.memory_space<vmem>>, vector<8x1152xf32>
    tpu.vector_store %arg4[%c0_6, %c0_7], %7 {strides = array<i32>} : memref<8x1152xf32, #tpu.memory_space<vmem>>, vector<8x1152xf32>,
    return
  }
  func.func @transform_0(%arg0: i32) -> (i32, i32) {
    %c0_i32 = arith.constant 0 : i32
    %c0_i32_0 = arith.constant 0 : i32
    %c0_i32_1 = arith.constant 0 : i32
    return %c0_i32, %c0_i32_0 : i32, i32
  }
  func.func @transform_1(%arg0: i32) -> (i32, i32) {
    %c0_i32 = arith.constant 0 : i32
    %c0_i32_0 = arith.constant 0 : i32
    %c0_i32_1 = arith.constant 0 : i32
    return %c0_i32, %c0_i32_0 : i32, i32
  }
  func.func @transform_2(%arg0: i32) -> (i32, i32) {
    %c0_i32 = arith.constant 0 : i32
    %c0_i32_0 = arith.constant 0 : i32
    %c0_i32_1 = arith.constant 0 : i32
    return %c0_i32, %c0_i32_0 : i32, i32
  }
  func.func @transform_3(%arg0: i32) -> (i32, i32) {
    %c0_i32 = arith.constant 0 : i32
    %c0_i32_0 = arith.constant 0 : i32
    %c0_i32_1 = arith.constant 0 : i32
    return %c0_i32, %c0_i32_0 : i32, i32
  }
}

module attributes {stable_mosaic.version = 11 : i64} {
  func.func @_clc_head_kernel(%arg0: i32, %arg1: memref<8x128xf32, #tpu.memory_space<vmem>>, %arg2: memref<9x1x128xf32, #tpu.memory_space<vmem>>, %arg3: memref<8x72xf32, #tpu.memory_space<vmem>>, %arg4: memref<8x1xf32, #tpu.memory_space<vmem>>, %arg5: memref<8x1xf32, #tpu.memory_space<vmem>>, %arg6: memref<8x1xf32, #tpu.memory_space<vmem>>, %arg7: memref<8x8xf32, #tpu.memory_space<vmem>>, %arg8: memref<8x1xf32, #tpu.memory_space<vmem>>, %arg9: memref<8x8xf32, #tpu.memory_space<vmem>>, %arg10: memref<8x1xf32, #tpu.memory_space<vmem>>, %arg11: memref<8x1xf32, #tpu.memory_space<vmem>>, %arg12: memref<8x1xf32, #tpu.memory_space<vmem>>, %arg13: memref<8x72xf32, #tpu.memory_space<vmem>>, %arg14: memref<8x1xf32, #tpu.memory_space<vmem>>, %arg15: memref<2x1x128xf32, #tpu.memory_space<vmem>>, %arg16: memref<1024x10xf32, #tpu.memory_space<vmem>>, %arg17: memref<1x10xf32, #tpu.memory_space<vmem>>, %arg18: memref<2x10xf32, #tpu.memory_space<vmem>>, %arg19: memref<8x128xf32, #tpu.memory_space<vmem>>) attributes {dimension_semantics = [#tpu.dimension_semantics<arbitrary>], iteration_bounds = array<i64: 2>, scalar_prefetch = 0 : i64, scratch_operands = 1 : i64, tpu.core_type = #tpu.core_type<tc>, window_params = [{pipeline_mode = #tpu.pipeline_mode<synchronous>, transform_indices = @transform_0, window_bounds = array<i64: 8, 128>}, {pipeline_mode = #tpu.pipeline_mode<synchronous>, transform_indices = @transform_1, window_bounds = array<i64: 9, 1, 128>}, {pipeline_mode = #tpu.pipeline_mode<synchronous>, transform_indices = @transform_2, window_bounds = array<i64: 8, 72>}, {pipeline_mode = #tpu.pipeline_mode<synchronous>, transform_indices = @transform_3, window_bounds = array<i64: 8, 1>}, {pipeline_mode = #tpu.pipeline_mode<synchronous>, transform_indices = @transform_4, window_bounds = array<i64: 8, 1>}, {pipeline_mode = #tpu.pipeline_mode<synchronous>, transform_indices = @transform_5, window_bounds = array<i64: 8, 1>}, {pipeline_mode = #tpu.pipeline_mode<synchronous>, transform_indices = @transform_6, window_bounds = array<i64: 8, 8>}, {pipeline_mode = #tpu.pipeline_mode<synchronous>, transform_indices = @transform_7, window_bounds = array<i64: 8, 1>}, {pipeline_mode = #tpu.pipeline_mode<synchronous>, transform_indices = @transform_8, window_bounds = array<i64: 8, 8>}, {pipeline_mode = #tpu.pipeline_mode<synchronous>, transform_indices = @transform_9, window_bounds = array<i64: 8, 1>}, {pipeline_mode = #tpu.pipeline_mode<synchronous>, transform_indices = @transform_10, window_bounds = array<i64: 8, 1>}, {pipeline_mode = #tpu.pipeline_mode<synchronous>, transform_indices = @transform_11, window_bounds = array<i64: 8, 1>}, {pipeline_mode = #tpu.pipeline_mode<synchronous>, transform_indices = @transform_12, window_bounds = array<i64: 8, 72>}, {pipeline_mode = #tpu.pipeline_mode<synchronous>, transform_indices = @transform_13, window_bounds = array<i64: 8, 1>}, {pipeline_mode = #tpu.pipeline_mode<synchronous>, transform_indices = @transform_14, window_bounds = array<i64: 2, 1, 128>}, {pipeline_mode = #tpu.pipeline_mode<synchronous>, transform_indices = @transform_15, window_bounds = array<i64: 1024, 10>}, {pipeline_mode = #tpu.pipeline_mode<synchronous>, transform_indices = @transform_16, window_bounds = array<i64: 1, 10>}, {pipeline_mode = #tpu.pipeline_mode<synchronous>, transform_indices = @transform_17, window_bounds = array<i64: 2, 10>}]} {
    %c0_i32 = arith.constant 0 : i32
    %0 = arith.cmpi eq, %arg0, %c0_i32 : i32
    %1 = arith.extui %0 : i1 to i32
    %c0_i32_0 = arith.constant 0 : i32
    %2 = arith.cmpi ne, %1, %c0_i32_0 : i32
    scf.if %2 {
      %c0_100 = arith.constant 0 : index
      %c0_101 = arith.constant 0 : index
      %170 = vector.load %arg1[%c0_100, %c0_101] : memref<8x128xf32, #tpu.memory_space<vmem>>, vector<8x128xf32>
      %c0_102 = arith.constant 0 : index
      %c0_103 = arith.constant 0 : index
      %171 = vector.load %arg19[%c0_102, %c0_103] : memref<8x128xf32, #tpu.memory_space<vmem>>, vector<8x128xf32>
      tpu.vector_store %arg19[%c0_102, %c0_103], %170 {strides = array<i32>} : memref<8x128xf32, #tpu.memory_space<vmem>>, vector<8x128xf32>,
    } else {
    }
    %c0 = arith.constant 0 : index
    %c0_1 = arith.constant 0 : index
    %3 = vector.load %arg19[%c0, %c0_1] : memref<8x128xf32, #tpu.memory_space<vmem>>, vector<8x128xf32>
    %c9_i32 = arith.constant 9 : i32
    %4 = tpu.dynamic_rotate %3 by %c9_i32 dim 1 : vector<8x128xf32>, i32 -> vector<8x128xf32>
    %c0_2 = arith.constant 0 : index
    %c0_3 = arith.constant 0 : index
    %c0_4 = arith.constant 0 : index
    %5 = vector.load %arg2[%c0_2, %c0_3, %c0_4] : memref<9x1x128xf32, #tpu.memory_space<vmem>>, vector<1x1x128xf32>
    %6 = vector.shape_cast %5 : vector<1x1x128xf32> to vector<1x128xf32>
    %7 = vector.broadcast %6 : vector<1x128xf32> to vector<8x128xf32>
    %8 = arith.mulf %4, %7 : vector<8x128xf32>
    %c8_i32 = arith.constant 8 : i32
    %9 = tpu.dynamic_rotate %3 by %c8_i32 dim 1 : vector<8x128xf32>, i32 -> vector<8x128xf32>
    %c1 = arith.constant 1 : index
    %c0_5 = arith.constant 0 : index
    %c0_6 = arith.constant 0 : index
    %10 = vector.load %arg2[%c1, %c0_5, %c0_6] : memref<9x1x128xf32, #tpu.memory_space<vmem>>, vector<1x1x128xf32>
    %11 = vector.shape_cast %10 : vector<1x1x128xf32> to vector<1x128xf32>
    %12 = vector.broadcast %11 : vector<1x128xf32> to vector<8x128xf32>
    %13 = arith.mulf %9, %12 : vector<8x128xf32>
    %c7_i32 = arith.constant 7 : i32
    %14 = tpu.dynamic_rotate %3 by %c7_i32 dim 1 : vector<8x128xf32>, i32 -> vector<8x128xf32>
    %c2 = arith.constant 2 : index
    %c0_7 = arith.constant 0 : index
    %c0_8 = arith.constant 0 : index
    %15 = vector.load %arg2[%c2, %c0_7, %c0_8] : memref<9x1x128xf32, #tpu.memory_space<vmem>>, vector<1x1x128xf32>
    %16 = vector.shape_cast %15 : vector<1x1x128xf32> to vector<1x128xf32>
    %17 = vector.broadcast %16 : vector<1x128xf32> to vector<8x128xf32>
    %18 = arith.mulf %14, %17 : vector<8x128xf32>
    %c1_i32 = arith.constant 1 : i32
    %19 = tpu.dynamic_rotate %3 by %c1_i32 dim 1 : vector<8x128xf32>, i32 -> vector<8x128xf32>
    %c3 = arith.constant 3 : index
    %c0_9 = arith.constant 0 : index
    %c0_10 = arith.constant 0 : index
    %20 = vector.load %arg2[%c3, %c0_9, %c0_10] : memref<9x1x128xf32, #tpu.memory_space<vmem>>, vector<1x1x128xf32>
    %21 = vector.shape_cast %20 : vector<1x1x128xf32> to vector<1x128xf32>
    %22 = vector.broadcast %21 : vector<1x128xf32> to vector<8x128xf32>
    %23 = arith.mulf %19, %22 : vector<8x128xf32>
    %c4 = arith.constant 4 : index
    %c0_11 = arith.constant 0 : index
    %c0_12 = arith.constant 0 : index
    %24 = vector.load %arg2[%c4, %c0_11, %c0_12] : memref<9x1x128xf32, #tpu.memory_space<vmem>>, vector<1x1x128xf32>
    %25 = vector.shape_cast %24 : vector<1x1x128xf32> to vector<1x128xf32>
    %26 = vector.broadcast %25 : vector<1x128xf32> to vector<8x128xf32>
    %27 = arith.mulf %3, %26 : vector<8x128xf32>
    %c127_i32 = arith.constant 127 : i32
    %28 = tpu.dynamic_rotate %3 by %c127_i32 dim 1 : vector<8x128xf32>, i32 -> vector<8x128xf32>
    %c5 = arith.constant 5 : index
    %c0_13 = arith.constant 0 : index
    %c0_14 = arith.constant 0 : index
    %29 = vector.load %arg2[%c5, %c0_13, %c0_14] : memref<9x1x128xf32, #tpu.memory_space<vmem>>, vector<1x1x128xf32>
    %30 = vector.shape_cast %29 : vector<1x1x128xf32> to vector<1x128xf32>
    %31 = vector.broadcast %30 : vector<1x128xf32> to vector<8x128xf32>
    %32 = arith.mulf %28, %31 : vector<8x128xf32>
    %c121_i32 = arith.constant 121 : i32
    %33 = tpu.dynamic_rotate %3 by %c121_i32 dim 1 : vector<8x128xf32>, i32 -> vector<8x128xf32>
    %c6 = arith.constant 6 : index
    %c0_15 = arith.constant 0 : index
    %c0_16 = arith.constant 0 : index
    %34 = vector.load %arg2[%c6, %c0_15, %c0_16] : memref<9x1x128xf32, #tpu.memory_space<vmem>>, vector<1x1x128xf32>
    %35 = vector.shape_cast %34 : vector<1x1x128xf32> to vector<1x128xf32>
    %36 = vector.broadcast %35 : vector<1x128xf32> to vector<8x128xf32>
    %37 = arith.mulf %33, %36 : vector<8x128xf32>
    %c120_i32 = arith.constant 120 : i32
    %38 = tpu.dynamic_rotate %3 by %c120_i32 dim 1 : vector<8x128xf32>, i32 -> vector<8x128xf32>
    %c7 = arith.constant 7 : index
    %c0_17 = arith.constant 0 : index
    %c0_18 = arith.constant 0 : index
    %39 = vector.load %arg2[%c7, %c0_17, %c0_18] : memref<9x1x128xf32, #tpu.memory_space<vmem>>, vector<1x1x128xf32>
    %40 = vector.shape_cast %39 : vector<1x1x128xf32> to vector<1x128xf32>
    %41 = vector.broadcast %40 : vector<1x128xf32> to vector<8x128xf32>
    %42 = arith.mulf %38, %41 : vector<8x128xf32>
    %c119_i32 = arith.constant 119 : i32
    %43 = tpu.dynamic_rotate %3 by %c119_i32 dim 1 : vector<8x128xf32>, i32 -> vector<8x128xf32>
    %c8 = arith.constant 8 : index
    %c0_19 = arith.constant 0 : index
    %c0_20 = arith.constant 0 : index
    %44 = vector.load %arg2[%c8, %c0_19, %c0_20] : memref<9x1x128xf32, #tpu.memory_space<vmem>>, vector<1x1x128xf32>
    %45 = vector.shape_cast %44 : vector<1x1x128xf32> to vector<1x128xf32>
    %46 = vector.broadcast %45 : vector<1x128xf32> to vector<8x128xf32>
    %47 = arith.mulf %43, %46 : vector<8x128xf32>
    %48 = tpu.concatenate %8, %13, %18, %23, %27, %32, %37, %42, %47 in 0 : vector<8x128xf32>, vector<8x128xf32>, vector<8x128xf32>, vector<8x128xf32>, vector<8x128xf32>, vector<8x128xf32>, vector<8x128xf32>, vector<8x128xf32>, vector<8x128xf32> -> vector<72x128xf32>
    %c0_21 = arith.constant 0 : index
    %c0_22 = arith.constant 0 : index
    %49 = vector.load %arg3[%c0_21, %c0_22] : memref<8x72xf32, #tpu.memory_space<vmem>>, vector<8x72xf32>
    %cst = arith.constant dense<0.000000e+00> : vector<8x128xf32>
    %50 = tpu.matmul %49, %48, %cst {dimension_numbers = #tpu.dot_dimension_numbers<[1], [0], [0], [1], [0, 0, 1, 1], [], []>} : vector<8x72xf32>, vector<72x128xf32>, vector<8x128xf32> -> vector<8x128xf32>
    %c0_23 = arith.constant 0 : index
    %c0_24 = arith.constant 0 : index
    %51 = vector.load %arg4[%c0_23, %c0_24] : memref<8x1xf32, #tpu.memory_space<vmem>>, vector<8x1xf32>
    %52 = vector.broadcast %51 : vector<8x1xf32> to vector<8x128xf32>
    %53 = arith.addf %50, %52 : vector<8x128xf32>
    %cst_25 = arith.constant 0.000000e+00 : f32
    %54 = vector.broadcast %cst_25 : f32 to vector<8x128xf32>
    %55 = arith.maximumf %53, %54 : vector<8x128xf32>
    %cst_26 = arith.constant dense<0.000000e+00> : vector<128xf32>
    %56 = vector.multi_reduction <add>, %55, %cst_26 [0] : vector<8x128xf32> to vector<128xf32>
    %57 = vector.shape_cast %56 : vector<128xf32> to vector<1x128xf32>
    %cst_27 = arith.constant 8.000000e+00 : f32
    %58 = vector.broadcast %cst_27 : f32 to vector<1x128xf32>
    %59 = arith.divf %57, %58 : vector<1x128xf32>
    %60 = vector.broadcast %59 : vector<1x128xf32> to vector<8x128xf32>
    %61 = arith.subf %55, %60 : vector<8x128xf32>
    %62 = arith.mulf %61, %61 : vector<8x128xf32>
    %cst_28 = arith.constant dense<0.000000e+00> : vector<128xf32>
    %63 = vector.multi_reduction <add>, %62, %cst_28 [0] : vector<8x128xf32> to vector<128xf32>
    %64 = vector.shape_cast %63 : vector<128xf32> to vector<1x128xf32>
    %cst_29 = arith.constant 8.000000e+00 : f32
    %65 = vector.broadcast %cst_29 : f32 to vector<1x128xf32>
    %66 = arith.divf %64, %65 : vector<1x128xf32>
    %cst_30 = arith.constant 9.99999974E-6 : f32
    %67 = vector.broadcast %cst_30 : f32 to vector<1x128xf32>
    %68 = arith.addf %66, %67 : vector<1x128xf32>
    %69 = math.rsqrt %68 : vector<1x128xf32>
    %70 = vector.broadcast %69 : vector<1x128xf32> to vector<8x128xf32>
    %71 = arith.mulf %61, %70 : vector<8x128xf32>
    %c0_31 = arith.constant 0 : index
    %c0_32 = arith.constant 0 : index
    %72 = vector.load %arg5[%c0_31, %c0_32] : memref<8x1xf32, #tpu.memory_space<vmem>>, vector<8x1xf32>
    %73 = vector.broadcast %72 : vector<8x1xf32> to vector<8x128xf32>
    %74 = arith.mulf %71, %73 : vector<8x128xf32>
    %c0_33 = arith.constant 0 : index
    %c0_34 = arith.constant 0 : index
    %75 = vector.load %arg6[%c0_33, %c0_34] : memref<8x1xf32, #tpu.memory_space<vmem>>, vector<8x1xf32>
    %76 = vector.broadcast %75 : vector<8x1xf32> to vector<8x128xf32>
    %77 = arith.addf %74, %76 : vector<8x128xf32>
    %c0_35 = arith.constant 0 : index
    %c0_36 = arith.constant 0 : index
    %78 = vector.load %arg7[%c0_35, %c0_36] : memref<8x8xf32, #tpu.memory_space<vmem>>, vector<8x8xf32>
    %cst_37 = arith.constant dense<0.000000e+00> : vector<8x128xf32>
    %79 = tpu.matmul %78, %77, %cst_37 {dimension_numbers = #tpu.dot_dimension_numbers<[1], [0], [0], [1], [0, 0, 1, 1], [], []>} : vector<8x8xf32>, vector<8x128xf32>, vector<8x128xf32> -> vector<8x128xf32>
    %c0_38 = arith.constant 0 : index
    %c0_39 = arith.constant 0 : index
    %80 = vector.load %arg8[%c0_38, %c0_39] : memref<8x1xf32, #tpu.memory_space<vmem>>, vector<8x1xf32>
    %81 = vector.broadcast %80 : vector<8x1xf32> to vector<8x128xf32>
    %82 = arith.addf %79, %81 : vector<8x128xf32>
    %cst_40 = arith.constant 0.000000e+00 : f32
    %83 = vector.broadcast %cst_40 : f32 to vector<8x128xf32>
    %84 = arith.maximumf %82, %83 : vector<8x128xf32>
    %c0_41 = arith.constant 0 : index
    %c0_42 = arith.constant 0 : index
    %85 = vector.load %arg9[%c0_41, %c0_42] : memref<8x8xf32, #tpu.memory_space<vmem>>, vector<8x8xf32>
    %cst_43 = arith.constant dense<0.000000e+00> : vector<8x128xf32>
    %86 = tpu.matmul %85, %84, %cst_43 {dimension_numbers = #tpu.dot_dimension_numbers<[1], [0], [0], [1], [0, 0, 1, 1], [], []>} : vector<8x8xf32>, vector<8x128xf32>, vector<8x128xf32> -> vector<8x128xf32>
    %c0_44 = arith.constant 0 : index
    %c0_45 = arith.constant 0 : index
    %87 = vector.load %arg10[%c0_44, %c0_45] : memref<8x1xf32, #tpu.memory_space<vmem>>, vector<8x1xf32>
    %88 = vector.broadcast %87 : vector<8x1xf32> to vector<8x128xf32>
    %89 = arith.addf %86, %88 : vector<8x128xf32>
    %90 = arith.addf %89, %77 : vector<8x128xf32>
    %cst_46 = arith.constant dense<0.000000e+00> : vector<128xf32>
    %91 = vector.multi_reduction <add>, %90, %cst_46 [0] : vector<8x128xf32> to vector<128xf32>
    %92 = vector.shape_cast %91 : vector<128xf32> to vector<1x128xf32>
    %cst_47 = arith.constant 8.000000e+00 : f32
    %93 = vector.broadcast %cst_47 : f32 to vector<1x128xf32>
    %94 = arith.divf %92, %93 : vector<1x128xf32>
    %95 = vector.broadcast %94 : vector<1x128xf32> to vector<8x128xf32>
    %96 = arith.subf %90, %95 : vector<8x128xf32>
    %97 = arith.mulf %96, %96 : vector<8x128xf32>
    %cst_48 = arith.constant dense<0.000000e+00> : vector<128xf32>
    %98 = vector.multi_reduction <add>, %97, %cst_48 [0] : vector<8x128xf32> to vector<128xf32>
    %99 = vector.shape_cast %98 : vector<128xf32> to vector<1x128xf32>
    %cst_49 = arith.constant 8.000000e+00 : f32
    %100 = vector.broadcast %cst_49 : f32 to vector<1x128xf32>
    %101 = arith.divf %99, %100 : vector<1x128xf32>
    %cst_50 = arith.constant 9.99999974E-6 : f32
    %102 = vector.broadcast %cst_50 : f32 to vector<1x128xf32>
    %103 = arith.addf %101, %102 : vector<1x128xf32>
    %104 = math.rsqrt %103 : vector<1x128xf32>
    %105 = vector.broadcast %104 : vector<1x128xf32> to vector<8x128xf32>
    %106 = arith.mulf %96, %105 : vector<8x128xf32>
    %c0_51 = arith.constant 0 : index
    %c0_52 = arith.constant 0 : index
    %107 = vector.load %arg11[%c0_51, %c0_52] : memref<8x1xf32, #tpu.memory_space<vmem>>, vector<8x1xf32>
    %108 = vector.broadcast %107 : vector<8x1xf32> to vector<8x128xf32>
    %109 = arith.mulf %106, %108 : vector<8x128xf32>
    %c0_53 = arith.constant 0 : index
    %c0_54 = arith.constant 0 : index
    %110 = vector.load %arg12[%c0_53, %c0_54] : memref<8x1xf32, #tpu.memory_space<vmem>>, vector<8x1xf32>
    %111 = vector.broadcast %110 : vector<8x1xf32> to vector<8x128xf32>
    %112 = arith.addf %109, %111 : vector<8x128xf32>
    %c9_i32_55 = arith.constant 9 : i32
    %113 = tpu.dynamic_rotate %112 by %c9_i32_55 dim 1 : vector<8x128xf32>, i32 -> vector<8x128xf32>
    %c0_56 = arith.constant 0 : index
    %c0_57 = arith.constant 0 : index
    %c0_58 = arith.constant 0 : index
    %114 = vector.load %arg2[%c0_56, %c0_57, %c0_58] : memref<9x1x128xf32, #tpu.memory_space<vmem>>, vector<1x1x128xf32>
    %115 = vector.shape_cast %114 : vector<1x1x128xf32> to vector<1x128xf32>
    %116 = vector.broadcast %115 : vector<1x128xf32> to vector<8x128xf32>
    %117 = arith.mulf %113, %116 : vector<8x128xf32>
    %c8_i32_59 = arith.constant 8 : i32
    %118 = tpu.dynamic_rotate %112 by %c8_i32_59 dim 1 : vector<8x128xf32>, i32 -> vector<8x128xf32>
    %c1_60 = arith.constant 1 : index
    %c0_61 = arith.constant 0 : index
    %c0_62 = arith.constant 0 : index
    %119 = vector.load %arg2[%c1_60, %c0_61, %c0_62] : memref<9x1x128xf32, #tpu.memory_space<vmem>>, vector<1x1x128xf32>
    %120 = vector.shape_cast %119 : vector<1x1x128xf32> to vector<1x128xf32>
    %121 = vector.broadcast %120 : vector<1x128xf32> to vector<8x128xf32>
    %122 = arith.mulf %118, %121 : vector<8x128xf32>
    %c7_i32_63 = arith.constant 7 : i32
    %123 = tpu.dynamic_rotate %112 by %c7_i32_63 dim 1 : vector<8x128xf32>, i32 -> vector<8x128xf32>
    %c2_64 = arith.constant 2 : index
    %c0_65 = arith.constant 0 : index
    %c0_66 = arith.constant 0 : index
    %124 = vector.load %arg2[%c2_64, %c0_65, %c0_66] : memref<9x1x128xf32, #tpu.memory_space<vmem>>, vector<1x1x128xf32>
    %125 = vector.shape_cast %124 : vector<1x1x128xf32> to vector<1x128xf32>
    %126 = vector.broadcast %125 : vector<1x128xf32> to vector<8x128xf32>
    %127 = arith.mulf %123, %126 : vector<8x128xf32>
    %c1_i32_67 = arith.constant 1 : i32
    %128 = tpu.dynamic_rotate %112 by %c1_i32_67 dim 1 : vector<8x128xf32>, i32 -> vector<8x128xf32>
    %c3_68 = arith.constant 3 : index
    %c0_69 = arith.constant 0 : index
    %c0_70 = arith.constant 0 : index
    %129 = vector.load %arg2[%c3_68, %c0_69, %c0_70] : memref<9x1x128xf32, #tpu.memory_space<vmem>>, vector<1x1x128xf32>
    %130 = vector.shape_cast %129 : vector<1x1x128xf32> to vector<1x128xf32>
    %131 = vector.broadcast %130 : vector<1x128xf32> to vector<8x128xf32>
    %132 = arith.mulf %128, %131 : vector<8x128xf32>
    %c4_71 = arith.constant 4 : index
    %c0_72 = arith.constant 0 : index
    %c0_73 = arith.constant 0 : index
    %133 = vector.load %arg2[%c4_71, %c0_72, %c0_73] : memref<9x1x128xf32, #tpu.memory_space<vmem>>, vector<1x1x128xf32>
    %134 = vector.shape_cast %133 : vector<1x1x128xf32> to vector<1x128xf32>
    %135 = vector.broadcast %134 : vector<1x128xf32> to vector<8x128xf32>
    %136 = arith.mulf %112, %135 : vector<8x128xf32>
    %c127_i32_74 = arith.constant 127 : i32
    %137 = tpu.dynamic_rotate %112 by %c127_i32_74 dim 1 : vector<8x128xf32>, i32 -> vector<8x128xf32>
    %c5_75 = arith.constant 5 : index
    %c0_76 = arith.constant 0 : index
    %c0_77 = arith.constant 0 : index
    %138 = vector.load %arg2[%c5_75, %c0_76, %c0_77] : memref<9x1x128xf32, #tpu.memory_space<vmem>>, vector<1x1x128xf32>
    %139 = vector.shape_cast %138 : vector<1x1x128xf32> to vector<1x128xf32>
    %140 = vector.broadcast %139 : vector<1x128xf32> to vector<8x128xf32>
    %141 = arith.mulf %137, %140 : vector<8x128xf32>
    %c121_i32_78 = arith.constant 121 : i32
    %142 = tpu.dynamic_rotate %112 by %c121_i32_78 dim 1 : vector<8x128xf32>, i32 -> vector<8x128xf32>
    %c6_79 = arith.constant 6 : index
    %c0_80 = arith.constant 0 : index
    %c0_81 = arith.constant 0 : index
    %143 = vector.load %arg2[%c6_79, %c0_80, %c0_81] : memref<9x1x128xf32, #tpu.memory_space<vmem>>, vector<1x1x128xf32>
    %144 = vector.shape_cast %143 : vector<1x1x128xf32> to vector<1x128xf32>
    %145 = vector.broadcast %144 : vector<1x128xf32> to vector<8x128xf32>
    %146 = arith.mulf %142, %145 : vector<8x128xf32>
    %c120_i32_82 = arith.constant 120 : i32
    %147 = tpu.dynamic_rotate %112 by %c120_i32_82 dim 1 : vector<8x128xf32>, i32 -> vector<8x128xf32>
    %c7_83 = arith.constant 7 : index
    %c0_84 = arith.constant 0 : index
    %c0_85 = arith.constant 0 : index
    %148 = vector.load %arg2[%c7_83, %c0_84, %c0_85] : memref<9x1x128xf32, #tpu.memory_space<vmem>>, vector<1x1x128xf32>
    %149 = vector.shape_cast %148 : vector<1x1x128xf32> to vector<1x128xf32>
    %150 = vector.broadcast %149 : vector<1x128xf32> to vector<8x128xf32>
    %151 = arith.mulf %147, %150 : vector<8x128xf32>
    %c119_i32_86 = arith.constant 119 : i32
    %152 = tpu.dynamic_rotate %112 by %c119_i32_86 dim 1 : vector<8x128xf32>, i32 -> vector<8x128xf32>
    %c8_87 = arith.constant 8 : index
    %c0_88 = arith.constant 0 : index
    %c0_89 = arith.constant 0 : index
    %153 = vector.load %arg2[%c8_87, %c0_88, %c0_89] : memref<9x1x128xf32, #tpu.memory_space<vmem>>, vector<1x1x128xf32>
    %154 = vector.shape_cast %153 : vector<1x1x128xf32> to vector<1x128xf32>
    %155 = vector.broadcast %154 : vector<1x128xf32> to vector<8x128xf32>
    %156 = arith.mulf %152, %155 : vector<8x128xf32>
    %157 = tpu.concatenate %117, %122, %127, %132, %136, %141, %146, %151, %156 in 0 : vector<8x128xf32>, vector<8x128xf32>, vector<8x128xf32>, vector<8x128xf32>, vector<8x128xf32>, vector<8x128xf32>, vector<8x128xf32>, vector<8x128xf32>, vector<8x128xf32> -> vector<72x128xf32>
    %c0_90 = arith.constant 0 : index
    %c0_91 = arith.constant 0 : index
    %158 = vector.load %arg13[%c0_90, %c0_91] : memref<8x72xf32, #tpu.memory_space<vmem>>, vector<8x72xf32>
    %cst_92 = arith.constant dense<0.000000e+00> : vector<8x128xf32>
    %159 = tpu.matmul %158, %157, %cst_92 {dimension_numbers = #tpu.dot_dimension_numbers<[1], [0], [0], [1], [0, 0, 1, 1], [], []>} : vector<8x72xf32>, vector<72x128xf32>, vector<8x128xf32> -> vector<8x128xf32>
    %c0_93 = arith.constant 0 : index
    %c0_94 = arith.constant 0 : index
    %160 = vector.load %arg14[%c0_93, %c0_94] : memref<8x1xf32, #tpu.memory_space<vmem>>, vector<8x1xf32>
    %161 = vector.broadcast %160 : vector<8x1xf32> to vector<8x128xf32>
    %162 = arith.addf %159, %161 : vector<8x128xf32>
    %cst_95 = arith.constant 0.000000e+00 : f32
    %163 = vector.broadcast %cst_95 : f32 to vector<8x128xf32>
    %164 = arith.maximumf %162, %163 : vector<8x128xf32>
    %165 = arith.addf %164, %3 : vector<8x128xf32>
    %c0_96 = arith.constant 0 : index
    %c0_97 = arith.constant 0 : index
    %166 = vector.load %arg19[%c0_96, %c0_97] : memref<8x128xf32, #tpu.memory_space<vmem>>, vector<8x128xf32>
    tpu.vector_store %arg19[%c0_96, %c0_97], %165 {strides = array<i32>} : memref<8x128xf32, #tpu.memory_space<vmem>>, vector<8x128xf32>,
    %c1_i32_98 = arith.constant 1 : i32
    %167 = arith.cmpi eq, %arg0, %c1_i32_98 : i32
    %168 = arith.extui %167 : i1 to i32
    %c0_i32_99 = arith.constant 0 : i32
    %169 = arith.cmpi ne, %168, %c0_i32_99 : i32
    scf.if %169 {
      %c0_100 = arith.constant 0 : index
      %c0_101 = arith.constant 0 : index
      %c0_102 = arith.constant 0 : index
      %170 = vector.load %arg15[%c0_100, %c0_101, %c0_102] : memref<2x1x128xf32, #tpu.memory_space<vmem>>, vector<1x1x128xf32>
      %171 = vector.shape_cast %170 : vector<1x1x128xf32> to vector<1x128xf32>
      %172 = vector.broadcast %171 : vector<1x128xf32> to vector<8x128xf32>
      %173 = arith.mulf %165, %172 : vector<8x128xf32>
      %cst_103 = arith.constant dense<0.000000e+00> : vector<8xf32>
      %174 = vector.multi_reduction <add>, %173, %cst_103 [1] : vector<8x128xf32> to vector<8xf32>
      %175 = vector.shape_cast %174 : vector<8xf32> to vector<8x1xf32>
      %cst_104 = arith.constant dense<0.000000e+00> : vector<1xf32>
      %176 = vector.multi_reduction <add>, %175, %cst_104 [0] : vector<8x1xf32> to vector<1xf32>
      %177 = vector.shape_cast %176 : vector<1xf32> to vector<1x1xf32>
      %cst_105 = arith.constant 0.001953125 : f32
      %178 = vector.broadcast %cst_105 : f32 to vector<1x1xf32>
      %179 = arith.mulf %177, %178 : vector<1x1xf32>
      %180 = vector.broadcast %179 : vector<1x1xf32> to vector<8x128xf32>
      %181 = arith.subf %165, %180 : vector<8x128xf32>
      %182 = vector.broadcast %171 : vector<1x128xf32> to vector<8x128xf32>
      %183 = arith.mulf %181, %182 : vector<8x128xf32>
      %184 = arith.mulf %183, %183 : vector<8x128xf32>
      %cst_106 = arith.constant dense<0.000000e+00> : vector<8xf32>
      %185 = vector.multi_reduction <add>, %184, %cst_106 [1] : vector<8x128xf32> to vector<8xf32>
      %186 = vector.shape_cast %185 : vector<8xf32> to vector<8x1xf32>
      %cst_107 = arith.constant dense<0.000000e+00> : vector<1xf32>
      %187 = vector.multi_reduction <add>, %186, %cst_107 [0] : vector<8x1xf32> to vector<1xf32>
      %188 = vector.shape_cast %187 : vector<1xf32> to vector<1x1xf32>
      %cst_108 = arith.constant 0.001953125 : f32
      %189 = vector.broadcast %cst_108 : f32 to vector<1x1xf32>
      %190 = arith.mulf %188, %189 : vector<1x1xf32>
      %cst_109 = arith.constant 9.99999974E-6 : f32
      %191 = vector.broadcast %cst_109 : f32 to vector<1x1xf32>
      %192 = arith.addf %190, %191 : vector<1x1xf32>
      %193 = math.rsqrt %192 : vector<1x1xf32>
      %194 = vector.broadcast %193 : vector<1x1xf32> to vector<8x128xf32>
      %195 = arith.mulf %183, %194 : vector<8x128xf32>
      %196 = vector.extract_strided_slice %195 {offsets = [0, 0], sizes = [1, 128], strides = [1, 1]} : vector<8x128xf32> to vector<1x128xf32>
      %197 = vector.extract_strided_slice %195 {offsets = [1, 0], sizes = [1, 128], strides = [1, 1]} : vector<8x128xf32> to vector<1x128xf32>
      %198 = vector.extract_strided_slice %195 {offsets = [2, 0], sizes = [1, 128], strides = [1, 1]} : vector<8x128xf32> to vector<1x128xf32>
      %199 = vector.extract_strided_slice %195 {offsets = [3, 0], sizes = [1, 128], strides = [1, 1]} : vector<8x128xf32> to vector<1x128xf32>
      %200 = vector.extract_strided_slice %195 {offsets = [4, 0], sizes = [1, 128], strides = [1, 1]} : vector<8x128xf32> to vector<1x128xf32>
      %201 = vector.extract_strided_slice %195 {offsets = [5, 0], sizes = [1, 128], strides = [1, 1]} : vector<8x128xf32> to vector<1x128xf32>
      %202 = vector.extract_strided_slice %195 {offsets = [6, 0], sizes = [1, 128], strides = [1, 1]} : vector<8x128xf32> to vector<1x128xf32>
      %203 = vector.extract_strided_slice %195 {offsets = [7, 0], sizes = [1, 128], strides = [1, 1]} : vector<8x128xf32> to vector<1x128xf32>
      %204 = tpu.concatenate %196, %197, %198, %199, %200, %201, %202, %203 in 1 : vector<1x128xf32>, vector<1x128xf32>, vector<1x128xf32>, vector<1x128xf32>, vector<1x128xf32>, vector<1x128xf32>, vector<1x128xf32>, vector<1x128xf32> -> vector<1x1024xf32>
      %c1_110 = arith.constant 1 : index
      %c0_111 = arith.constant 0 : index
      %c0_112 = arith.constant 0 : index
      %205 = vector.load %arg15[%c1_110, %c0_111, %c0_112] : memref<2x1x128xf32, #tpu.memory_space<vmem>>, vector<1x1x128xf32>
      %206 = vector.shape_cast %205 : vector<1x1x128xf32> to vector<1x128xf32>
      %207 = vector.broadcast %206 : vector<1x128xf32> to vector<8x128xf32>
      %208 = arith.mulf %165, %207 : vector<8x128xf32>
      %cst_113 = arith.constant dense<0.000000e+00> : vector<8xf32>
      %209 = vector.multi_reduction <add>, %208, %cst_113 [1] : vector<8x128xf32> to vector<8xf32>
      %210 = vector.shape_cast %209 : vector<8xf32> to vector<8x1xf32>
      %cst_114 = arith.constant dense<0.000000e+00> : vector<1xf32>
      %211 = vector.multi_reduction <add>, %210, %cst_114 [0] : vector<8x1xf32> to vector<1xf32>
      %212 = vector.shape_cast %211 : vector<1xf32> to vector<1x1xf32>
      %cst_115 = arith.constant 0.001953125 : f32
      %213 = vector.broadcast %cst_115 : f32 to vector<1x1xf32>
      %214 = arith.mulf %212, %213 : vector<1x1xf32>
      %215 = vector.broadcast %214 : vector<1x1xf32> to vector<8x128xf32>
      %216 = arith.subf %165, %215 : vector<8x128xf32>
      %217 = vector.broadcast %206 : vector<1x128xf32> to vector<8x128xf32>
      %218 = arith.mulf %216, %217 : vector<8x128xf32>
      %219 = arith.mulf %218, %218 : vector<8x128xf32>
      %cst_116 = arith.constant dense<0.000000e+00> : vector<8xf32>
      %220 = vector.multi_reduction <add>, %219, %cst_116 [1] : vector<8x128xf32> to vector<8xf32>
      %221 = vector.shape_cast %220 : vector<8xf32> to vector<8x1xf32>
      %cst_117 = arith.constant dense<0.000000e+00> : vector<1xf32>
      %222 = vector.multi_reduction <add>, %221, %cst_117 [0] : vector<8x1xf32> to vector<1xf32>
      %223 = vector.shape_cast %222 : vector<1xf32> to vector<1x1xf32>
      %cst_118 = arith.constant 0.001953125 : f32
      %224 = vector.broadcast %cst_118 : f32 to vector<1x1xf32>
      %225 = arith.mulf %223, %224 : vector<1x1xf32>
      %cst_119 = arith.constant 9.99999974E-6 : f32
      %226 = vector.broadcast %cst_119 : f32 to vector<1x1xf32>
      %227 = arith.addf %225, %226 : vector<1x1xf32>
      %228 = math.rsqrt %227 : vector<1x1xf32>
      %229 = vector.broadcast %228 : vector<1x1xf32> to vector<8x128xf32>
      %230 = arith.mulf %218, %229 : vector<8x128xf32>
      %231 = vector.extract_strided_slice %230 {offsets = [0, 0], sizes = [1, 128], strides = [1, 1]} : vector<8x128xf32> to vector<1x128xf32>
      %232 = vector.extract_strided_slice %230 {offsets = [1, 0], sizes = [1, 128], strides = [1, 1]} : vector<8x128xf32> to vector<1x128xf32>
      %233 = vector.extract_strided_slice %230 {offsets = [2, 0], sizes = [1, 128], strides = [1, 1]} : vector<8x128xf32> to vector<1x128xf32>
      %234 = vector.extract_strided_slice %230 {offsets = [3, 0], sizes = [1, 128], strides = [1, 1]} : vector<8x128xf32> to vector<1x128xf32>
      %235 = vector.extract_strided_slice %230 {offsets = [4, 0], sizes = [1, 128], strides = [1, 1]} : vector<8x128xf32> to vector<1x128xf32>
      %236 = vector.extract_strided_slice %230 {offsets = [5, 0], sizes = [1, 128], strides = [1, 1]} : vector<8x128xf32> to vector<1x128xf32>
      %237 = vector.extract_strided_slice %230 {offsets = [6, 0], sizes = [1, 128], strides = [1, 1]} : vector<8x128xf32> to vector<1x128xf32>
      %238 = vector.extract_strided_slice %230 {offsets = [7, 0], sizes = [1, 128], strides = [1, 1]} : vector<8x128xf32> to vector<1x128xf32>
      %239 = tpu.concatenate %231, %232, %233, %234, %235, %236, %237, %238 in 1 : vector<1x128xf32>, vector<1x128xf32>, vector<1x128xf32>, vector<1x128xf32>, vector<1x128xf32>, vector<1x128xf32>, vector<1x128xf32>, vector<1x128xf32> -> vector<1x1024xf32>
      %240 = tpu.concatenate %204, %239 in 0 : vector<1x1024xf32>, vector<1x1024xf32> -> vector<2x1024xf32>
      %c0_120 = arith.constant 0 : index
      %c0_121 = arith.constant 0 : index
      %241 = vector.load %arg16[%c0_120, %c0_121] : memref<1024x10xf32, #tpu.memory_space<vmem>>, vector<1024x10xf32>
      %cst_122 = arith.constant dense<0.000000e+00> : vector<2x10xf32>
      %242 = tpu.matmul %240, %241, %cst_122 {dimension_numbers = #tpu.dot_dimension_numbers<[1], [0], [0], [1], [0, 0, 1, 1], [], []>} : vector<2x1024xf32>, vector<1024x10xf32>, vector<2x10xf32> -> vector<2x10xf32>
      %c0_123 = arith.constant 0 : index
      %c0_124 = arith.constant 0 : index
      %243 = vector.load %arg17[%c0_123, %c0_124] : memref<1x10xf32, #tpu.memory_space<vmem>>, vector<1x10xf32>
      %244 = vector.broadcast %243 : vector<1x10xf32> to vector<2x10xf32>
      %245 = arith.addf %242, %244 : vector<2x10xf32>
      %c0_125 = arith.constant 0 : index
      %c0_126 = arith.constant 0 : index
      %246 = vector.load %arg18[%c0_125, %c0_126] : memref<2x10xf32, #tpu.memory_space<vmem>>, vector<2x10xf32>
      tpu.vector_store %arg18[%c0_125, %c0_126], %245 {strides = array<i32>} : memref<2x10xf32, #tpu.memory_space<vmem>>, vector<2x10xf32>,
    } else {
    }
    return
  }
  func.func @transform_0(%arg0: i32) -> (i32, i32) {
    %c0_i32 = arith.constant 0 : i32
    %c0_i32_0 = arith.constant 0 : i32
    %c0_i32_1 = arith.constant 0 : i32
    return %c0_i32, %c0_i32_0 : i32, i32
  }
  func.func @transform_1(%arg0: i32) -> (i32, i32, i32) {
    %c0_i32 = arith.constant 0 : i32
    %c0_i32_0 = arith.constant 0 : i32
    %c0_i32_1 = arith.constant 0 : i32
    %c0_i32_2 = arith.constant 0 : i32
    return %c0_i32, %c0_i32_0, %c0_i32_1 : i32, i32, i32
  }
  func.func @transform_2(%arg0: i32) -> (i32, i32) {
    %c0_i32 = arith.constant 0 : i32
    %c0_i32_0 = arith.constant 0 : i32
    %c0_i32_1 = arith.constant 0 : i32
    return %c0_i32, %c0_i32_0 : i32, i32
  }
  func.func @transform_3(%arg0: i32) -> (i32, i32) {
    %c0_i32 = arith.constant 0 : i32
    %c0_i32_0 = arith.constant 0 : i32
    %c0_i32_1 = arith.constant 0 : i32
    return %c0_i32, %c0_i32_0 : i32, i32
  }
  func.func @transform_4(%arg0: i32) -> (i32, i32) {
    %c0_i32 = arith.constant 0 : i32
    %c0_i32_0 = arith.constant 0 : i32
    %c0_i32_1 = arith.constant 0 : i32
    return %c0_i32, %c0_i32_0 : i32, i32
  }
  func.func @transform_5(%arg0: i32) -> (i32, i32) {
    %c0_i32 = arith.constant 0 : i32
    %c0_i32_0 = arith.constant 0 : i32
    %c0_i32_1 = arith.constant 0 : i32
    return %c0_i32, %c0_i32_0 : i32, i32
  }
  func.func @transform_6(%arg0: i32) -> (i32, i32) {
    %c0_i32 = arith.constant 0 : i32
    %c0_i32_0 = arith.constant 0 : i32
    %c0_i32_1 = arith.constant 0 : i32
    return %c0_i32, %c0_i32_0 : i32, i32
  }
  func.func @transform_7(%arg0: i32) -> (i32, i32) {
    %c0_i32 = arith.constant 0 : i32
    %c0_i32_0 = arith.constant 0 : i32
    %c0_i32_1 = arith.constant 0 : i32
    return %c0_i32, %c0_i32_0 : i32, i32
  }
  func.func @transform_8(%arg0: i32) -> (i32, i32) {
    %c0_i32 = arith.constant 0 : i32
    %c0_i32_0 = arith.constant 0 : i32
    %c0_i32_1 = arith.constant 0 : i32
    return %c0_i32, %c0_i32_0 : i32, i32
  }
  func.func @transform_9(%arg0: i32) -> (i32, i32) {
    %c0_i32 = arith.constant 0 : i32
    %c0_i32_0 = arith.constant 0 : i32
    %c0_i32_1 = arith.constant 0 : i32
    return %c0_i32, %c0_i32_0 : i32, i32
  }
  func.func @transform_10(%arg0: i32) -> (i32, i32) {
    %c0_i32 = arith.constant 0 : i32
    %c0_i32_0 = arith.constant 0 : i32
    %c0_i32_1 = arith.constant 0 : i32
    return %c0_i32, %c0_i32_0 : i32, i32
  }
  func.func @transform_11(%arg0: i32) -> (i32, i32) {
    %c0_i32 = arith.constant 0 : i32
    %c0_i32_0 = arith.constant 0 : i32
    %c0_i32_1 = arith.constant 0 : i32
    return %c0_i32, %c0_i32_0 : i32, i32
  }
  func.func @transform_12(%arg0: i32) -> (i32, i32) {
    %c0_i32 = arith.constant 0 : i32
    %c0_i32_0 = arith.constant 0 : i32
    %c0_i32_1 = arith.constant 0 : i32
    return %c0_i32, %c0_i32_0 : i32, i32
  }
  func.func @transform_13(%arg0: i32) -> (i32, i32) {
    %c0_i32 = arith.constant 0 : i32
    %c0_i32_0 = arith.constant 0 : i32
    %c0_i32_1 = arith.constant 0 : i32
    return %c0_i32, %c0_i32_0 : i32, i32
  }
  func.func @transform_14(%arg0: i32) -> (i32, i32, i32) {
    %c0_i32 = arith.constant 0 : i32
    %c0_i32_0 = arith.constant 0 : i32
    %c0_i32_1 = arith.constant 0 : i32
    %c0_i32_2 = arith.constant 0 : i32
    return %c0_i32, %c0_i32_0, %c0_i32_1 : i32, i32, i32
  }
  func.func @transform_15(%arg0: i32) -> (i32, i32) {
    %c0_i32 = arith.constant 0 : i32
    %c0_i32_0 = arith.constant 0 : i32
    %c0_i32_1 = arith.constant 0 : i32
    return %c0_i32, %c0_i32_0 : i32, i32
  }
  func.func @transform_16(%arg0: i32) -> (i32, i32) {
    %c0_i32 = arith.constant 0 : i32
    %c0_i32_0 = arith.constant 0 : i32
    %c0_i32_1 = arith.constant 0 : i32
    return %c0_i32, %c0_i32_0 : i32, i32
  }
  func.func @transform_17(%arg0: i32) -> (i32, i32) {
    %c0_i32 = arith.constant 0 : i32
    %c0_i32_0 = arith.constant 0 : i32
    %c0_i32_1 = arith.constant 0 : i32
    return %c0_i32, %c0_i32_0 : i32, i32
  }
}

</mosaic_0001>

<bundles_post_ra>
// kernel: netb_forward.3
= control target key start
LH: loop header
LB: loop body
LE: loop exit
PB: predicated region body
PF: predicated region fallthrough
CT: control target
= control target key end

     0   :  { %vm155_vm0 = vcmask 1042432   ;;  %v780_v3 = vmov 0.0   ;;  %v781_v5 = vmov 0   ;;  %vm151_vm1 = vcmask 613376   ;;  %s1284_s1 = inlined_call_operand.vmem [shape: f32[75,1568], index: 1, kind: input, shape index: {}]   ;;  %s1285_s0 = inlined_call_operand.vmem [shape: f32[8,75], index: 0, kind: input, shape index: {}]   ;;  %s1286_s2 = inlined_call_operand.vmem [shape: f32[8,1], index: 2, kind: input, shape index: {}]   ;;  %s1287_s3 = inlined_call_operand.vmem [shape: f32[8,1568], index: 3, kind: output, shape index: {}]  }
   0x1   :  { %v133_v0 = vld [vmem:[%s1284_s1 + $0x3b0] sm:$0x7]  ;;  %v132_v1 = vld [vmem:[%s1284_s1 + $0x3a8] sm:$0x7]  ;;  %259 = vmatprep.mubr.f32.mxu0 %v780_v3  ;;  %330 = vmatprep.mubr.f32.mxu1 %v780_v3  ;;  %v119_v4 = vld [vmem:[%s1284_s1 + $0x340] sm:$0xff]  ;;  %vm782_vm2 = vmmov 0  }
   0x2   :  { %v120_v2 = vld [vmem:[%s1284_s1 + $0x348] sm:$0xff]  ;;  %722 = vmatprep.subr.msk.mxu0 %vm155_vm0, %v133_v0  ;;  %779 = vset.pattern.permute.xlu0 %v781_v5  ;;  %v107_v6 = vld [vmem:[%s1284_s1 + $0x2e0] sm:$0xff]  ;;  %v106_v7 = vld [vmem:[%s1284_s1 + $0x2d8] sm:$0xff]  ;;  %vm716_vm3 = vcmask 261120  }
   0x3   :  { %723 = vmatpush1.msk.msra.mxu0 %vm155_vm0, %v132_v1  ;;  %v94_v8 = vld [vmem:[%s1284_s1 + $0x278] sm:$0xff]  ;;  %v93_v9 = vld [vmem:[%s1284_s1 + $0x270] sm:$0xff]  ;;  %v135_v10 = vld [vmem:[%s1284_s1 + $0x3c0] sm:$0x7] }
   0x4   :  { %209 = vmatprep.subr.mxu0 %v120_v2  ;;  %v81_v11 = vld [vmem:[%s1284_s1 + $0x210] sm:$0xff]  ;;  %725 = vmatprep.subr.msk.mxu1 %vm155_vm0, %v135_v10  ;;  %v134_v12 = vld [vmem:[%s1284_s1 + $0x3b8] sm:$0x7]  ;;  %v80_v13 = vld [vmem:[%s1284_s1 + $0x208] sm:$0xff] }
   0x5   :  { %210 = vmatpush1.msra.mxu0 %v119_v4  ;;  %726 = vmatpush1.msk.msra.mxu1 %vm155_vm0, %v134_v12  ;;  %v122_v14 = vld [vmem:[%s1284_s1 + $0x358] sm:$0xff]  ;;  %v121_v15 = vld [vmem:[%s1284_s1 + $0x350] sm:$0xff]  ;;  %v68_v16 = vld [vmem:[%s1284_s1 + $0x1a8] sm:$0xff] }
   0x6   :  { %211 = vmatprep.subr.mxu0 %v107_v6  ;;  %280 = vmatprep.subr.mxu1 %v122_v14  ;;  %v109_v17 = vld [vmem:[%s1284_s1 + $0x2f0] sm:$0xff]  ;;  %v67_v18 = vld [vmem:[%s1284_s1 + $0x1a0] sm:$0xff]  ;;  %v108_v19 = vld [vmem:[%s1284_s1 + $0x2e8] sm:$0xff] }
   0x7   :  { %212 = vmatpush1.msra.mxu0 %v106_v7  ;;  %281 = vmatpush1.msra.mxu1 %v121_v15  ;;  %v96_v20 = vld [vmem:[%s1284_s1 + $0x288] sm:$0xff]  ;;  %v55_v21 = vld [vmem:[%s1284_s1 + $0x140] sm:$0xff]  ;;  %v54_v23 = vld [vmem:[%s1284_s1 + $0x138] sm:$0xff] }
   0x8   :  { %213 = vmatprep.subr.mxu0 %v94_v8  ;;  %282 = vmatprep.subr.mxu1 %v109_v17  ;;  %v95_v22 = vld [vmem:[%s1284_s1 + $0x280] sm:$0xff]  ;;  %v42_v25 = vld [vmem:[%s1284_s1 + $0xd8] sm:$0xff]  ;;  %v41_v27 = vld [vmem:[%s1284_s1 + $0xd0] sm:$0xff] }
   0x9   :  { %214 = vmatpush1.msra.mxu0 %v93_v9  ;;  %283 = vmatpush1.msra.mxu1 %v108_v19  ;;  %v83_v24 = vld [vmem:[%s1284_s1 + $0x220] sm:$0xff]  ;;  %v82_v26 = vld [vmem:[%s1284_s1 + $0x218] sm:$0xff]  ;;  %v29_v29 = vld [vmem:[%s1284_s1 + $0x70] sm:$0xff] }
   0xa   :  { %215 = vmatprep.subr.mxu0 %v81_v11  ;;  %284 = vmatprep.subr.mxu1 %v96_v20  ;;  %v70_v28 = vld [vmem:[%s1284_s1 + $0x1b8] sm:$0xff]  ;;  %v69_v30 = vld [vmem:[%s1284_s1 + $0x1b0] sm:$0xff]  ;;  %v28_v31 = vld [vmem:[%s1284_s1 + $0x68] sm:$0xff] }
   0xb   :  { %216 = vmatpush1.msra.mxu0 %v80_v13  ;;  %285 = vmatpush1.msra.mxu1 %v95_v22  ;;  %v57_v32 = vld [vmem:[%s1284_s1 + $0x150] sm:$0xff]  ;;  %v16_v33 = vld [vmem:[%s1284_s1 + $0x8] sm:$0xff]  ;;  %v15_v35 = vld [vmem:[%s1284_s1] sm:$0xff] }
   0xc   :  { %217 = vmatprep.subr.mxu0 %v68_v16  ;;  %286 = vmatprep.subr.mxu1 %v83_v24  ;;  %v56_v34 = vld [vmem:[%s1284_s1 + $0x148] sm:$0xff]  ;;  %v917_v37 = vld [vmem:[%s1285_s0] sm:$0xff]  ;;  %v137_v38 = vld [vmem:[%s1284_s1 + $0x3d0] sm:$0x7] }
   0xd   :  { %218 = vmatpush1.msra.mxu0 %v67_v18  ;;  %287 = vmatpush1.msra.mxu1 %v82_v26  ;;  %v44_v36 = vld [vmem:[%s1284_s1 + $0xe8] sm:$0xff]  ;;  %v43_v40 = vld [vmem:[%s1284_s1 + $0xe0] sm:$0xff]  ;;  %v30_v44 = vld [vmem:[%s1284_s1 + $0x78] sm:$0xff] }
   0xe   :  { %219 = vmatprep.subr.mxu0 %v55_v21  ;;  %288 = vmatprep.subr.mxu1 %v70_v28  ;;  %v136_v39 = vld [vmem:[%s1284_s1 + $0x3c8] sm:$0x7]  ;;  %v31_v42 = vld [vmem:[%s1284_s1 + $0x80] sm:$0xff]  ;;  %v18_v46 = vld [vmem:[%s1284_s1 + $0x18] sm:$0xff] }
   0xf   :  { %220 = vmatpush1.msra.mxu0 %v54_v23  ;;  %289 = vmatpush1.msra.mxu1 %v69_v30  ;;  %v124_v41 = vld [vmem:[%s1284_s1 + $0x368] sm:$0xff]  ;;  %v123_v43 = vld [vmem:[%s1284_s1 + $0x360] sm:$0xff]  ;;  %v110_v47 = vld [vmem:[%s1284_s1 + $0x2f8] sm:$0xff] }
  0x10   :  { %221 = vmatprep.subr.mxu0 %v42_v25  ;;  %290 = vmatprep.subr.mxu1 %v57_v32  ;;  %v111_v45 = vld [vmem:[%s1284_s1 + $0x300] sm:$0xff]  ;;  %v17_v48 = vld [vmem:[%s1284_s1 + $0x10] sm:$0xff]  ;;  %v98_v49 = vld [vmem:[%s1284_s1 + $0x298] sm:$0xff] }
  0x11   :  { %222 = vmatpush1.msra.mxu0 %v41_v27  ;;  %291 = vmatpush1.msra.mxu1 %v56_v34  ;;  %v139_v50 = vld [vmem:[%s1284_s1 + $0x3e0] sm:$0x7]  ;;  %v97_v51 = vld [vmem:[%s1284_s1 + $0x290] sm:$0xff]  ;;  %v138_v53 = vld [vmem:[%s1284_s1 + $0x3d8] sm:$0x7] }
  0x12   :  { %223 = vmatprep.subr.mxu0 %v29_v29  ;;  %292 = vmatprep.subr.mxu1 %v44_v36  ;;  %v85_v52 = vld [vmem:[%s1284_s1 + $0x230] sm:$0xff]  ;;  %v84_v54 = vld [vmem:[%s1284_s1 + $0x228] sm:$0xff]  ;;  %v126_v55 = vld [vmem:[%s1284_s1 + $0x378] sm:$0xff] }
  0x13   :  { %224 = vmatpush1.msra.mxu0 %v28_v31  ;;  %293 = vmatpush1.msra.mxu1 %v43_v40  ;;  %v72_v56 = vld [vmem:[%s1284_s1 + $0x1c8] sm:$0xff]  ;;  %v71_v57 = vld [vmem:[%s1284_s1 + $0x1c0] sm:$0xff]  ;;  %v125_v58 = vld [vmem:[%s1284_s1 + $0x370] sm:$0xff] }
  0x14   :  { %225 = vmatprep.subr.mxu0 %v16_v33  ;;  %294 = vmatprep.subr.mxu1 %v31_v42  ;;  %v59_v59 = vld [vmem:[%s1284_s1 + $0x160] sm:$0xff]  ;;  %v113_v60 = vld [vmem:[%s1284_s1 + $0x310] sm:$0xff]  ;;  %v58_v61 = vld [vmem:[%s1284_s1 + $0x158] sm:$0xff] }
  0x15   :  { %226 = vmatpush1.msra.mxu0 %v15_v35  ;;  %295 = vmatpush1.msra.mxu1 %v30_v44  ;;  %v112_v62 = vld [vmem:[%s1284_s1 + $0x308] sm:$0xff]  ;;  %v46_v63 = vld [vmem:[%s1284_s1 + $0xf8] sm:$0xff]  ;;  %v45_v1 = vld [vmem:[%s1284_s1 + $0xf0] sm:$0xff] }
  0x16   :  { %724 = vmatmul.mubr.msk.f32.vlgmr.msra.gmra.mxu0 %vm151_vm1, %v917_v37  ;;  %728 = vmatprep.subr.msk.mxu0 %vm155_vm0, %v137_v38  ;;  %v100_v0 = vld [vmem:[%s1284_s1 + $0x2a8] sm:$0xff]  ;;  %v99_v2 = vld [vmem:[%s1284_s1 + $0x2a0] sm:$0xff]  ;;  %v33_v4 = vld [vmem:[%s1284_s1 + $0x90] sm:$0xff] }
  0x17   :  { %729 = vmatpush1.msk.msra.mxu0 %vm155_vm0, %v136_v39  ;;  %296 = vmatprep.subr.mxu1 %v18_v46  ;;  %v87_v5 = vld [vmem:[%s1284_s1 + $0x240] sm:$0xff]  ;;  %v32_v6 = vld [vmem:[%s1284_s1 + $0x88] sm:$0xff]  ;;  %v86_v7 = vld [vmem:[%s1284_s1 + $0x238] sm:$0xff] }
  0x18   :  { %351 = vmatprep.subr.mxu0 %v124_v41  ;;  %297 = vmatpush1.msra.mxu1 %v17_v48  ;;  %v20_v8 = vld [vmem:[%s1284_s1 + $0x28] sm:$0xff]  ;;  %v74_v9 = vld [vmem:[%s1284_s1 + $0x1d8] sm:$0xff]  ;;  %v19_v10 = vld [vmem:[%s1284_s1 + $0x20] sm:$0xff] }
  0x19   :  { %352 = vmatpush1.msra.mxu0 %v123_v43  ;;  %731 = vmatprep.subr.msk.mxu1 %vm155_vm0, %v139_v50  ;;  %v73_v11 = vld [vmem:[%s1284_s1 + $0x1d0] sm:$0xff]  ;;  %v140_v13 = vld [vmem:[%s1284_s1 + $0x3e8] sm:$0x7]  ;;  %v127_v17 = vld [vmem:[%s1284_s1 + $0x380] sm:$0xff] }
  0x1a   :  { %353 = vmatprep.subr.mxu0 %v111_v45  ;;  %727 = vmatmul.mubr.msk.f32.vlgmr.msra.gmra.mxu1 %vm151_vm1, %v917_v37  ;;  %v141_v12 = vld [vmem:[%s1284_s1 + $0x3f0] sm:$0x7]  ;;  %v128_v15 = vld [vmem:[%s1284_s1 + $0x388] sm:$0xff]  ;;  %v115_v19 = vld [vmem:[%s1284_s1 + $0x320] sm:$0xff] }
  0x1b   :  { %354 = vmatpush1.msra.mxu0 %v110_v47  ;;  %732 = vmatpush1.msk.msra.mxu1 %vm155_vm0, %v138_v53  ;;  %v61_v14 = vld [vmem:[%s1284_s1 + $0x170] sm:$0xff]  ;;  %v60_v16 = vld [vmem:[%s1284_s1 + $0x168] sm:$0xff]  ;;  %v47_v20 = vld [vmem:[%s1284_s1 + $0x100] sm:$0xff] }
  0x1c   :  { %355 = vmatprep.subr.mxu0 %v98_v49  ;;  %422 = vmatprep.subr.mxu1 %v126_v55  ;;  %v48_v18 = vld [vmem:[%s1284_s1 + $0x108] sm:$0xff]  ;;  %v114_v21 = vld [vmem:[%s1284_s1 + $0x318] sm:$0xff]  ;;  %v35_v22 = vld [vmem:[%s1284_s1 + $0xa0] sm:$0xff] }
  0x1d   :  { %356 = vmatpush1.msra.mxu0 %v97_v51  ;;  %401 = vmatprep.mubr.f32.mxu0 %v780_v3  ;;  %v102_v23 = vld [vmem:[%s1284_s1 + $0x2b8] sm:$0xff]  ;;  %v101_v25 = vld [vmem:[%s1284_s1 + $0x2b0] sm:$0xff]  ;;  %v88_v29 = vld [vmem:[%s1284_s1 + $0x248] sm:$0xff] }
  0x1e   :  { %357 = vmatprep.subr.mxu0 %v85_v52  ;;  %423 = vmatpush1.msra.mxu1 %v125_v58  ;;  %v34_v24 = vld [vmem:[%s1284_s1 + $0x98] sm:$0xff]  ;;  %v89_v27 = vld [vmem:[%s1284_s1 + $0x250] sm:$0xff]  ;;  %v76_v30 = vld [vmem:[%s1284_s1 + $0x1e8] sm:$0xff] }
  0x1f   :  { %358 = vmatpush1.msra.mxu0 %v84_v54  ;;  %424 = vmatprep.subr.mxu1 %v113_v60  ;;  %v22_v26 = vld [vmem:[%s1284_s1 + $0x38] sm:$0xff]  ;;  %v21_v28 = vld [vmem:[%s1284_s1 + $0x30] sm:$0xff]  ;;  %v143_v31 = vld [vmem:[%s1284_s1 + $0x400] sm:$0x7] }
  0x20   :  { %359 = vmatprep.subr.mxu0 %v72_v56  ;;  %425 = vmatpush1.msra.mxu1 %v112_v62  ;;  %v75_v32 = vld [vmem:[%s1284_s1 + $0x1e0] sm:$0xff]  ;;  %v142_v34 = vld [vmem:[%s1284_s1 + $0x3f8] sm:$0x7]  ;;  %v49_v39 = vld [vmem:[%s1284_s1 + $0x110] sm:$0xff] }
  0x21   :  { %360 = vmatpush1.msra.mxu0 %v71_v57  ;;  %426 = vmatprep.subr.mxu1 %v100_v0  ;;  %v63_v33 = vld [vmem:[%s1284_s1 + $0x180] sm:$0xff]  ;;  %v62_v35 = vld [vmem:[%s1284_s1 + $0x178] sm:$0xff]  ;;  %v129_v40 = vld [vmem:[%s1284_s1 + $0x390] sm:$0xff] }
  0x22   :  { %361 = vmatprep.subr.mxu0 %v59_v59  ;;  %427 = vmatpush1.msra.mxu1 %v99_v2  ;;  %v130_v36 = vld [vmem:[%s1284_s1 + $0x398] sm:$0xff]  ;;  %v37_v41 = vld [vmem:[%s1284_s1 + $0xb0] sm:$0xff]  ;;  %v36_v43 = vld [vmem:[%s1284_s1 + $0xa8] sm:$0xff] }
  0x23   :  { %362 = vmatpush1.msra.mxu0 %v58_v61  ;;  %428 = vmatprep.subr.mxu1 %v87_v5  ;;  %v50_v38 = vld [vmem:[%s1284_s1 + $0x118] sm:$0xff]  ;;  %v117_v42 = vld [vmem:[%s1284_s1 + $0x330] sm:$0xff]  ;;  %v116_v44 = vld [vmem:[%s1284_s1 + $0x328] sm:$0xff] }
  0x24   :  { %363 = vmatprep.subr.mxu0 %v46_v63  ;;  %429 = vmatpush1.msra.mxu1 %v86_v7  ;;  %v24_v45 = vld [vmem:[%s1284_s1 + $0x48] sm:$0xff]  ;;  %v23_v47 = vld [vmem:[%s1284_s1 + $0x40] sm:$0xff]  ;;  %v90_v51 = vld [vmem:[%s1284_s1 + $0x258] sm:$0xff] }
  0x25   :  { %364 = vmatpush1.msra.mxu0 %v45_v1  ;;  %430 = vmatprep.subr.mxu1 %v74_v9  ;;  %v104_v46 = vld [vmem:[%s1284_s1 + $0x2c8] sm:$0xff]  ;;  %v103_v48 = vld [vmem:[%s1284_s1 + $0x2c0] sm:$0xff]  ;;  %v78_v53 = vld [vmem:[%s1284_s1 + $0x1f8] sm:$0xff] }
  0x26   :  { %365 = vmatprep.subr.mxu0 %v33_v4  ;;  %431 = vmatpush1.msra.mxu1 %v73_v11  ;;  %v144_v49 = vld [vmem:[%s1284_s1 + $0x408] sm:$0x7]  ;;  %v91_v50 = vld [vmem:[%s1284_s1 + $0x260] sm:$0xff]  ;;  %v77_v54 = vld [vmem:[%s1284_s1 + $0x1f0] sm:$0xff] }
  0x27   :  { %366 = vmatpush1.msra.mxu0 %v32_v6  ;;  %432 = vmatprep.subr.mxu1 %v61_v14  ;;  %v131_v52 = vld [vmem:[%s1284_s1 + $0x3a0] sm:$0xff]  ;;  %v118_v55 = vld [vmem:[%s1284_s1 + $0x338] sm:$0xff]  ;;  %v65_v56 = vld [vmem:[%s1284_s1 + $0x190] sm:$0xff] }
  0x28   :  { %367 = vmatprep.subr.mxu0 %v20_v8  ;;  %433 = vmatpush1.msra.mxu1 %v60_v16  ;;  %v64_v57 = vld [vmem:[%s1284_s1 + $0x188] sm:$0xff]  ;;  %v105_v58 = vld [vmem:[%s1284_s1 + $0x2d0] sm:$0xff]  ;;  %v51_v60 = vld [vmem:[%s1284_s1 + $0x120] sm:$0xff] }
  0x29   :  { %368 = vmatpush1.msra.mxu0 %v19_v10  ;;  %434 = vmatprep.subr.mxu1 %v48_v18  ;;  %v52_v59 = vld [vmem:[%s1284_s1 + $0x128] sm:$0xff]  ;;  %v39_v62 = vld [vmem:[%s1284_s1 + $0xc0] sm:$0xff]  ;;  %v38_v63 = vld [vmem:[%s1284_s1 + $0xb8] sm:$0xff] }
  0x2a   :  { %730 = vmatmul.mubr.msk.f32.vlgmr.msra.gmra.mxu0 %vm151_vm1, %v917_v37  ;;  %734 = vmatprep.subr.msk.mxu0 %vm155_vm0, %v141_v12  ;;  %v92_v61 = vld [vmem:[%s1284_s1 + $0x268] sm:$0xff]  ;;  %v79_v0 = vld [vmem:[%s1284_s1 + $0x200] sm:$0xff]  ;;  %v26_v1 = vld [vmem:[%s1284_s1 + $0x58] sm:$0xff] }
  0x2b   :  { %735 = vmatpush1.msk.msra.mxu0 %vm155_vm0, %v140_v13  ;;  %435 = vmatpush1.msra.mxu1 %v47_v20  ;;  %v25_v2 = vld [vmem:[%s1284_s1 + $0x50] sm:$0xff]  ;;  %v66_v4 = vld [vmem:[%s1284_s1 + $0x198] sm:$0xff]  ;;  %v145_v6 = vld [vmem:[%s1286_s2] sm:$0xff] }
  0x2c   :  { %493 = vmatprep.subr.mxu0 %v128_v15  ;;  %436 = vmatprep.subr.mxu1 %v35_v22  ;;  %v53_v5 = vld [vmem:[%s1284_s1 + $0x130] sm:$0xff]  ;;  %v40_v7 = vld [vmem:[%s1284_s1 + $0xc8] sm:$0xff]  ;;  %v27_v8 = vld [vmem:[%s1284_s1 + $0x60] sm:$0xff] }
  0x2d   :  { %494 = vmatpush1.msra.mxu0 %v127_v17  ;;  %437 = vmatpush1.msra.mxu1 %v34_v24 }
  0x2e   :  { %495 = vmatprep.subr.mxu0 %v115_v19  ;;  %438 = vmatprep.subr.mxu1 %v22_v26 }
  0x2f   :  { %496 = vmatpush1.msra.mxu0 %v114_v21  ;;  %439 = vmatpush1.msra.mxu1 %v21_v28 }
  0x30   :  { %497 = vmatprep.subr.mxu0 %v102_v23  ;;  %472 = vmatprep.mubr.f32.mxu1 %v780_v3 }
  0x31   :  { %498 = vmatpush1.msra.mxu0 %v101_v25  ;;  %737 = vmatprep.subr.msk.mxu1 %vm155_vm0, %v143_v31 }
  0x32   :  { %499 = vmatprep.subr.mxu0 %v89_v27  ;;  %733 = vmatmul.mubr.msk.f32.vlgmr.msra.gmra.mxu1 %vm151_vm1, %v917_v37 }
  0x33   :  { %500 = vmatpush1.msra.mxu0 %v88_v29  ;;  %738 = vmatpush1.msk.msra.mxu1 %vm155_vm0, %v142_v34 }
  0x34   :  { %501 = vmatprep.subr.mxu0 %v76_v30  ;;  %564 = vmatprep.subr.mxu1 %v130_v36 }
  0x35   :  { %502 = vmatpush1.msra.mxu0 %v75_v32  ;;  %543 = vmatprep.mubr.f32.mxu0 %v780_v3 }
  0x36   :  { %503 = vmatprep.subr.mxu0 %v63_v33  ;;  %565 = vmatpush1.msra.mxu1 %v129_v40 }
  0x37   :  { %504 = vmatpush1.msra.mxu0 %v62_v35  ;;  %566 = vmatprep.subr.mxu1 %v117_v42 }
  0x38   :  { %505 = vmatprep.subr.mxu0 %v50_v38  ;;  %567 = vmatpush1.msra.mxu1 %v116_v44 }
  0x39   :  { %506 = vmatpush1.msra.mxu0 %v49_v39  ;;  %568 = vmatprep.subr.mxu1 %v104_v46 }
  0x3a   :  { %507 = vmatprep.subr.mxu0 %v37_v41  ;;  %569 = vmatpush1.msra.mxu1 %v103_v48 }
  0x3b   :  { %508 = vmatpush1.msra.mxu0 %v36_v43  ;;  %570 = vmatprep.subr.mxu1 %v91_v50 }
  0x3c   :  { %509 = vmatprep.subr.mxu0 %v24_v45  ;;  %571 = vmatpush1.msra.mxu1 %v90_v51 }
  0x3d   :  { %510 = vmatpush1.msra.mxu0 %v23_v47  ;;  %572 = vmatprep.subr.mxu1 %v78_v53 }
  0x3e   :  { %736 = vmatmul.mubr.msk.f32.vlgmr.msra.gmra.mxu0 %vm151_vm1, %v917_v37  ;;  %753 = vmatprep.subr.mxu0 %v780_v3 }
  0x3f   :  { %754 = vmatpush3.msk.msra.mxu0 %vm155_vm0, %v144_v49  ;;  %573 = vmatpush1.msra.mxu1 %v77_v54 }
  0x40   :  { %755 = vmatprep.subr.mxu0 %v780_v3  ;;  %574 = vmatprep.subr.mxu1 %v65_v56 }
  0x41   :  { %756 = vmatpush3.msra.mxu0 %v131_v52  ;;  %575 = vmatpush1.msra.mxu1 %v64_v57 }
  0x42   :  { %757 = vmatprep.subr.mxu0 %v780_v3  ;;  %576 = vmatprep.subr.mxu1 %v52_v59 }
  0x43   :  { %758 = vmatpush3.msra.mxu0 %v118_v55  ;;  %577 = vmatpush1.msra.mxu1 %v51_v60 }
  0x44   :  { %759 = vmatprep.subr.mxu0 %v780_v3  ;;  %578 = vmatprep.subr.mxu1 %v39_v62 }
  0x45   :  { %760 = vmatpush3.msra.mxu0 %v105_v58  ;;  %579 = vmatpush1.msra.mxu1 %v38_v63 }
  0x46   :  { %761 = vmatprep.subr.mxu0 %v780_v3  ;;  %580 = vmatprep.subr.mxu1 %v26_v1 }
  0x47   :  { %762 = vmatpush3.msra.mxu0 %v92_v61  ;;  %581 = vmatpush1.msra.mxu1 %v25_v2 }
  0x48   :  { %763 = vmatprep.subr.mxu0 %v780_v3  ;;  %614 = vmatprep.mubr.f32.mxu1 %v780_v3 }
  0x49   :  { %764 = vmatpush3.msra.mxu0 %v79_v0  ;;  %739 = vmatmul.mubr.msk.f32.vlgmr.msra.gmra.mxu1 %vm151_vm1, %v917_v37 }
  0x4a   :  { %765 = vmatprep.subr.mxu0 %v780_v3  ;;  %773 = vmatprep.mubr.msk.f32.mxu0 %vm782_vm2, %v780_v3 }
  0x4b   :  { %766 = vmatpush3.msra.mxu0 %v66_v4  ;;  %148 = vperm.xlu0 %779, %v145_v6  }
  0x4c   :  { %767 = vmatprep.subr.mxu0 %v780_v3 }
  0x4d   :  { %768 = vmatpush3.msra.mxu0 %v53_v5 }
  0x4e   :  { %769 = vmatprep.subr.mxu0 %v780_v3 }
  0x4f   :  { %770 = vmatpush3.msra.mxu0 %v40_v7 }
  0x50   :  { %771 = vmatprep.subr.mxu0 %v780_v3 }
  0x51   :  { %772 = vmatpush3.msra.mxu0 %v27_v8 }
  0x52   :  { %774 = vmatmul.mubr.msk.f32.vlgmr.msra.gmra.mxu0 %vm151_vm1, %v917_v37 }
  0xc6   :  { %v149_v9 = vpop.permute.xlu0 %148 }
  0xd6   :  { %v261_v10 = vpop.f32.mrf.mxu0 }
  0xd7   :  { %v262_v11 = vadd.f32 %v261_v10, %v149_v9 }
  0xd8   :  { %v263_v12 = vpop.f32.mrf.mxu0 }
  0xd9   :  { %v691_v13 = vmax.f32 %v262_v11, 0.0  ;;  %v264_v14 = vadd.f32 %v263_v12, %v149_v9 }
  0xda   :  { %v332_v3 = vpop.f32.mrf.mxu1 }
  0xdb   :  { %704 = vst [vmem:[%s1287_s3] sm:$0xff] %v691_v13  ;;  %v692_v15 = vmax.f32 %v264_v14, 0.0  ;;  %v333_v16 = vadd.f32 %v332_v3, %v149_v9 }
  0xdc   :  { %v334_v17 = vpop.f32.mrf.mxu1 }
  0xdd   :  { %705 = vst [vmem:[%s1287_s3 + $0x8] sm:$0xff] %v692_v15  ;;  %v693_v18 = vmax.f32 %v333_v16, 0.0  ;;  %v335_v37 = vadd.f32 %v334_v17, %v149_v9 }
  0xdf   :  { %706 = vst [vmem:[%s1287_s3 + $0x10] sm:$0xff] %v693_v18  ;;  %v694_v19 = vmax.f32 %v335_v37, 0.0 }
  0xe1   :  { %707 = vst [vmem:[%s1287_s3 + $0x18] sm:$0xff] %v694_v19 }
  0xea   :  { %v403_v20 = vpop.f32.mrf.mxu0 }
  0xeb   :  { %v404_v21 = vadd.f32 %v403_v20, %v149_v9 }
  0xec   :  { %v405_v22 = vpop.f32.mrf.mxu0 }
  0xed   :  { %v695_v23 = vmax.f32 %v404_v21, 0.0  ;;  %v406_v24 = vadd.f32 %v405_v22, %v149_v9 }
  0xef   :  { %708 = vst [vmem:[%s1287_s3 + $0x20] sm:$0xff] %v695_v23  ;;  %v696_v25 = vmax.f32 %v406_v24, 0.0 }
  0xf1   :  { %709 = vst [vmem:[%s1287_s3 + $0x28] sm:$0xff] %v696_v25 }
  0xf2   :  { %v474_v26 = vpop.f32.mrf.mxu1 }
  0xf3   :  { %v475_v27 = vadd.f32 %v474_v26, %v149_v9 }
  0xf4   :  { %v476_v28 = vpop.f32.mrf.mxu1 }
  0xf5   :  { %v697_v29 = vmax.f32 %v475_v27, 0.0  ;;  %v477_v30 = vadd.f32 %v476_v28, %v149_v9 }
  0xf7   :  { %710 = vst [vmem:[%s1287_s3 + $0x30] sm:$0xff] %v697_v29  ;;  %v698_v31 = vmax.f32 %v477_v30, 0.0 }
  0xf9   :  { %711 = vst [vmem:[%s1287_s3 + $0x38] sm:$0xff] %v698_v31 }
  0xfe   :  { %v545_v32 = vpop.f32.mrf.mxu0 }
  0xff   :  { %v546_v33 = vadd.f32 %v545_v32, %v149_v9 }
 0x100   :  { %v547_v34 = vpop.f32.mrf.mxu0 }
 0x101   :  { %v699_v35 = vmax.f32 %v546_v33, 0.0  ;;  %v548_v36 = vadd.f32 %v547_v34, %v149_v9 }
 0x103   :  { %712 = vst [vmem:[%s1287_s3 + $0x40] sm:$0xff] %v699_v35  ;;  %v700_v38 = vmax.f32 %v548_v36, 0.0 }
 0x105   :  { %713 = vst [vmem:[%s1287_s3 + $0x48] sm:$0xff] %v700_v38 }
 0x109   :  { %v616_v39 = vpop.f32.mrf.mxu1 }
 0x10a   :  { %v617_v40 = vadd.f32 %v616_v39, %v149_v9 }
 0x10b   :  { %v618_v41 = vpop.f32.mrf.mxu1 }
 0x10c   :  { %v701_v42 = vmax.f32 %v617_v40, 0.0  ;;  %v619_v43 = vadd.f32 %v618_v41, %v149_v9 }
 0x10e   :  { %714 = vst [vmem:[%s1287_s3 + $0x50] sm:$0xff] %v701_v42  ;;  %v702_v44 = vmax.f32 %v619_v43, 0.0 }
 0x110   :  { %715 = vst [vmem:[%s1287_s3 + $0x58] sm:$0xff] %v702_v44 }
 0x112   :  { %v687_v45 = vpop.f32.mrf.mxu0 }
 0x113   :  { %v688_v46 = vadd.f32 %v687_v45, %v149_v9 }
 0x114   :  { %v775_v47 = vpop.f32.mrf.mxu0 }
 0x115   :  { %v703_v48 = vmax.f32 %v688_v46, 0.0 }
 0x117   :  { %717 = vst.msk [vmem:[%s1287_s3 + $0x60] sm:$0xff] %vm716_vm3, %v703_v48 }

// kernel: netb_forward.4
= control target key start
LH: loop header
LB: loop body
LE: loop exit
PB: predicated region body
PF: predicated region fallthrough
CT: control target
= control target key end

     0   :  { %v635_v3 = vmov 0   ;;  %vm247_vm0 = vcmask 588800   ;;  %s1412_s1 = inlined_call_operand.vmem [shape: f32[200,1152], index: 1, kind: input, shape index: {}]   ;;  %s1413_s0 = inlined_call_operand.vmem [shape: f32[8,200], index: 0, kind: input, shape index: {}]   ;;  %s1414_s2 = inlined_call_operand.vmem [shape: f32[8,1], index: 2, kind: input, shape index: {}]   ;;  %s1415_s3 = inlined_call_operand.vmem [shape: f32[8,1152], index: 3, kind: output, shape index: {}]  }
   0x1   :  { %v152_v0 = vld [vmem:[%s1412_s1 + $0x440] sm:$0xff]  ;;  %v151_v1 = vld [vmem:[%s1412_s1 + $0x438] sm:$0xff]  ;;  %634 = vset.pattern.permute.xlu0 %v635_v3  ;;  %v142_v4 = vld [vmem:[%s1412_s1 + $0x3f0] sm:$0xff] }
   0x2   :  { %v143_v2 = vld [vmem:[%s1412_s1 + $0x3f8] sm:$0xff]  ;;  %251 = vmatprep.subr.mxu0 %v152_v0  ;;  %v134_v5 = vld [vmem:[%s1412_s1 + $0x3b0] sm:$0xff]  ;;  %v133_v6 = vld [vmem:[%s1412_s1 + $0x3a8] sm:$0xff] }
   0x3   :  { %252 = vmatpush1.msra.mxu0 %v151_v1  ;;  %v125_v7 = vld [vmem:[%s1412_s1 + $0x368] sm:$0xff]  ;;  %v124_v8 = vld [vmem:[%s1412_s1 + $0x360] sm:$0xff]  ;;  %v115_v10 = vld [vmem:[%s1412_s1 + $0x318] sm:$0xff] }
   0x4   :  { %253 = vmatprep.subr.mxu0 %v143_v2  ;;  %v116_v9 = vld [vmem:[%s1412_s1 + $0x320] sm:$0xff]  ;;  %v107_v11 = vld [vmem:[%s1412_s1 + $0x2d8] sm:$0xff]  ;;  %v106_v12 = vld [vmem:[%s1412_s1 + $0x2d0] sm:$0xff] }
   0x5   :  { %254 = vmatpush1.msra.mxu0 %v142_v4  ;;  %v98_v13 = vld [vmem:[%s1412_s1 + $0x290] sm:$0xff]  ;;  %v97_v14 = vld [vmem:[%s1412_s1 + $0x288] sm:$0xff]  ;;  %v88_v16 = vld [vmem:[%s1412_s1 + $0x240] sm:$0xff] }
   0x6   :  { %255 = vmatprep.subr.mxu0 %v134_v5  ;;  %v89_v15 = vld [vmem:[%s1412_s1 + $0x248] sm:$0xff]  ;;  %v80_v17 = vld [vmem:[%s1412_s1 + $0x200] sm:$0xff]  ;;  %v79_v18 = vld [vmem:[%s1412_s1 + $0x1f8] sm:$0xff] }
   0x7   :  { %256 = vmatpush1.msra.mxu0 %v133_v6  ;;  %v154_v19 = vld [vmem:[%s1412_s1 + $0x450] sm:$0xff]  ;;  %v71_v20 = vld [vmem:[%s1412_s1 + $0x1b8] sm:$0xff]  ;;  %v153_v21 = vld [vmem:[%s1412_s1 + $0x448] sm:$0xff] }
   0x8   :  { %257 = vmatprep.subr.mxu0 %v125_v7  ;;  %322 = vmatprep.subr.mxu1 %v154_v19  ;;  %v70_v22 = vld [vmem:[%s1412_s1 + $0x1b0] sm:$0xff]  ;;  %v145_v23 = vld [vmem:[%s1412_s1 + $0x408] sm:$0xff]  ;;  %v144_v26 = vld [vmem:[%s1412_s1 + $0x400] sm:$0xff] }
   0x9   :  { %258 = vmatpush1.msra.mxu0 %v124_v8  ;;  %323 = vmatpush1.msra.mxu1 %v153_v21  ;;  %v729_v24 = vld [vmem:[%s1413_s0 + $0x8] sm:$0xff]  ;;  %v62_v25 = vld [vmem:[%s1412_s1 + $0x170] sm:$0xff]  ;;  %v136_v27 = vld [vmem:[%s1412_s1 + $0x3c0] sm:$0xff] }
   0xa   :  { %259 = vmatprep.subr.mxu0 %v116_v9  ;;  %324 = vmatprep.subr.mxu1 %v145_v23  ;;  %v61_v28 = vld [vmem:[%s1412_s1 + $0x168] sm:$0xff]  ;;  %v135_v29 = vld [vmem:[%s1412_s1 + $0x3b8] sm:$0xff]  ;;  %v52_v32 = vld [vmem:[%s1412_s1 + $0x120] sm:$0xff] }
   0xb   :  { %260 = vmatpush1.msra.mxu0 %v115_v10  ;;  %627 = vmatprep.mubr.msk.f32.mxu0 %vm247_vm0, %v729_v24  ;;  %v53_v30 = vld [vmem:[%s1412_s1 + $0x128] sm:$0xff]  ;;  %v127_v31 = vld [vmem:[%s1412_s1 + $0x378] sm:$0xff]  ;;  %v126_v33 = vld [vmem:[%s1412_s1 + $0x370] sm:$0xff] }
   0xc   :  { %261 = vmatprep.subr.mxu0 %v107_v11  ;;  %325 = vmatpush1.msra.mxu1 %v144_v26  ;;  %v44_v34 = vld [vmem:[%s1412_s1 + $0xe0] sm:$0xff]  ;;  %v118_v35 = vld [vmem:[%s1412_s1 + $0x330] sm:$0xff]  ;;  %v43_v36 = vld [vmem:[%s1412_s1 + $0xd8] sm:$0xff] }
   0xd   :  { %262 = vmatpush1.msra.mxu0 %v106_v12  ;;  %326 = vmatprep.subr.mxu1 %v136_v27  ;;  %v117_v37 = vld [vmem:[%s1412_s1 + $0x328] sm:$0xff]  ;;  %v35_v38 = vld [vmem:[%s1412_s1 + $0x98] sm:$0xff]  ;;  %v34_v40 = vld [vmem:[%s1412_s1 + $0x90] sm:$0xff] }
   0xe   :  { %263 = vmatprep.subr.mxu0 %v98_v13  ;;  %327 = vmatpush1.msra.mxu1 %v135_v29  ;;  %v109_v39 = vld [vmem:[%s1412_s1 + $0x2e8] sm:$0xff]  ;;  %v108_v41 = vld [vmem:[%s1412_s1 + $0x2e0] sm:$0xff]  ;;  %v26_v42 = vld [vmem:[%s1412_s1 + $0x50] sm:$0xff] }
   0xf   :  { %264 = vmatpush1.msra.mxu0 %v97_v14  ;;  %328 = vmatprep.subr.mxu1 %v127_v31  ;;  %v100_v43 = vld [vmem:[%s1412_s1 + $0x2a0] sm:$0xff]  ;;  %v25_v44 = vld [vmem:[%s1412_s1 + $0x48] sm:$0xff]  ;;  %v99_v45 = vld [vmem:[%s1412_s1 + $0x298] sm:$0xff] }
  0x10   :  { %265 = vmatprep.subr.mxu0 %v89_v15  ;;  %329 = vmatpush1.msra.mxu1 %v126_v33  ;;  %v17_v46 = vld [vmem:[%s1412_s1 + $0x8] sm:$0xff]  ;;  %v91_v47 = vld [vmem:[%s1412_s1 + $0x258] sm:$0xff]  ;;  %v16_v48 = vld [vmem:[%s1412_s1] sm:$0xff] }
  0x11   :  { %266 = vmatpush1.msra.mxu0 %v88_v16  ;;  %330 = vmatprep.subr.mxu1 %v118_v35  ;;  %v90_v49 = vld [vmem:[%s1412_s1 + $0x250] sm:$0xff]  ;;  %v233_v50 = vld [vmem:[%s1412_s1 + $0x6c8] sm:$0xff]  ;;  %v232_v52 = vld [vmem:[%s1412_s1 + $0x6c0] sm:$0xff] }
  0x12   :  { %267 = vmatprep.subr.mxu0 %v80_v17  ;;  %331 = vmatpush1.msra.mxu1 %v117_v37  ;;  %v82_v51 = vld [vmem:[%s1412_s1 + $0x210] sm:$0xff]  ;;  %v81_v53 = vld [vmem:[%s1412_s1 + $0x208] sm:$0xff]  ;;  %v224_v54 = vld [vmem:[%s1412_s1 + $0x680] sm:$0xff] }
  0x13   :  { %268 = vmatpush1.msra.mxu0 %v79_v18  ;;  %332 = vmatprep.subr.mxu1 %v109_v39  ;;  %v73_v55 = vld [vmem:[%s1412_s1 + $0x1c8] sm:$0xff]  ;;  %v223_v56 = vld [vmem:[%s1412_s1 + $0x678] sm:$0xff]  ;;  %v72_v57 = vld [vmem:[%s1412_s1 + $0x1c0] sm:$0xff] }
  0x14   :  { %269 = vmatprep.subr.mxu0 %v71_v20  ;;  %333 = vmatpush1.msra.mxu1 %v108_v41  ;;  %v215_v58 = vld [vmem:[%s1412_s1 + $0x638] sm:$0xff]  ;;  %v64_v59 = vld [vmem:[%s1412_s1 + $0x180] sm:$0xff]  ;;  %v214_v60 = vld [vmem:[%s1412_s1 + $0x630] sm:$0xff] }
  0x15   :  { %270 = vmatpush1.msra.mxu0 %v70_v22  ;;  %334 = vmatprep.subr.mxu1 %v100_v43  ;;  %v63_v61 = vld [vmem:[%s1412_s1 + $0x178] sm:$0xff]  ;;  %v206_v62 = vld [vmem:[%s1412_s1 + $0x5f0] sm:$0xff]  ;;  %v205_v0 = vld [vmem:[%s1412_s1 + $0x5e8] sm:$0xff] }
  0x16   :  { %271 = vmatprep.subr.mxu0 %v62_v25  ;;  %335 = vmatpush1.msra.mxu1 %v99_v45  ;;  %v55_v63 = vld [vmem:[%s1412_s1 + $0x138] sm:$0xff]  ;;  %v54_v1 = vld [vmem:[%s1412_s1 + $0x130] sm:$0xff]  ;;  %v197_v2 = vld [vmem:[%s1412_s1 + $0x5a8] sm:$0xff] }
  0x17   :  { %272 = vmatpush1.msra.mxu0 %v61_v28  ;;  %336 = vmatprep.subr.mxu1 %v91_v47  ;;  %v46_v3 = vld [vmem:[%s1412_s1 + $0xf0] sm:$0xff]  ;;  %v196_v4 = vld [vmem:[%s1412_s1 + $0x5a0] sm:$0xff]  ;;  %v45_v5 = vld [vmem:[%s1412_s1 + $0xe8] sm:$0xff] }
  0x18   :  { %273 = vmatprep.subr.mxu0 %v53_v30  ;;  %337 = vmatpush1.msra.mxu1 %v90_v49  ;;  %v188_v6 = vld [vmem:[%s1412_s1 + $0x560] sm:$0xff]  ;;  %v37_v7 = vld [vmem:[%s1412_s1 + $0xa8] sm:$0xff]  ;;  %v187_v8 = vld [vmem:[%s1412_s1 + $0x558] sm:$0xff] }
  0x19   :  { %274 = vmatpush1.msra.mxu0 %v52_v32  ;;  %338 = vmatprep.subr.mxu1 %v82_v51  ;;  %v36_v9 = vld [vmem:[%s1412_s1 + $0xa0] sm:$0xff]  ;;  %v179_v10 = vld [vmem:[%s1412_s1 + $0x518] sm:$0xff]  ;;  %v178_v12 = vld [vmem:[%s1412_s1 + $0x510] sm:$0xff] }
  0x1a   :  { %275 = vmatprep.subr.mxu0 %v44_v34  ;;  %339 = vmatpush1.msra.mxu1 %v81_v53  ;;  %v28_v11 = vld [vmem:[%s1412_s1 + $0x60] sm:$0xff]  ;;  %v27_v13 = vld [vmem:[%s1412_s1 + $0x58] sm:$0xff]  ;;  %v170_v14 = vld [vmem:[%s1412_s1 + $0x4d0] sm:$0xff] }
  0x1b   :  { %276 = vmatpush1.msra.mxu0 %v43_v36  ;;  %340 = vmatprep.subr.mxu1 %v73_v55  ;;  %v19_v15 = vld [vmem:[%s1412_s1 + $0x18] sm:$0xff]  ;;  %v169_v16 = vld [vmem:[%s1412_s1 + $0x4c8] sm:$0xff]  ;;  %v18_v17 = vld [vmem:[%s1412_s1 + $0x10] sm:$0xff] }
  0x1c   :  { %277 = vmatprep.subr.mxu0 %v35_v38  ;;  %341 = vmatpush1.msra.mxu1 %v72_v57  ;;  %v161_v18 = vld [vmem:[%s1412_s1 + $0x488] sm:$0xff]  ;;  %v235_v19 = vld [vmem:[%s1412_s1 + $0x6d8] sm:$0xff]  ;;  %v160_v20 = vld [vmem:[%s1412_s1 + $0x480] sm:$0xff] }
  0x1d   :  { %278 = vmatpush1.msra.mxu0 %v34_v40  ;;  %342 = vmatprep.subr.mxu1 %v64_v59  ;;  %v234_v21 = vld [vmem:[%s1412_s1 + $0x6d0] sm:$0xff]  ;;  %v919_v22 = vld [vmem:[%s1413_s0] sm:$0xff]  ;;  %v155_v25 = vld [vmem:[%s1412_s1 + $0x458] sm:$0xff] }
  0x1e   :  { %279 = vmatprep.subr.mxu0 %v26_v42  ;;  %343 = vmatpush1.msra.mxu1 %v63_v61  ;;  %v156_v23 = vld [vmem:[%s1412_s1 + $0x460] sm:$0xff]  ;;  %v226_v26 = vld [vmem:[%s1412_s1 + $0x690] sm:$0xff]  ;;  %v147_v27 = vld [vmem:[%s1412_s1 + $0x418] sm:$0xff] }
  0x1f   :  { %280 = vmatpush1.msra.mxu0 %v25_v44  ;;  %344 = vmatprep.subr.mxu1 %v55_v63  ;;  %v225_v28 = vld [vmem:[%s1412_s1 + $0x688] sm:$0xff]  ;;  %v146_v29 = vld [vmem:[%s1412_s1 + $0x410] sm:$0xff]  ;;  %v216_v32 = vld [vmem:[%s1412_s1 + $0x640] sm:$0xff] }
  0x20   :  { %281 = vmatprep.subr.mxu0 %v17_v46  ;;  %345 = vmatpush1.msra.mxu1 %v54_v1  ;;  %v217_v30 = vld [vmem:[%s1412_s1 + $0x648] sm:$0xff]  ;;  %v138_v31 = vld [vmem:[%s1412_s1 + $0x3d0] sm:$0xff]  ;;  %v208_v34 = vld [vmem:[%s1412_s1 + $0x600] sm:$0xff] }
  0x21   :  { %282 = vmatpush1.msra.mxu0 %v16_v48  ;;  %346 = vmatprep.subr.mxu1 %v46_v3  ;;  %v137_v33 = vld [vmem:[%s1412_s1 + $0x3c8] sm:$0xff]  ;;  %v207_v36 = vld [vmem:[%s1412_s1 + $0x5f8] sm:$0xff]  ;;  %v128_v37 = vld [vmem:[%s1412_s1 + $0x380] sm:$0xff] }
  0x22   :  { %297 = vmatprep.subr.mxu0 %v233_v50  ;;  %347 = vmatpush1.msra.mxu1 %v45_v5  ;;  %v129_v35 = vld [vmem:[%s1412_s1 + $0x388] sm:$0xff]  ;;  %v199_v38 = vld [vmem:[%s1412_s1 + $0x5b8] sm:$0xff]  ;;  %v120_v39 = vld [vmem:[%s1412_s1 + $0x340] sm:$0xff] }
  0x23   :  { %298 = vmatpush2.msra.mxu0 %v232_v52  ;;  %348 = vmatprep.subr.mxu1 %v37_v7  ;;  %v198_v40 = vld [vmem:[%s1412_s1 + $0x5b0] sm:$0xff]  ;;  %v119_v41 = vld [vmem:[%s1412_s1 + $0x338] sm:$0xff]  ;;  %v189_v44 = vld [vmem:[%s1412_s1 + $0x568] sm:$0xff] }
  0x24   :  { %299 = vmatprep.subr.mxu0 %v224_v54  ;;  %349 = vmatpush1.msra.mxu1 %v36_v9  ;;  %v190_v42 = vld [vmem:[%s1412_s1 + $0x570] sm:$0xff]  ;;  %v111_v43 = vld [vmem:[%s1412_s1 + $0x2f8] sm:$0xff]  ;;  %v181_v46 = vld [vmem:[%s1412_s1 + $0x528] sm:$0xff] }
  0x25   :  { %300 = vmatpush2.msra.mxu0 %v223_v56  ;;  %350 = vmatprep.subr.mxu1 %v28_v11  ;;  %v110_v45 = vld [vmem:[%s1412_s1 + $0x2f0] sm:$0xff]  ;;  %v180_v48 = vld [vmem:[%s1412_s1 + $0x520] sm:$0xff]  ;;  %v101_v49 = vld [vmem:[%s1412_s1 + $0x2a8] sm:$0xff] }
  0x26   :  { %301 = vmatprep.subr.mxu0 %v215_v58  ;;  %351 = vmatpush1.msra.mxu1 %v27_v13  ;;  %v102_v47 = vld [vmem:[%s1412_s1 + $0x2b0] sm:$0xff]  ;;  %v172_v50 = vld [vmem:[%s1412_s1 + $0x4e0] sm:$0xff]  ;;  %v93_v51 = vld [vmem:[%s1412_s1 + $0x268] sm:$0xff] }
  0x27   :  { %302 = vmatpush2.msra.mxu0 %v214_v60  ;;  %352 = vmatprep.subr.mxu1 %v19_v15  ;;  %v171_v52 = vld [vmem:[%s1412_s1 + $0x4d8] sm:$0xff]  ;;  %v92_v53 = vld [vmem:[%s1412_s1 + $0x260] sm:$0xff]  ;;  %v162_v56 = vld [vmem:[%s1412_s1 + $0x490] sm:$0xff] }
  0x28   :  { %303 = vmatprep.subr.mxu0 %v206_v62  ;;  %353 = vmatpush1.msra.mxu1 %v18_v17  ;;  %v163_v54 = vld [vmem:[%s1412_s1 + $0x498] sm:$0xff]  ;;  %v84_v55 = vld [vmem:[%s1412_s1 + $0x220] sm:$0xff]  ;;  %v158_v59 = vld [vmem:[%s1412_s1 + $0x470] sm:$0xff] }
  0x29   :  { %304 = vmatpush2.msra.mxu0 %v205_v0  ;;  %368 = vmatprep.subr.mxu1 %v235_v19  ;;  %v83_v57 = vld [vmem:[%s1412_s1 + $0x218] sm:$0xff]  ;;  %v74_v60 = vld [vmem:[%s1412_s1 + $0x1d0] sm:$0xff]  ;;  %v157_v62 = vld [vmem:[%s1412_s1 + $0x468] sm:$0xff] }
  0x2a   :  { %305 = vmatprep.subr.mxu0 %v197_v2  ;;  %369 = vmatpush2.msra.mxu1 %v234_v21  ;;  %v75_v58 = vld [vmem:[%s1412_s1 + $0x1d8] sm:$0xff]  ;;  %v66_v61 = vld [vmem:[%s1412_s1 + $0x190] sm:$0xff]  ;;  %v65_v63 = vld [vmem:[%s1412_s1 + $0x188] sm:$0xff] }
  0x2b   :  { %306 = vmatpush2.msra.mxu0 %v196_v4  ;;  %370 = vmatprep.subr.mxu1 %v226_v26  ;;  %v149_v0 = vld [vmem:[%s1412_s1 + $0x428] sm:$0xff]  ;;  %v56_v2 = vld [vmem:[%s1412_s1 + $0x140] sm:$0xff]  ;;  %v139_v7 = vld [vmem:[%s1412_s1 + $0x3d8] sm:$0xff] }
  0x2c   :  { %307 = vmatprep.subr.mxu0 %v188_v6  ;;  %371 = vmatpush2.msra.mxu1 %v225_v28  ;;  %v57_v1 = vld [vmem:[%s1412_s1 + $0x148] sm:$0xff]  ;;  %v148_v3 = vld [vmem:[%s1412_s1 + $0x420] sm:$0xff]  ;;  %v47_v6 = vld [vmem:[%s1412_s1 + $0xf8] sm:$0xff] }
  0x2d   :  { %308 = vmatpush2.msra.mxu0 %v187_v8  ;;  %372 = vmatprep.subr.mxu1 %v217_v30  ;;  %v48_v4 = vld [vmem:[%s1412_s1 + $0x100] sm:$0xff]  ;;  %v39_v8 = vld [vmem:[%s1412_s1 + $0xb8] sm:$0xff]  ;;  %v130_v11 = vld [vmem:[%s1412_s1 + $0x390] sm:$0xff] }
  0x2e   :  { %309 = vmatprep.subr.mxu0 %v179_v10  ;;  %373 = vmatpush2.msra.mxu1 %v216_v32  ;;  %v140_v5 = vld [vmem:[%s1412_s1 + $0x3e0] sm:$0xff]  ;;  %v131_v9 = vld [vmem:[%s1412_s1 + $0x398] sm:$0xff]  ;;  %v38_v10 = vld [vmem:[%s1412_s1 + $0xb0] sm:$0xff] }
  0x2f   :  { %310 = vmatpush2.msra.mxu0 %v178_v12  ;;  %374 = vmatprep.subr.mxu1 %v208_v34  ;;  %v30_v12 = vld [vmem:[%s1412_s1 + $0x70] sm:$0xff]  ;;  %v121_v15 = vld [vmem:[%s1412_s1 + $0x348] sm:$0xff]  ;;  %v112_v19 = vld [vmem:[%s1412_s1 + $0x300] sm:$0xff] }
  0x30   :  { %311 = vmatprep.subr.mxu0 %v170_v14  ;;  %375 = vmatpush2.msra.mxu1 %v207_v36  ;;  %v122_v13 = vld [vmem:[%s1412_s1 + $0x350] sm:$0xff]  ;;  %v29_v14 = vld [vmem:[%s1412_s1 + $0x68] sm:$0xff]  ;;  %v104_v21 = vld [vmem:[%s1412_s1 + $0x2c0] sm:$0xff] }
  0x31   :  { %312 = vmatpush2.msra.mxu0 %v169_v16  ;;  %376 = vmatprep.subr.mxu1 %v199_v38  ;;  %v21_v16 = vld [vmem:[%s1412_s1 + $0x28] sm:$0xff]  ;;  %v228_v26 = vld [vmem:[%s1412_s1 + $0x6a0] sm:$0xff]  ;;  %v227_v28 = vld [vmem:[%s1412_s1 + $0x698] sm:$0xff] }
  0x32   :  { %313 = vmatprep.subr.mxu0 %v161_v18  ;;  %377 = vmatpush2.msra.mxu1 %v198_v40  ;;  %v113_v17 = vld [vmem:[%s1412_s1 + $0x308] sm:$0xff]  ;;  %v20_v18 = vld [vmem:[%s1412_s1 + $0x20] sm:$0xff]  ;;  %v219_v30 = vld [vmem:[%s1412_s1 + $0x658] sm:$0xff] }
  0x33   :  { %314 = vmatpush2.msra.mxu0 %v160_v20  ;;  %378 = vmatprep.subr.mxu1 %v190_v42  ;;  %v237_v20 = vld [vmem:[%s1412_s1 + $0x6e8] sm:$0xff]  ;;  %v218_v32 = vld [vmem:[%s1412_s1 + $0x650] sm:$0xff]  ;;  %v200_v40 = vld [vmem:[%s1412_s1 + $0x5c0] sm:$0xff] }
  0x34   :  { %316 = vmatmul.mubr.f32.vlgmr.msra.gmra.mxu0 %v919_v22  ;;  %393 = vmatprep.subr.mxu0 %v156_v23  ;;  %v236_v23 = vld [vmem:[%s1412_s1 + $0x6e0] sm:$0xff]  ;;  %v210_v34 = vld [vmem:[%s1412_s1 + $0x610] sm:$0xff]  ;;  %v209_v36 = vld [vmem:[%s1412_s1 + $0x608] sm:$0xff] }
  0x35   :  { %394 = vmatpush1.msra.mxu0 %v155_v25  ;;  %379 = vmatpush2.msra.mxu1 %v189_v44  ;;  %v103_v25 = vld [vmem:[%s1412_s1 + $0x2b8] sm:$0xff]  ;;  %v201_v38 = vld [vmem:[%s1412_s1 + $0x5c8] sm:$0xff]  ;;  %v192_v42 = vld [vmem:[%s1412_s1 + $0x580] sm:$0xff] }
  0x36   :  { %395 = vmatprep.subr.mxu0 %v147_v27  ;;  %380 = vmatprep.subr.mxu1 %v181_v46  ;;  %v95_v27 = vld [vmem:[%s1412_s1 + $0x278] sm:$0xff] }
  0x37   :  { %396 = vmatpush1.msra.mxu0 %v146_v29  ;;  %381 = vmatpush2.msra.mxu1 %v180_v48  ;;  %v94_v29 = vld [vmem:[%s1412_s1 + $0x270] sm:$0xff]  ;;  %v191_v44 = vld [vmem:[%s1412_s1 + $0x578] sm:$0xff] }
  0x38   :  { %397 = vmatprep.subr.mxu0 %v138_v31  ;;  %382 = vmatprep.subr.mxu1 %v172_v50  ;;  %v86_v31 = vld [vmem:[%s1412_s1 + $0x230] sm:$0xff]  ;;  %v183_v46 = vld [vmem:[%s1412_s1 + $0x538] sm:$0xff] }
  0x39   :  { %398 = vmatpush1.msra.mxu0 %v137_v33  ;;  %383 = vmatpush2.msra.mxu1 %v171_v52  ;;  %v85_v33 = vld [vmem:[%s1412_s1 + $0x228] sm:$0xff]  ;;  %v182_v48 = vld [vmem:[%s1412_s1 + $0x530] sm:$0xff] }
  0x3a   :  { %399 = vmatprep.subr.mxu0 %v129_v35  ;;  %384 = vmatprep.subr.mxu1 %v163_v54  ;;  %v77_v35 = vld [vmem:[%s1412_s1 + $0x1e8] sm:$0xff]  ;;  %v174_v50 = vld [vmem:[%s1412_s1 + $0x4f0] sm:$0xff] }
  0x3b   :  { %400 = vmatpush1.msra.mxu0 %v128_v37  ;;  %385 = vmatpush2.msra.mxu1 %v162_v56  ;;  %v76_v37 = vld [vmem:[%s1412_s1 + $0x1e0] sm:$0xff]  ;;  %v173_v52 = vld [vmem:[%s1412_s1 + $0x4e8] sm:$0xff] }
  0x3c   :  { %401 = vmatprep.subr.mxu0 %v120_v39  ;;  %628 = vmatprep.mubr.msk.f32.mxu1 %vm247_vm0, %v729_v24  ;;  %v68_v39 = vld [vmem:[%s1412_s1 + $0x1a0] sm:$0xff]  ;;  %v165_v54 = vld [vmem:[%s1412_s1 + $0x4a8] sm:$0xff] }
  0x3d   :  { %402 = vmatpush1.msra.mxu0 %v119_v41  ;;  %464 = vmatprep.subr.mxu1 %v158_v59  ;;  %v67_v41 = vld [vmem:[%s1412_s1 + $0x198] sm:$0xff]  ;;  %v164_v56 = vld [vmem:[%s1412_s1 + $0x4a0] sm:$0xff] }
  0x3e   :  { %403 = vmatprep.subr.mxu0 %v111_v43  ;;  %387 = vmatmul.mubr.f32.vlgmr.msra.gmra.mxu1 %v919_v22  ;;  %v59_v43 = vld [vmem:[%s1412_s1 + $0x158] sm:$0xff] }
  0x3f   :  { %404 = vmatpush1.msra.mxu0 %v110_v45  ;;  %465 = vmatpush1.msra.mxu1 %v157_v62  ;;  %v58_v45 = vld [vmem:[%s1412_s1 + $0x150] sm:$0xff]  ;;  %v31_v59 = vld [vmem:[%s1412_s1 + $0x78] sm:$0xff] }
  0x40   :  { %405 = vmatprep.subr.mxu0 %v102_v47  ;;  %466 = vmatprep.subr.mxu1 %v149_v0  ;;  %v241_v47 = vld [vmem:[%s1414_s2] sm:$0xff]  ;;  %v150_v62 = vld [vmem:[%s1412_s1 + $0x430] sm:$0xff]  ;;  %v239_v0 = vld [vmem:[%s1412_s1 + $0x6f8] sm:$0xff] }
  0x41   :  { %406 = vmatpush1.msra.mxu0 %v101_v49  ;;  %629 = vmatprep.mubr.msk.f32.mxu0 %vm247_vm0, %v729_v24  ;;  %v50_v49 = vld [vmem:[%s1412_s1 + $0x110] sm:$0xff] }
  0x42   :  { %407 = vmatprep.subr.mxu0 %v93_v51  ;;  %467 = vmatpush1.msra.mxu1 %v148_v3  ;;  %v49_v51 = vld [vmem:[%s1412_s1 + $0x108] sm:$0xff]  ;;  %v230_v3 = vld [vmem:[%s1412_s1 + $0x6b0] sm:$0xff] }
  0x43   :  { %408 = vmatpush1.msra.mxu0 %v92_v53  ;;  %468 = vmatprep.subr.mxu1 %v140_v5  ;;  %v41_v53 = vld [vmem:[%s1412_s1 + $0xc8] sm:$0xff] }
  0x44   :  { %409 = vmatprep.subr.mxu0 %v84_v55  ;;  %469 = vmatpush1.msra.mxu1 %v139_v7  ;;  %v40_v55 = vld [vmem:[%s1412_s1 + $0xc0] sm:$0xff]  ;;  %v229_v5 = vld [vmem:[%s1412_s1 + $0x6a8] sm:$0xff]  ;;  %v123_v7 = vld [vmem:[%s1412_s1 + $0x358] sm:$0xff] }
  0x45   :  { %410 = vmatpush1.msra.mxu0 %v83_v57  ;;  %470 = vmatprep.subr.mxu1 %v131_v9  ;;  %v32_v57 = vld [vmem:[%s1412_s1 + $0x80] sm:$0xff] }
  0x46   :  { %411 = vmatprep.subr.mxu0 %v75_v58  ;;  %471 = vmatpush1.msra.mxu1 %v130_v11  ;;  %v159_v58 = vld [vmem:[%s1412_s1 + $0x478] sm:$0xff]  ;;  %v212_v9 = vld [vmem:[%s1412_s1 + $0x620] sm:$0xff] }
  0x47   :  { %412 = vmatpush1.msra.mxu0 %v74_v60  ;;  %472 = vmatprep.subr.mxu1 %v122_v13  ;;  %v23_v60 = vld [vmem:[%s1412_s1 + $0x38] sm:$0xff]  ;;  %v105_v13 = vld [vmem:[%s1412_s1 + $0x2c8] sm:$0xff] }
  0x48   :  { %413 = vmatprep.subr.mxu0 %v66_v61  ;;  %473 = vmatpush1.msra.mxu1 %v121_v15  ;;  %v636_v61 = vmov 0.0   ;;  %v211_v11 = vld [vmem:[%s1412_s1 + $0x618] sm:$0xff]  ;;  %v194_v15 = vld [vmem:[%s1412_s1 + $0x590] sm:$0xff] }
  0x49   :  { %414 = vmatpush1.msra.mxu0 %v65_v63  ;;  %474 = vmatprep.subr.mxu1 %v113_v17  ;;  %v22_v63 = vld [vmem:[%s1412_s1 + $0x30] sm:$0xff]  ;;  %v193_v17 = vld [vmem:[%s1412_s1 + $0x588] sm:$0xff] }
  0x4a   :  { %415 = vmatprep.subr.mxu0 %v57_v1  ;;  %475 = vmatpush1.msra.mxu1 %v112_v19  ;;  %v141_v1 = vld [vmem:[%s1412_s1 + $0x3e8] sm:$0xff]  ;;  %v87_v19 = vld [vmem:[%s1412_s1 + $0x238] sm:$0xff] }
  0x4b   :  { %416 = vmatpush1.msra.mxu0 %v56_v2  ;;  %476 = vmatprep.subr.mxu1 %v104_v21  ;;  %v238_v2 = vld [vmem:[%s1412_s1 + $0x6f0] sm:$0xff]  ;;  %v176_v21 = vld [vmem:[%s1412_s1 + $0x500] sm:$0xff] }
  0x4c   :  { %417 = vmatprep.subr.mxu0 %v48_v4  ;;  %477 = vmatpush1.msra.mxu1 %v103_v25  ;;  %v132_v4 = vld [vmem:[%s1412_s1 + $0x3a0] sm:$0xff]  ;;  %v175_v25 = vld [vmem:[%s1412_s1 + $0x4f8] sm:$0xff] }
  0x4d   :  { %418 = vmatpush1.msra.mxu0 %v47_v6  ;;  %478 = vmatprep.subr.mxu1 %v95_v27  ;;  %v221_v6 = vld [vmem:[%s1412_s1 + $0x668] sm:$0xff] }
  0x4e   :  { %419 = vmatprep.subr.mxu0 %v39_v8  ;;  %479 = vmatpush1.msra.mxu1 %v94_v29  ;;  %v220_v8 = vld [vmem:[%s1412_s1 + $0x660] sm:$0xff]  ;;  %v69_v27 = vld [vmem:[%s1412_s1 + $0x1a8] sm:$0xff] }
  0x4f   :  { %420 = vmatpush1.msra.mxu0 %v38_v10  ;;  %480 = vmatprep.subr.mxu1 %v86_v31  ;;  %v114_v10 = vld [vmem:[%s1412_s1 + $0x310] sm:$0xff]  ;;  %v60_v29 = vld [vmem:[%s1412_s1 + $0x160] sm:$0xff] }
  0x50   :  { %421 = vmatprep.subr.mxu0 %v30_v12  ;;  %481 = vmatpush1.msra.mxu1 %v85_v33  ;;  %v203_v12 = vld [vmem:[%s1412_s1 + $0x5d8] sm:$0xff]  ;;  %v42_v31 = vld [vmem:[%s1412_s1 + $0xd0] sm:$0xff]  ;;  %v24_v33 = vld [vmem:[%s1412_s1 + $0x40] sm:$0xff] }
  0x51   :  { %422 = vmatpush1.msra.mxu0 %v29_v14  ;;  %482 = vmatprep.subr.mxu1 %v77_v35  ;;  %v202_v14 = vld [vmem:[%s1412_s1 + $0x5d0] sm:$0xff] }
  0x52   :  { %423 = vmatprep.subr.mxu0 %v21_v16  ;;  %483 = vmatpush1.msra.mxu1 %v76_v37  ;;  %v96_v16 = vld [vmem:[%s1412_s1 + $0x280] sm:$0xff]  ;;  %v222_v35 = vld [vmem:[%s1412_s1 + $0x670] sm:$0xff] }
  0x53   :  { %424 = vmatpush1.msra.mxu0 %v20_v18  ;;  %484 = vmatprep.subr.mxu1 %v68_v39  ;;  %v185_v18 = vld [vmem:[%s1412_s1 + $0x548] sm:$0xff]  ;;  %v204_v37 = vld [vmem:[%s1412_s1 + $0x5e0] sm:$0xff]  ;;  %v186_v39 = vld [vmem:[%s1412_s1 + $0x550] sm:$0xff] }
  0x54   :  { %439 = vmatprep.subr.mxu0 %v237_v20  ;;  %485 = vmatpush1.msra.mxu1 %v67_v41  ;;  %v184_v20 = vld [vmem:[%s1412_s1 + $0x540] sm:$0xff] }
  0x55   :  { %440 = vmatpush2.msra.mxu0 %v236_v23  ;;  %486 = vmatprep.subr.mxu1 %v59_v43  ;;  %v78_v23 = vld [vmem:[%s1412_s1 + $0x1f0] sm:$0xff]  ;;  %v168_v41 = vld [vmem:[%s1412_s1 + $0x4c0] sm:$0xff] }
  0x56   :  { %441 = vmatprep.subr.mxu0 %v228_v26  ;;  %487 = vmatpush1.msra.mxu1 %v58_v45  ;;  %v167_v26 = vld [vmem:[%s1412_s1 + $0x4b8] sm:$0xff] }
  0x57   :  { %442 = vmatpush2.msra.mxu0 %v227_v28  ;;  %244 = vperm.xlu0 %634, %v241_v47   ;;  %v166_v28 = vld [vmem:[%s1412_s1 + $0x4b0] sm:$0xff] }
  0x58   :  { %443 = vmatprep.subr.mxu0 %v219_v30  ;;  %488 = vmatprep.subr.mxu1 %v50_v49  ;;  %v51_v30 = vld [vmem:[%s1412_s1 + $0x118] sm:$0xff] }
  0x59   :  { %444 = vmatpush2.msra.mxu0 %v218_v32  ;;  %489 = vmatpush1.msra.mxu1 %v49_v51  ;;  %v33_v32 = vld [vmem:[%s1412_s1 + $0x88] sm:$0xff] }
  0x5a   :  { %445 = vmatprep.subr.mxu0 %v210_v34  ;;  %490 = vmatprep.subr.mxu1 %v41_v53  ;;  %v231_v34 = vld [vmem:[%s1412_s1 + $0x6b8] sm:$0xff] }
  0x5b   :  { %446 = vmatpush2.msra.mxu0 %v209_v36  ;;  %491 = vmatpush1.msra.mxu1 %v40_v55  ;;  %v213_v36 = vld [vmem:[%s1412_s1 + $0x628] sm:$0xff] }
  0x5c   :  { %447 = vmatprep.subr.mxu0 %v201_v38  ;;  %492 = vmatprep.subr.mxu1 %v32_v57  ;;  %v195_v38 = vld [vmem:[%s1412_s1 + $0x598] sm:$0xff] }
  0x5d   :  { %448 = vmatpush2.msra.mxu0 %v200_v40  ;;  %493 = vmatpush1.msra.mxu1 %v31_v59  ;;  %v177_v40 = vld [vmem:[%s1412_s1 + $0x508] sm:$0xff] }
  0x5e   :  { %449 = vmatprep.subr.mxu0 %v192_v42  ;;  %494 = vmatprep.subr.mxu1 %v23_v60 }
  0x5f   :  { %450 = vmatpush2.msra.mxu0 %v191_v44  ;;  %495 = vmatpush1.msra.mxu1 %v22_v63 }
  0x60   :  { %451 = vmatprep.subr.mxu0 %v183_v46  ;;  %510 = vmatprep.subr.mxu1 %v239_v0 }
  0x61   :  { %452 = vmatpush2.msra.mxu0 %v182_v48  ;;  %511 = vmatpush2.msra.mxu1 %v238_v2 }
  0x62   :  { %453 = vmatprep.subr.mxu0 %v174_v50  ;;  %512 = vmatprep.subr.mxu1 %v230_v3 }
  0x63   :  { %454 = vmatpush2.msra.mxu0 %v173_v52  ;;  %513 = vmatpush2.msra.mxu1 %v229_v5 }
  0x64   :  { %455 = vmatprep.subr.mxu0 %v165_v54  ;;  %514 = vmatprep.subr.mxu1 %v221_v6 }
  0x65   :  { %456 = vmatpush2.msra.mxu0 %v164_v56  ;;  %515 = vmatpush2.msra.mxu1 %v220_v8 }
  0x66   :  { %458 = vmatmul.mubr.f32.vlgmr.msra.gmra.mxu0 %v919_v22  ;;  %535 = vmatprep.subr.mxu0 %v636_v61 }
  0x67   :  { %536 = vmatpush1.msra.mxu0 %v159_v58  ;;  %516 = vmatprep.subr.mxu1 %v212_v9 }
  0x68   :  { %537 = vmatprep.subr.mxu0 %v636_v61  ;;  %517 = vmatpush2.msra.mxu1 %v211_v11 }
  0x69   :  { %538 = vmatpush1.msra.mxu0 %v150_v62  ;;  %518 = vmatprep.subr.mxu1 %v203_v12 }
  0x6a   :  { %539 = vmatprep.subr.mxu0 %v636_v61  ;;  %519 = vmatpush2.msra.mxu1 %v202_v14 }
  0x6b   :  { %540 = vmatpush1.msra.mxu0 %v141_v1  ;;  %520 = vmatprep.subr.mxu1 %v194_v15 }
  0x6c   :  { %541 = vmatprep.subr.mxu0 %v636_v61  ;;  %521 = vmatpush2.msra.mxu1 %v193_v17 }
  0x6d   :  { %542 = vmatpush1.msra.mxu0 %v132_v4  ;;  %522 = vmatprep.subr.mxu1 %v185_v18 }
  0x6e   :  { %543 = vmatprep.subr.mxu0 %v636_v61  ;;  %523 = vmatpush2.msra.mxu1 %v184_v20 }
  0x6f   :  { %544 = vmatpush1.msra.mxu0 %v123_v7  ;;  %524 = vmatprep.subr.mxu1 %v176_v21 }
  0x70   :  { %545 = vmatprep.subr.mxu0 %v636_v61  ;;  %525 = vmatpush2.msra.mxu1 %v175_v25 }
  0x71   :  { %546 = vmatpush1.msra.mxu0 %v114_v10  ;;  %526 = vmatprep.subr.mxu1 %v167_v26 }
  0x72   :  { %547 = vmatprep.subr.mxu0 %v636_v61  ;;  %527 = vmatpush2.msra.mxu1 %v166_v28 }
  0x73   :  { %548 = vmatpush1.msra.mxu0 %v105_v13  ;;  %630 = vmatprep.mubr.msk.f32.mxu1 %vm247_vm0, %v729_v24 }
  0x74   :  { %549 = vmatprep.subr.mxu0 %v636_v61  ;;  %529 = vmatmul.mubr.f32.vlgmr.msra.gmra.mxu1 %v919_v22 }
  0x75   :  { %550 = vmatpush1.msra.mxu0 %v96_v16  ;;  %631 = vmatprep.mubr.msk.f32.mxu0 %vm247_vm0, %v729_v24  ;;  %v240_v24 = vld [vmem:[%s1412_s1 + $0x700] sm:$0xff] }
  0x76   :  { %551 = vmatprep.subr.mxu0 %v636_v61 }
  0x77   :  { %552 = vmatpush1.msra.mxu0 %v87_v19 }
  0x78   :  { %553 = vmatprep.subr.mxu0 %v636_v61 }
  0x79   :  { %554 = vmatpush1.msra.mxu0 %v78_v23 }
  0x7a   :  { %555 = vmatprep.subr.mxu0 %v636_v61 }
  0x7b   :  { %556 = vmatpush1.msra.mxu0 %v69_v27 }
  0x7c   :  { %557 = vmatprep.subr.mxu0 %v636_v61 }
  0x7d   :  { %558 = vmatpush1.msra.mxu0 %v60_v29 }
  0x7e   :  { %559 = vmatprep.subr.mxu0 %v636_v61 }
  0x7f   :  { %560 = vmatpush1.msra.mxu0 %v51_v30 }
  0x80   :  { %561 = vmatprep.subr.mxu0 %v636_v61 }
  0x81   :  { %562 = vmatpush1.msra.mxu0 %v42_v31 }
  0x82   :  { %563 = vmatprep.subr.mxu0 %v636_v61 }
  0x83   :  { %564 = vmatpush1.msra.mxu0 %v33_v32 }
  0x84   :  { %565 = vmatprep.subr.mxu0 %v636_v61 }
  0x85   :  { %566 = vmatpush1.msra.mxu0 %v24_v33 }
  0x86   :  { %581 = vmatprep.subr.mxu0 %v636_v61 }
  0x87   :  { %582 = vmatpush2.msra.mxu0 %v240_v24 }
  0x88   :  { %583 = vmatprep.subr.mxu0 %v636_v61 }
  0x89   :  { %584 = vmatpush2.msra.mxu0 %v231_v34 }
  0x8a   :  { %585 = vmatprep.subr.mxu0 %v636_v61 }
  0x8b   :  { %586 = vmatpush2.msra.mxu0 %v222_v35 }
  0x8c   :  { %587 = vmatprep.subr.mxu0 %v636_v61 }
  0x8d   :  { %588 = vmatpush2.msra.mxu0 %v213_v36 }
  0x8e   :  { %589 = vmatprep.subr.mxu0 %v636_v61 }
  0x8f   :  { %590 = vmatpush2.msra.mxu0 %v204_v37 }
  0x90   :  { %591 = vmatprep.subr.mxu0 %v636_v61 }
  0x91   :  { %592 = vmatpush2.msra.mxu0 %v195_v38 }
  0x92   :  { %593 = vmatprep.subr.mxu0 %v636_v61 }
  0x93   :  { %594 = vmatpush2.msra.mxu0 %v186_v39 }
  0x94   :  { %595 = vmatprep.subr.mxu0 %v636_v61 }
  0x95   :  { %596 = vmatpush2.msra.mxu0 %v177_v40 }
  0x96   :  { %597 = vmatprep.subr.mxu0 %v636_v61 }
  0x97   :  { %598 = vmatpush2.msra.mxu0 %v168_v41 }
  0x98   :  { %600 = vmatmul.mubr.f32.vlgmr.msra.gmra.mxu0 %v919_v22 }
  0xd2   :  { %v245_v42 = vpop.permute.xlu0 %244 }
  0xf4   :  { %v317_v43 = vpop.f32.mrf.mxu0 }
  0xf5   :  { %v318_v44 = vadd.f32 %v317_v43, %v245_v42 }
  0xf6   :  { %v319_v45 = vpop.f32.mrf.mxu0 }
  0xf7   :  { %v605_v46 = vmax.f32 %v318_v44, 0.0  ;;  %v320_v47 = vadd.f32 %v319_v45, %v245_v42 }
  0xf9   :  { %614 = vst [vmem:[%s1415_s3] sm:$0xff] %v605_v46  ;;  %v606_v48 = vmax.f32 %v320_v47, 0.0 }
  0xfb   :  { %615 = vst [vmem:[%s1415_s3 + $0x8] sm:$0xff] %v606_v48 }
  0xfe   :  { %v388_v49 = vpop.f32.mrf.mxu1 }
  0xff   :  { %v389_v50 = vadd.f32 %v388_v49, %v245_v42 }
 0x100   :  { %v390_v51 = vpop.f32.mrf.mxu1 }
 0x101   :  { %v607_v52 = vmax.f32 %v389_v50, 0.0  ;;  %v391_v22 = vadd.f32 %v390_v51, %v245_v42 }
 0x103   :  { %616 = vst [vmem:[%s1415_s3 + $0x10] sm:$0xff] %v607_v52  ;;  %v608_v53 = vmax.f32 %v391_v22, 0.0 }
 0x105   :  { %617 = vst [vmem:[%s1415_s3 + $0x18] sm:$0xff] %v608_v53 }
 0x126   :  { %v459_v54 = vpop.f32.mrf.mxu0 }
 0x127   :  { %v460_v55 = vadd.f32 %v459_v54, %v245_v42 }
 0x128   :  { %v461_v56 = vpop.f32.mrf.mxu0 }
 0x129   :  { %v609_v57 = vmax.f32 %v460_v55, 0.0  ;;  %v462_v58 = vadd.f32 %v461_v56, %v245_v42 }
 0x12b   :  { %618 = vst [vmem:[%s1415_s3 + $0x20] sm:$0xff] %v609_v57  ;;  %v610_v59 = vmax.f32 %v462_v58, 0.0 }
 0x12d   :  { %619 = vst [vmem:[%s1415_s3 + $0x28] sm:$0xff] %v610_v59 }
 0x134   :  { %v530_v60 = vpop.f32.mrf.mxu1 }
 0x135   :  { %v531_v61 = vadd.f32 %v530_v60, %v245_v42 }
 0x136   :  { %v532_v62 = vpop.f32.mrf.mxu1 }
 0x137   :  { %v611_v63 = vmax.f32 %v531_v61, 0.0  ;;  %v533_v0 = vadd.f32 %v532_v62, %v245_v42 }
 0x139   :  { %620 = vst [vmem:[%s1415_s3 + $0x30] sm:$0xff] %v611_v63  ;;  %v612_v1 = vmax.f32 %v533_v0, 0.0 }
 0x13b   :  { %621 = vst [vmem:[%s1415_s3 + $0x38] sm:$0xff] %v612_v1 }
 0x158   :  { %v601_v2 = vpop.f32.mrf.mxu0 }
 0x159   :  { %v602_v3 = vadd.f32 %v601_v2, %v245_v42 }
 0x15a   :  { %v603_v4 = vpop.f32.mrf.mxu0 }
 0x15b   :  { %v613_v5 = vmax.f32 %v602_v3, 0.0 }
 0x15d   :  { %622 = vst [vmem:[%s1415_s3 + $0x40] sm:$0xff] %v613_v5 }

// kernel: netb_forward.5
= control target key start
LH: loop header
LB: loop body
LE: loop exit
PB: predicated region body
PF: predicated region fallthrough
CT: control target
= control target key end

     0   :  { %s2652_s0 = inlined_call_operand.vmem [shape: f32[8,128], index: 0, kind: input, shape index: {}]   ;;  %s2653_s1 = inlined_call_operand.vmem [shape: f32[9,1,128], index: 1, kind: input, shape index: {}]   ;;  %s2654_s2 = inlined_call_operand.vmem [shape: f32[8,72], index: 2, kind: input, shape index: {}]   ;;  %s2655_s3 = inlined_call_operand.vmem [shape: f32[8,1], index: 3, kind: input, shape index: {}]   ;;  %s2656_s4 = inlined_call_operand.vmem [shape: f32[8,1], index: 4, kind: input, shape index: {}]   ;;  %s2657_s5 = inlined_call_operand.vmem [shape: f32[8,1], index: 5, kind: input, shape index: {}]   ;;  %s2658_s6 = inlined_call_operand.vmem [shape: f32[8,8], index: 6, kind: input, shape index: {}]   ;;  %s2659_s7 = inlined_call_operand.vmem [shape: f32[8,1], index: 7, kind: input, shape index: {}]   ;;  %s2660_s8 = inlined_call_operand.vmem [shape: f32[8,8], index: 8, kind: input, shape index: {}]   ;;  %s2661_s9 = inlined_call_operand.vmem [shape: f32[8,1], index: 9, kind: input, shape index: {}]   ;;  %s2662_s10 = inlined_call_operand.vmem [shape: f32[8,1], index: 10, kind: input, shape index: {}]   ;;  %s2663_s11 = inlined_call_operand.vmem [shape: f32[8,1], index: 11, kind: input, shape index: {}]   ;;  %s2664_s12 = inlined_call_operand.vmem [shape: f32[8,72], index: 12, kind: input, shape index: {}]   ;;  %s2665_s13 = inlined_call_operand.vmem [shape: f32[8,1], index: 13, kind: input, shape index: {}]   ;;  %s2666_s14 = inlined_call_operand.vmem [shape: f32[2,1,128], index: 14, kind: input, shape index: {}]   ;;  %s2667_s15 = inlined_call_operand.vmem [shape: f32[1024,10], index: 15, kind: input, shape index: {}]   ;;  %s2668_s16 = inlined_call_operand.vmem [shape: f32[1,10], index: 16, kind: input, shape index: {}]   ;;  %s2669_s17 = inlined_call_operand.hbm [shape: f32[2,10], index: 17, kind: output, shape index: {}]  }
   0x1   :  { %2676 = sst [smem:[#allocation6_spill]] %s2652_s0 }
   0x2   :  { %2677 = sst [smem:[#allocation7_spill]] %s2653_s1 }
   0x3   :  { %22 = vsyncpa [#allocation4], 0  ;;  %s2035_s24 = smov 0  }
   0x4 LB: > { %s2041_s25 = sadd.s32 4294967295, %s1931_s24   ;;  %p1607_p0 = scmp.ge.s32.totalorder %s1931_s24, 1  ;;  %s1931_s24 = sphi %s2035_s24, %s28_s24  }
   0x5   : > { %p473_p1 = scmp.lt.s32.totalorder %s1931_s24, 3 }
   0x7   : > { %p474_p2 = pnand %p1607_p0, %p473_p1 }
   0x8   : > { %p1608_p3 = scmp.ne.s32.totalorder (!%p474_p2), %s2041_s25, 0 }
   0x9   : > { %477 = sbr.rel (%p474_p2) target bundleno = 1788 (0x6fc), region = 88 }
   0xe   : > { %518 = sbr.rel (%p1608_p3) target bundleno = 22 (0x16), region = 92  ;;  %s2678_s28 = sld [smem:[#allocation6_spill]] (!%p1608_p3) }
  0x14   : > { %v519_v0 = vld [vmem:[%s2678_s28] sm:$0xff] }
  0x15   : > { %520 = vst [vmem:[#allocation2] sm:$0xff] %v519_v0 }
  0x16 PF: > { %s1933_s29 = smov 119   ;;  %s2675_s0 = smov 121   ;;  %v1935_v2 = vmov 0.0   ;;  %vm1938_vm0 = vmmov 0   ;;  %v1941_v3 = vmov 0   ;;  %v619_v4 = vld [vmem:[%s2655_s3] sm:$0xff] }
  0x17   : > { %1809 = vmatprep.subr.mxu0 %v1935_v2  ;;  %1835 = vmatprep.subr.mxu1 %v1935_v2  ;;  %s1936_s30 = smov 120   ;;  %s1937_s18 = smov 127   ;;  %v720_v5 = vld [vmem:[%s2656_s4] sm:$0xff]  ;;  %vm625_vm1 = vcmask 588800   ;;  %vm741_vm2 = vcmask 64512  }
  0x18   : > { %1827 = vmatprep.mubr.msk.f32.mxu0 %vm1938_vm0, %v1935_v2  ;;  %1837 = vmatprep.mubr.msk.f32.mxu1 %vm1938_vm0, %v1935_v2  ;;  %s2671_s19 = smov 1   ;;  %s2672_s1 = smov 7   ;;  %v735_v6 = vld [vmem:[%s2659_s7] sm:$0xff] }
  0x19   : > { %1887 = vset.pattern.permute.xlu0 %v1941_v3  ;;  %1888 = vset.pattern.permute.xlu1 %v1941_v3  ;;  %s2673_s20 = smov 8   ;;  %s2674_s21 = smov 9   ;;  %v727_v7 = vld [vmem:[%s2657_s5] sm:$0xff] }
  0x1a   : > { %v916_v8 = vld [vmem:[%s2662_s10] sm:$0xff]  ;;  %s2680_s23 = smov 121   ;;  %s2681_s26 = smov 7  }
  0x1b   : > { %v817_v9 = vld [vmem:[%s2661_s9] sm:$0xff]  ;;  %s2682_s27 = smov 1   ;;  %p1630_p4 = scmp.ne.s32.totalorder %s2041_s25, 1 }
  0x1c   : > { %v2049_v1 = vld [vmem:[#allocation2] sm:$0xff] }
  0x1d   : > { %607 = vrot.lane.b32.xlu0 %v2049_v1, %s1933_s29  ;;  %585 = vrot.lane.b32.xlu1 %v2049_v1, %s2675_s0  ;;  %v923_v10 = vld [vmem:[%s2663_s11] sm:$0xff] }
  0x1e   : > { %v618_v37 = vld [vmem:[%s2654_s2] sm:$0xff] }
  0x21   : > { %596 = vrot.lane.b32.xlu0 %v2049_v1, %s1936_s30  ;;  %574 = vrot.lane.b32.xlu1 %v2049_v1, %s1937_s18 }
  0x25   : > { %554 = vrot.lane.b32.xlu0 %v2049_v1, %s2671_s19  ;;  %543 = vrot.lane.b32.xlu1 %v2049_v1, %s2672_s1  ;;  %s2683_s19 = smov 9   ;;  %s2684_s1 = smov 8  }
  0x29   : > { %532 = vrot.lane.b32.xlu0 %v2049_v1, %s2673_s20  ;;  %522 = vrot.lane.b32.xlu1 %v2049_v1, %s2674_s21  ;;  %s2679_s20 = sld [smem:[#allocation7_spill]] }
  0x2d   : > { %622 = vperm.xlu0 %1887, %v619_v4   ;;  %723 = vperm.xlu1 %1888, %v720_v5   ;;  %v734_v4 = vld [vmem:[%s2658_s6] sm:$0xff] }
  0x2f   : > { %v2097_v11 = vld [vmem:[%s2679_s20 + $0x8] ss:$0 sm:$0xff]  ;;  %v2103_v15 = vld [vmem:[%s2679_s20 + $0x7] ss:$0 sm:$0xff]  ;;  %v2108_v16 = vld [vmem:[%s2679_s20 + $0x6] ss:$0 sm:$0xff] }
  0x30   : > { %v2114_v18 = vld [vmem:[%s2679_s20 + $0x5] ss:$0 sm:$0xff]  ;;  %v2120_v21 = vld [vmem:[%s2679_s20 + $0x4] ss:$0 sm:$0xff]  ;;  %v2128_v24 = vld [vmem:[%s2679_s20 + $0x3] ss:$0 sm:$0xff] }
  0x31   : > { %738 = vperm.xlu0 %1887, %v735_v6   ;;  %730 = vperm.xlu1 %1888, %v727_v7   ;;  %v573_v27 = vmul.f32 %v2120_v21, %v2049_v1  ;;  %v2136_v28 = vld [vmem:[%s2679_s20 + $0x2] ss:$0 sm:$0xff]  ;;  %v2143_v30 = vld [vmem:[%s2679_s20 + $0x1] ss:$0 sm:$0xff]  ;;  %v2150_v33 = vld [vmem:[%s2679_s20] ss:$0 sm:$0xff] }
  0x35   : > { %919 = vperm.xlu0 %1887, %v916_v8   ;;  %820 = vperm.xlu1 %1888, %v817_v9  }
  0x39   : > { %926 = vperm.xlu1 %1888, %v923_v10   ;;  %v816_v10 = vld [vmem:[%s2660_s8] sm:$0xff] }
  0x8f   : > { %v608_v12 = vpop.permute.xlu0 %607  ;;  %v586_v13 = vpop.permute.xlu1 %585 }
  0x90   : > { %v617_v14 = vmul.f32 %v2097_v11, %v608_v12  ;;  %v595_v22 = vmul.f32 %v2108_v16, %v586_v13 }
  0x92   : > { %1810 = vmatpush3.msra.mxu0 %v617_v14 }
  0x93   : > { %v597_v17 = vpop.permute.xlu0 %596  ;;  %1811 = vmatprep.subr.mxu0 %v1935_v2  ;;  %v575_v19 = vpop.permute.xlu1 %574 }
  0x94   : > { %v606_v20 = vmul.f32 %v2103_v15, %v597_v17  ;;  %v584_v23 = vmul.f32 %v2114_v18, %v575_v19 }
  0x96   : > { %1812 = vmatpush3.msra.mxu0 %v606_v20 }
  0x97   : > { %1813 = vmatprep.subr.mxu0 %v1935_v2  ;;  %v555_v25 = vpop.permute.xlu0 %554  ;;  %v544_v26 = vpop.permute.xlu1 %543 }
  0x98   : > { %1814 = vmatpush3.msra.mxu0 %v595_v22  ;;  %v564_v29 = vmul.f32 %v2128_v24, %v555_v25  ;;  %v553_v32 = vmul.f32 %v2136_v28, %v544_v26 }
  0x99   : > { %1815 = vmatprep.subr.mxu0 %v1935_v2 }
  0x9a   : > { %1816 = vmatpush3.msra.mxu0 %v584_v23 }
  0x9b   : > { %1817 = vmatprep.subr.mxu0 %v1935_v2  ;;  %v533_v31 = vpop.permute.xlu0 %532  ;;  %v523_v34 = vpop.permute.xlu1 %522 }
  0x9c   : > { %1818 = vmatpush3.msra.mxu0 %v573_v27  ;;  %v542_v35 = vmul.f32 %v2143_v30, %v533_v31  ;;  %v531_v36 = vmul.f32 %v2150_v33, %v523_v34 }
  0x9d   : > { %1819 = vmatprep.subr.mxu0 %v1935_v2 }
  0x9e   : > { %1820 = vmatpush3.msra.mxu0 %v564_v29 }
  0x9f   : > { %1821 = vmatprep.subr.mxu0 %v1935_v2 }
  0xa0   : > { %1822 = vmatpush3.msra.mxu0 %v553_v32 }
  0xa1   : > { %1823 = vmatprep.subr.mxu0 %v1935_v2 }
  0xa2   : > { %1824 = vmatpush3.msra.mxu0 %v542_v35 }
  0xa3   : > { %1825 = vmatprep.subr.mxu0 %v1935_v2 }
  0xa4   : > { %1826 = vmatpush3.msra.mxu0 %v531_v36 }
  0xa5   : > { %1828 = vmatmul.mubr.msk.f32.vlgmr.msra.gmra.mxu0 %vm625_vm1, %v618_v37  ;;  %1830 = vmatprep.subr.mxu0 %v1935_v2 }
  0xa6   : > { %1832 = vmatprep.mubr.msk.f32.mxu0 %vm1938_vm0, %v1935_v2 }
  0xa8   : > { %v623_v38 = vpop.permute.xlu0 %622  ;;  %v724_v60 = vpop.permute.xlu1 %723 }
  0xac   : > { %v731_v0 = vpop.permute.xlu1 %730  ;;  %v739_v5 = vpop.permute.xlu0 %738 }
  0xb0   : > { %v821_v12 = vpop.permute.xlu1 %820 }
 0x165   : > { %v695_v39 = vpop.f32.mrf.mxu0 }
 0x166   : > { %v696_v40 = vadd.f32 %v695_v39, %v623_v38 }
 0x167   : > { %v1829_v41 = vpop.f32.mrf.mxu0 }
 0x168   : > { %v699_v42 = vmax.f32 %v696_v40, 0.0 }
 0x16a   : > { %v700_v43 = vrot.slane %v699_v42, 4 }
 0x16c   : > { %v701_v44 = vadd.f32 %v700_v43, %v699_v42 }
 0x16e   : > { %v702_v45 = vrot.slane %v701_v44, 2 }
 0x170   : > { %v703_v46 = vadd.f32 %v702_v45, %v701_v44  ;;  %v920_v44 = vpop.permute.xlu0 %919 }
 0x172   : > { %v704_v47 = vrot.slane %v703_v46, 1 }
 0x174   : > { %v705_v48 = vadd.f32 %v704_v47, %v703_v46  ;;  %v927_v46 = vpop.permute.xlu1 %926 }
 0x176   : > { %v707_v49 = vmul.f32 0.125, %v705_v48  ;;  %v956_v48 = vld [vmem:[%s2665_s13] sm:$0xff] }
 0x178   : > { %v708_v50 = vsub.f32 %v699_v42, %v707_v49 }
 0x17a   : > { %v709_v51 = vmul.f32 %v708_v50, %v708_v50 }
 0x17c   : > { %v710_v52 = vrot.slane %v709_v51, 4 }
 0x17e   : > { %v711_v53 = vadd.f32 %v710_v52, %v709_v51 }
 0x180   : > { %v712_v54 = vrot.slane %v711_v53, 2 }
 0x182   : > { %v713_v55 = vadd.f32 %v712_v54, %v711_v53 }
 0x184   : > { %v714_v56 = vrot.slane %v713_v55, 1 }
 0x186   : > { %v715_v57 = vadd.f32 %v714_v56, %v713_v55 }
 0x188   : > { %v716_v58 = vmul.f32 0.125, %v715_v57 }
 0x18a   : > { %v717_v59 = vadd.f32 1e-05, %v716_v58 }
 0x18c   : > { %1889 = vrsqrt.f32 %v717_v59 }
 0x199   : > { %v1890_v61 = vpop.eup %1889 }
 0x19a   : > { %v719_v62 = vmul.f32 %v1890_v61, %v708_v50 }
 0x19c   : > { %v726_v63 = vmul.f32 %v724_v60, %v719_v62 }
 0x19e   : > { %v733_v3 = vadd.f32 %v731_v0, %v726_v63 }
 0x1a0   : > { %1831 = vmatpush3.msra.mxu0 %v733_v3 }
 0x1a1   : > { %1833 = vmatmul.mubr.msk.f32.vlgmr.msra.gmra.mxu0 %vm741_vm2, %v734_v4 }
 0x261   : > { %v811_v6 = vpop.f32.mrf.mxu0 }
 0x262   : > { %v812_v7 = vadd.f32 %v811_v6, %v739_v5 }
 0x263   : > { %v1834_v8 = vpop.f32.mrf.mxu0 }
 0x264   : > { %v815_v9 = vmax.f32 %v812_v7, 0.0 }
 0x266   : > { %1836 = vmatpush3.msra.mxu1 %v815_v9 }
 0x267   : > { %1838 = vmatmul.mubr.msk.f32.vlgmr.msra.gmra.mxu1 %vm741_vm2, %v816_v10  ;;  %1840 = vmatprep.subr.mxu1 %v1935_v2 }
 0x268   : > { %1858 = vmatprep.mubr.msk.f32.mxu1 %vm1938_vm0, %v1935_v2 }
 0x327   : > { %v892_v13 = vpop.f32.mrf.mxu1 }
 0x328   : > { %v893_v14 = vadd.f32 %v892_v13, %v821_v12 }
 0x329   : > { %v1839_v17 = vpop.f32.mrf.mxu1 }
 0x32a   : > { %v896_v19 = vadd.f32 %v893_v14, %v733_v3 }
 0x32c   : > { %v897_v20 = vrot.slane %v896_v19, 4 }
 0x32e   : > { %v898_v22 = vadd.f32 %v897_v20, %v896_v19 }
 0x330   : > { %v899_v23 = vrot.slane %v898_v22, 2 }
 0x332   : > { %v900_v25 = vadd.f32 %v899_v23, %v898_v22 }
 0x334   : > { %v901_v26 = vrot.slane %v900_v25, 1 }
 0x336   : > { %v902_v27 = vadd.f32 %v901_v26, %v900_v25 }
 0x338   : > { %v903_v29 = vmul.f32 0.125, %v902_v27 }
 0x33a   : > { %v904_v31 = vsub.f32 %v896_v19, %v903_v29 }
 0x33c   : > { %v905_v32 = vmul.f32 %v904_v31, %v904_v31 }
 0x33e   : > { %v906_v34 = vrot.slane %v905_v32, 4 }
 0x340   : > { %v907_v35 = vadd.f32 %v906_v34, %v905_v32 }
 0x342   : > { %v908_v36 = vrot.slane %v907_v35, 2 }
 0x344   : > { %v909_v37 = vadd.f32 %v908_v36, %v907_v35 }
 0x346   : > { %v910_v38 = vrot.slane %v909_v37, 1 }
 0x348   : > { %v911_v39 = vadd.f32 %v910_v38, %v909_v37 }
 0x34a   : > { %v912_v40 = vmul.f32 0.125, %v911_v39 }
 0x34c   : > { %v913_v41 = vadd.f32 1e-05, %v912_v40 }
 0x34e   : > { %1891 = vrsqrt.f32 %v913_v41 }
 0x35b   : > { %v1892_v42 = vpop.eup %1891 }
 0x35c   : > { %v915_v43 = vmul.f32 %v1892_v42, %v904_v31 }
 0x35e   : > { %v922_v45 = vmul.f32 %v920_v44, %v915_v43 }
 0x360   : > { %v929_v47 = vadd.f32 %v927_v46, %v922_v45 }
 0x362   : > { %949 = vrot.lane.b32.xlu1 %v929_v47, %s1936_s30  ;;  %952 = vrot.lane.b32.xlu0 %v929_v47, %s1933_s29 }
 0x366   : > { %943 = vrot.lane.b32.xlu1 %v929_v47, %s1937_s18  ;;  %946 = vrot.lane.b32.xlu0 %v929_v47, %s2680_s23 }
 0x36a   : > { %936 = vrot.lane.b32.xlu1 %v929_v47, %s2681_s26  ;;  %939 = vrot.lane.b32.xlu0 %v929_v47, %s2682_s27 }
 0x36e   : > { %930 = vrot.lane.b32.xlu1 %v929_v47, %s2683_s19  ;;  %933 = vrot.lane.b32.xlu0 %v929_v47, %s2684_s1 }
 0x372   : > { %959 = vperm.xlu0 %1887, %v956_v48  }
 0x3d4   : > { %v950_v49 = vpop.permute.xlu1 %949  ;;  %v953_v50 = vpop.permute.xlu0 %952 }
 0x3d5   : > { %v954_v51 = vmul.f32 %v2097_v11, %v953_v50  ;;  %v951_v52 = vmul.f32 %v2103_v15, %v950_v49  ;;  %v942_v11 = vmul.f32 %v2120_v21, %v929_v47 }
 0x3d7   : > { %1841 = vmatpush3.msra.mxu1 %v954_v51 }
 0x3d8   : > { %v944_v53 = vpop.permute.xlu1 %943  ;;  %1842 = vmatprep.subr.mxu1 %v1935_v2  ;;  %v947_v54 = vpop.permute.xlu0 %946 }
 0x3d9   : > { %v948_v55 = vmul.f32 %v2108_v16, %v947_v54  ;;  %1843 = vmatpush3.msra.mxu1 %v951_v52  ;;  %v945_v56 = vmul.f32 %v2114_v18, %v944_v53 }
 0x3da   : > { %1844 = vmatprep.subr.mxu1 %v1935_v2 }
 0x3db   : > { %1845 = vmatpush3.msra.mxu1 %v948_v55 }
 0x3dc   : > { %v937_v57 = vpop.permute.xlu1 %936  ;;  %1846 = vmatprep.subr.mxu1 %v1935_v2  ;;  %v940_v58 = vpop.permute.xlu0 %939 }
 0x3dd   : > { %1847 = vmatpush3.msra.mxu1 %v945_v56  ;;  %v941_v15 = vmul.f32 %v2128_v24, %v940_v58  ;;  %v938_v16 = vmul.f32 %v2136_v28, %v937_v57  ;;  %v955_v24 = vld [vmem:[%s2664_s12] sm:$0xff] }
 0x3de   : > { %1848 = vmatprep.subr.mxu1 %v1935_v2 }
 0x3df   : > { %1849 = vmatpush3.msra.mxu1 %v942_v11 }
 0x3e0   : > { %v934_v59 = vpop.permute.xlu0 %933  ;;  %1850 = vmatprep.subr.mxu1 %v1935_v2  ;;  %v931_v18 = vpop.permute.xlu1 %930 }
 0x3e1   : > { %1851 = vmatpush3.msra.mxu1 %v941_v15  ;;  %v935_v60 = vmul.f32 %v2143_v30, %v934_v59  ;;  %v932_v21 = vmul.f32 %v2150_v33, %v931_v18 }
 0x3e2   : > { %1852 = vmatprep.subr.mxu1 %v1935_v2 }
 0x3e3   : > { %1853 = vmatpush3.msra.mxu1 %v938_v16 }
 0x3e4   : > { %1854 = vmatprep.subr.mxu1 %v1935_v2 }
 0x3e5   : > { %1855 = vmatpush3.msra.mxu1 %v935_v60 }
 0x3e6   : > { %1856 = vmatprep.subr.mxu1 %v1935_v2 }
 0x3e7   : > { %1857 = vmatpush3.msra.mxu1 %v932_v21 }
 0x3e8   : > { %1859 = vmatmul.mubr.msk.f32.vlgmr.msra.gmra.mxu1 %vm625_vm1, %v955_v24 }
 0x3ed   : > { %v960_v28 = vpop.permute.xlu0 %959 }
 0x4a8   : > { %v1031_v61 = vpop.f32.mrf.mxu1 }
 0x4a9   : > { %v1032_v62 = vadd.f32 %v1031_v61, %v960_v28 }
 0x4aa   : > { %v1860_v63 = vpop.f32.mrf.mxu1 }
 0x4ab   : > { %v1035_v30 = vmax.f32 %v1032_v62, 0.0  ;;  %1041 = sbr.rel (%p1630_p4) target bundleno = 1773 (0x6ed), region = 96 }
 0x4ad   : > { %v1036_v0 = vadd.f32 %v1035_v30, %v2049_v1 }
 0x4af   : > { %1037 = vst [vmem:[#allocation2] sm:$0xff] %v1036_v0 }
 0x4b0   : > { %v1631_v33 = vld [vmem:[%s2666_s14] ss:$0 sm:$0xff]  ;;  %v1633_v2 = vld [vmem:[%s2666_s14 + $0x1] ss:$0 sm:$0xff]  ;;  %v1185_v35 = vld [vmem:[%s2667_s15 + $0xf8] sm:$0xff]  ;;  %vm1145_vm3 = vcmask 1040384  }
 0x4b1   : > { %v1049_v3 = vmul.f32 %v1631_v33, %v1036_v0  ;;  %v1097_v4 = vmul.f32 %v1633_v2, %v1036_v0  ;;  %1669 = vmatprep.subr.mxu0 %v1185_v35  ;;  %v1169_v36 = vld [vmem:[%s2667_s15 + $0x78] sm:$0xff]  ;;  %v1184_v38 = vld [vmem:[%s2667_s15 + $0xf0] sm:$0xff]  ;;  %v1183_v42 = vld [vmem:[%s2667_s15 + $0xe8] sm:$0xff]  ;;  %vm1569_vm4 = vcmask 74752  }
 0x4b2   : > { %v1217_v37 = vld [vmem:[%s2667_s15 + $0x1f8] sm:$0xff]  ;;  %1670 = vmatpush3.msra.mxu0 %v1169_v36  ;;  %v1168_v40 = vld [vmem:[%s2667_s15 + $0x70] sm:$0xff]  ;;  %v1167_v44 = vld [vmem:[%s2667_s15 + $0x68] sm:$0xff] }
 0x4b3   : > { %1050 = vadd.xlane.f32.xlu0 %v1049_v3  ;;  %1704 = vmatprep.subr.mxu1 %v1217_v37  ;;  %v1201_v39 = vld [vmem:[%s2667_s15 + $0x178] sm:$0xff]  ;;  %v1216_v41 = vld [vmem:[%s2667_s15 + $0x1f0] sm:$0xff]  ;;  %v1215_v45 = vld [vmem:[%s2667_s15 + $0x1e8] sm:$0xff] }
 0x4b4   : > { %1671 = vmatprep.subr.mxu0 %v1184_v38  ;;  %1705 = vmatpush3.msra.mxu1 %v1201_v39  ;;  %v1200_v43 = vld [vmem:[%s2667_s15 + $0x170] sm:$0xff]  ;;  %v1182_v46 = vld [vmem:[%s2667_s15 + $0xe0] sm:$0xff]  ;;  %v1199_v47 = vld [vmem:[%s2667_s15 + $0x168] sm:$0xff] }
 0x4b5   : > { %1672 = vmatpush3.msra.mxu0 %v1168_v40  ;;  %1706 = vmatprep.subr.mxu1 %v1216_v41  ;;  %v1166_v48 = vld [vmem:[%s2667_s15 + $0x60] sm:$0xff]  ;;  %v1181_v50 = vld [vmem:[%s2667_s15 + $0xd8] sm:$0xff]  ;;  %v1180_v54 = vld [vmem:[%s2667_s15 + $0xd0] sm:$0xff] }
 0x4b6   : > { %1673 = vmatprep.subr.mxu0 %v1183_v42  ;;  %1707 = vmatpush3.msra.mxu1 %v1200_v43  ;;  %v1214_v49 = vld [vmem:[%s2667_s15 + $0x1e0] sm:$0xff]  ;;  %v1165_v52 = vld [vmem:[%s2667_s15 + $0x58] sm:$0xff]  ;;  %v1164_v56 = vld [vmem:[%s2667_s15 + $0x50] sm:$0xff] }
 0x4b7   : > { %1098 = vadd.xlane.f32.xlu0 %v1097_v4  ;;  %1674 = vmatpush3.msra.mxu0 %v1167_v44  ;;  %v1198_v51 = vld [vmem:[%s2667_s15 + $0x160] sm:$0xff]  ;;  %v1213_v53 = vld [vmem:[%s2667_s15 + $0x1d8] sm:$0xff]  ;;  %v1212_v57 = vld [vmem:[%s2667_s15 + $0x1d0] sm:$0xff] }
 0x4b8   : > { %1708 = vmatprep.subr.mxu1 %v1215_v45  ;;  %1675 = vmatprep.subr.mxu0 %v1182_v46  ;;  %v1197_v55 = vld [vmem:[%s2667_s15 + $0x158] sm:$0xff]  ;;  %v1179_v58 = vld [vmem:[%s2667_s15 + $0xc8] sm:$0xff]  ;;  %v1196_v11 = vld [vmem:[%s2667_s15 + $0x150] sm:$0xff] }
 0x4b9   : > { %1709 = vmatpush3.msra.mxu1 %v1199_v47  ;;  %1676 = vmatpush3.msra.mxu0 %v1166_v48  ;;  %v1163_v15 = vld [vmem:[%s2667_s15 + $0x48] sm:$0xff]  ;;  %v1178_v16 = vld [vmem:[%s2667_s15 + $0xc0] sm:$0xff]  ;;  %v1177_v24 = vld [vmem:[%s2667_s15 + $0xb8] sm:$0xff] }
 0x4ba   : > { %1710 = vmatprep.subr.mxu1 %v1214_v49  ;;  %1677 = vmatprep.subr.mxu0 %v1181_v50  ;;  %v1211_v59 = vld [vmem:[%s2667_s15 + $0x1c8] sm:$0xff]  ;;  %v1162_v60 = vld [vmem:[%s2667_s15 + $0x40] sm:$0xff]  ;;  %v1161_v61 = vld [vmem:[%s2667_s15 + $0x38] sm:$0xff] }
 0x4bb   : > { %1711 = vmatpush3.msra.mxu1 %v1198_v51  ;;  %1678 = vmatpush3.msra.mxu0 %v1165_v52  ;;  %v1195_v18 = vld [vmem:[%s2667_s15 + $0x148] sm:$0xff]  ;;  %v1210_v21 = vld [vmem:[%s2667_s15 + $0x1c0] sm:$0xff]  ;;  %v1209_v62 = vld [vmem:[%s2667_s15 + $0x1b8] sm:$0xff] }
 0x4bc   : > { %1712 = vmatprep.subr.mxu1 %v1213_v53  ;;  %1679 = vmatprep.subr.mxu0 %v1180_v54  ;;  %v1194_v28 = vld [vmem:[%s2667_s15 + $0x140] sm:$0xff]  ;;  %v1176_v63 = vld [vmem:[%s2667_s15 + $0xb0] sm:$0xff]  ;;  %v1193_v30 = vld [vmem:[%s2667_s15 + $0x138] sm:$0xff] }
 0x4bd   : > { %1713 = vmatpush3.msra.mxu1 %v1197_v55  ;;  %1680 = vmatpush3.msra.mxu0 %v1164_v56  ;;  %v1192_v3 = vld [vmem:[%s2667_s15 + $0x130] sm:$0xff]  ;;  %v1159_v4 = vld [vmem:[%s2667_s15 + $0x28] sm:$0xff]  ;;  %v1202_v35 = vld [vmem:[%s2667_s15 + $0x180] sm:$0xff] }
 0x4be   : > { %1714 = vmatprep.subr.mxu1 %v1212_v57  ;;  %1681 = vmatprep.subr.mxu0 %v1179_v58  ;;  %v1186_v36 = vld [vmem:[%s2667_s15 + $0x100] sm:$0xff]  ;;  %v1249_v37 = vld [vmem:[%s2667_s15 + $0x2f8] sm:$0xff] }
 0x4bf   : > { %1715 = vmatpush3.msra.mxu1 %v1196_v11  ;;  %1682 = vmatpush3.msra.mxu0 %v1163_v15  ;;  %v1281_v38 = vld [vmem:[%s2667_s15 + $0x3f8] sm:$0xff] }
 0x4c0   : > { %1716 = vmatprep.subr.mxu1 %v1211_v59  ;;  %1683 = vmatprep.subr.mxu0 %v1178_v16 }
 0x4c1   : > { %1717 = vmatpush3.msra.mxu1 %v1195_v18  ;;  %1684 = vmatpush3.msra.mxu0 %v1162_v60 }
 0x4c2   : > { %1718 = vmatprep.subr.mxu1 %v1210_v21  ;;  %1685 = vmatprep.subr.mxu0 %v1177_v24 }
 0x4c3   : > { %1719 = vmatpush3.msra.mxu1 %v1194_v28  ;;  %1686 = vmatpush3.msra.mxu0 %v1161_v61 }
 0x4c4   : > { %1720 = vmatprep.subr.mxu1 %v1209_v62  ;;  %1687 = vmatprep.subr.mxu0 %v1176_v63 }
 0x4c5   : > { %1721 = vmatpush3.msra.mxu1 %v1193_v30 }
 0x53c   : > { %v1051_v5 = vpop.xlane.xlu0 %1050 }
 0x53d   : > { %v1052_v6 = vrot.slane %v1051_v5, 4 }
 0x53f   : > { %v1053_v7 = vadd.f32 %v1052_v6, %v1051_v5  ;;  %v1207_v5 = vld [vmem:[%s2667_s15 + $0x1a8] sm:$0xff]  ;;  %v1174_v6 = vld [vmem:[%s2667_s15 + $0xa0] sm:$0xff] }
 0x540   : > { %v1099_v1 = vpop.xlane.xlu0 %1098 }
 0x541   : > { %v1054_v8 = vrot.slane %v1053_v7, 2  ;;  %v1100_v9 = vrot.slane %v1099_v1, 4 }
 0x543   : > { %v1055_v10 = vadd.f32 %v1054_v8, %v1053_v7  ;;  %v1101_v12 = vadd.f32 %v1100_v9, %v1099_v1  ;;  %v1191_v7 = vld [vmem:[%s2667_s15 + $0x128] sm:$0xff]  ;;  %v1158_v1 = vld [vmem:[%s2667_s15 + $0x20] sm:$0xff]  ;;  %v1173_v9 = vld [vmem:[%s2667_s15 + $0x98] sm:$0xff] }
 0x544   : > { %v1206_v8 = vld [vmem:[%s2667_s15 + $0x1a0] sm:$0xff] }
 0x545   : > { %v1056_v13 = vrot.slane %v1055_v10, 1  ;;  %v1102_v14 = vrot.slane %v1101_v12, 2 }
 0x547   : > { %v1103_v17 = vadd.f32 %v1102_v14, %v1101_v12  ;;  %v1057_v19 = vadd.f32 %v1056_v13, %v1055_v10  ;;  %v1190_v10 = vld [vmem:[%s2667_s15 + $0x120] sm:$0xff]  ;;  %v1157_v12 = vld [vmem:[%s2667_s15 + $0x18] sm:$0xff]  ;;  %v1172_v14 = vld [vmem:[%s2667_s15 + $0x90] sm:$0xff] }
 0x548   : > { %v1205_v13 = vld [vmem:[%s2667_s15 + $0x198] sm:$0xff] }
 0x549   : > { %v1104_v20 = vrot.slane %v1103_v17, 1  ;;  %v1058_v22 = vmul.f32 0.001953125, %v1057_v19  ;;  %v1156_v19 = vld [vmem:[%s2667_s15 + $0x10] sm:$0xff] }
 0x54b   : > { %v1105_v23 = vadd.f32 %v1104_v20, %v1103_v17  ;;  %v1059_v25 = vsub.f32 %v1036_v0, %v1058_v22  ;;  %v1189_v17 = vld [vmem:[%s2667_s15 + $0x118] sm:$0xff]  ;;  %v1204_v20 = vld [vmem:[%s2667_s15 + $0x190] sm:$0xff]  ;;  %v1171_v22 = vld [vmem:[%s2667_s15 + $0x88] sm:$0xff] }
 0x54d   : > { %v1106_v26 = vmul.f32 0.001953125, %v1105_v23  ;;  %v2213_v27 = vmul.f32 %v1631_v33, %v1059_v25  ;;  %v1208_v33 = vld [vmem:[%s2667_s15 + $0x1b0] sm:$0xff]  ;;  %v1155_v25 = vld [vmem:[%s2667_s15 + $0x8] sm:$0xff] }
 0x54e   : > { %1722 = vmatprep.subr.mxu1 %v1208_v33  ;;  %v1188_v23 = vld [vmem:[%s2667_s15 + $0x110] sm:$0xff] }
 0x54f   : > { %v1061_v29 = vmul.f32 %v2213_v27, %v2213_v27  ;;  %v1107_v31 = vsub.f32 %v1036_v0, %v1106_v26  ;;  %v1160_v0 = vld [vmem:[%s2667_s15 + $0x30] sm:$0xff]  ;;  %1723 = vmatpush3.msra.mxu1 %v1192_v3  ;;  %v1203_v26 = vld [vmem:[%s2667_s15 + $0x188] sm:$0xff] }
 0x550   : > { %1688 = vmatpush3.msra.mxu0 %v1160_v0  ;;  %1724 = vmatprep.subr.mxu1 %v1207_v5  ;;  %v1248_v33 = vld [vmem:[%s2667_s15 + $0x2f0] sm:$0xff] }
 0x551   : > { %1062 = vadd.xlane.f32.xlu1 %v1061_v29  ;;  %v2217_v32 = vmul.f32 %v1633_v2, %v1107_v31  ;;  %v1175_v2 = vld [vmem:[%s2667_s15 + $0xa8] sm:$0xff]  ;;  %1725 = vmatpush3.msra.mxu1 %v1191_v7  ;;  %v1170_v29 = vld [vmem:[%s2667_s15 + $0x80] sm:$0xff]  ;;  %v1232_v5 = vld [vmem:[%s2667_s15 + $0x270] sm:$0xff] }
 0x552   : > { %1689 = vmatprep.subr.mxu0 %v1175_v2  ;;  %1726 = vmatprep.subr.mxu1 %v1206_v8  ;;  %v1187_v31 = vld [vmem:[%s2667_s15 + $0x108] sm:$0xff]  ;;  %v1264_v8 = vld [vmem:[%s2667_s15 + $0x370] sm:$0xff] }
 0x553   : > { %v1109_v34 = vmul.f32 %v2217_v32, %v2217_v32  ;;  %1690 = vmatpush3.msra.mxu0 %v1159_v4  ;;  %1727 = vmatpush3.msra.mxu1 %v1190_v10  ;;  %v1265_v4 = vld [vmem:[%s2667_s15 + $0x378] sm:$0xff]  ;;  %v1279_v10 = vld [vmem:[%s2667_s15 + $0x3e8] sm:$0xff] }
 0x554   : > { %1691 = vmatprep.subr.mxu0 %v1174_v6  ;;  %1728 = vmatprep.subr.mxu1 %v1205_v13  ;;  %v1280_v6 = vld [vmem:[%s2667_s15 + $0x3f0] sm:$0xff]  ;;  %v1263_v13 = vld [vmem:[%s2667_s15 + $0x368] sm:$0xff] }
 0x555   : > { %1110 = vadd.xlane.f32.xlu1 %v1109_v34  ;;  %1692 = vmatpush3.msra.mxu0 %v1158_v1  ;;  %v1154_v34 = vld [vmem:[%s2667_s15] sm:$0xff]  ;;  %v1247_v1 = vld [vmem:[%s2667_s15 + $0x2e8] sm:$0xff] }
 0x556   : > { %1693 = vmatprep.subr.mxu0 %v1173_v9  ;;  %1729 = vmatpush3.msra.mxu1 %v1189_v17  ;;  %v1231_v9 = vld [vmem:[%s2667_s15 + $0x268] sm:$0xff]  ;;  %v1278_v17 = vld [vmem:[%s2667_s15 + $0x3e0] sm:$0xff] }
 0x557   : > { %1694 = vmatpush3.msra.mxu0 %v1157_v12  ;;  %1730 = vmatprep.subr.mxu1 %v1204_v20  ;;  %v1246_v12 = vld [vmem:[%s2667_s15 + $0x2e0] sm:$0xff] }
 0x558   : > { %1695 = vmatprep.subr.mxu0 %v1172_v14  ;;  %1731 = vmatpush3.msra.mxu1 %v1188_v23  ;;  %v1230_v14 = vld [vmem:[%s2667_s15 + $0x260] sm:$0xff]  ;;  %v1277_v23 = vld [vmem:[%s2667_s15 + $0x3d8] sm:$0xff] }
 0x559   : > { %1696 = vmatpush3.msra.mxu0 %v1156_v19  ;;  %1732 = vmatprep.subr.mxu1 %v1203_v26  ;;  %v1245_v19 = vld [vmem:[%s2667_s15 + $0x2d8] sm:$0xff]  ;;  %v1262_v20 = vld [vmem:[%s2667_s15 + $0x360] sm:$0xff] }
 0x55a   : > { %1697 = vmatprep.subr.mxu0 %v1171_v22  ;;  %1733 = vmatpush3.msra.mxu1 %v1187_v31  ;;  %v1229_v22 = vld [vmem:[%s2667_s15 + $0x258] sm:$0xff]  ;;  %v1276_v31 = vld [vmem:[%s2667_s15 + $0x3d0] sm:$0xff] }
 0x55b   : > { %1698 = vmatpush3.msra.mxu0 %v1155_v25  ;;  %1734 = vmatprep.subr.mxu1 %v1202_v35  ;;  %v1244_v25 = vld [vmem:[%s2667_s15 + $0x2d0] sm:$0xff]  ;;  %v1261_v26 = vld [vmem:[%s2667_s15 + $0x358] sm:$0xff] }
 0x55c   : > { %1699 = vmatprep.subr.mxu0 %v1170_v29  ;;  %1735 = vmatpush3.msra.mxu1 %v1186_v36  ;;  %v1228_v29 = vld [vmem:[%s2667_s15 + $0x250] sm:$0xff]  ;;  %v1227_v36 = vld [vmem:[%s2667_s15 + $0x248] sm:$0xff] }
 0x55d   : > { %1700 = vmatpush3.msra.mxu0 %v1154_v34  ;;  %1774 = vmatprep.subr.mxu1 %v1281_v38  ;;  %v1243_v34 = vld [vmem:[%s2667_s15 + $0x2c8] sm:$0xff]  ;;  %v1260_v35 = vld [vmem:[%s2667_s15 + $0x350] sm:$0xff]  ;;  %v1242_v38 = vld [vmem:[%s2667_s15 + $0x2c0] sm:$0xff] }
 0x55e   : > { %1739 = vmatprep.subr.mxu0 %v1249_v37  ;;  %v1275_v37 = vld [vmem:[%s2667_s15 + $0x3c8] sm:$0xff] }
 0x5da   : > { %v1063_v39 = vpop.xlane.xlu1 %1062 }
 0x5db   : > { %v1064_v40 = vrot.slane %v1063_v39, 4 }
 0x5dd   : > { %v1065_v41 = vadd.f32 %v1064_v40, %v1063_v39  ;;  %v1259_v39 = vld [vmem:[%s2667_s15 + $0x348] sm:$0xff]  ;;  %v1226_v40 = vld [vmem:[%s2667_s15 + $0x240] sm:$0xff] }
 0x5de   : > { %v1111_v42 = vpop.xlane.xlu1 %1110 }
 0x5df   : > { %v1066_v43 = vrot.slane %v1065_v41, 2  ;;  %v1112_v44 = vrot.slane %v1111_v42, 4 }
 0x5e1   : > { %v1067_v45 = vadd.f32 %v1066_v43, %v1065_v41  ;;  %v1113_v46 = vadd.f32 %v1112_v44, %v1111_v42  ;;  %v1274_v41 = vld [vmem:[%s2667_s15 + $0x3c0] sm:$0xff]  ;;  %v1241_v42 = vld [vmem:[%s2667_s15 + $0x2b8] sm:$0xff] }
 0x5e2   : > { %v1258_v43 = vld [vmem:[%s2667_s15 + $0x340] sm:$0xff]  ;;  %v1225_v44 = vld [vmem:[%s2667_s15 + $0x238] sm:$0xff] }
 0x5e3   : > { %v1068_v47 = vrot.slane %v1067_v45, 1  ;;  %v1114_v48 = vrot.slane %v1113_v46, 2 }
 0x5e5   : > { %v1069_v49 = vadd.f32 %v1068_v47, %v1067_v45  ;;  %v1115_v50 = vadd.f32 %v1114_v48, %v1113_v46  ;;  %v1273_v45 = vld [vmem:[%s2667_s15 + $0x3b8] sm:$0xff]  ;;  %v1240_v46 = vld [vmem:[%s2667_s15 + $0x2b0] sm:$0xff] }
 0x5e6   : > { %v1257_v47 = vld [vmem:[%s2667_s15 + $0x338] sm:$0xff]  ;;  %v1224_v48 = vld [vmem:[%s2667_s15 + $0x230] sm:$0xff] }
 0x5e7   : > { %v1070_v51 = vmul.f32 0.001953125, %v1069_v49  ;;  %v1116_v52 = vrot.slane %v1115_v50, 1  ;;  %v1272_v49 = vld [vmem:[%s2667_s15 + $0x3b0] sm:$0xff] }
 0x5e9   : > { %v1071_v53 = vadd.f32 1e-05, %v1070_v51  ;;  %v1117_v54 = vadd.f32 %v1116_v52, %v1115_v50  ;;  %v1239_v50 = vld [vmem:[%s2667_s15 + $0x2a8] sm:$0xff]  ;;  %v1256_v51 = vld [vmem:[%s2667_s15 + $0x330] sm:$0xff] }
 0x5ea   : > { %v1223_v52 = vld [vmem:[%s2667_s15 + $0x228] sm:$0xff] }
 0x5eb   : > { %1893 = vrsqrt.f32 %v1071_v53  ;;  %v1118_v55 = vmul.f32 0.001953125, %v1117_v54  ;;  %v1271_v53 = vld [vmem:[%s2667_s15 + $0x3a8] sm:$0xff]  ;;  %v1238_v54 = vld [vmem:[%s2667_s15 + $0x2a0] sm:$0xff] }
 0x5ed   : > { %v1119_v56 = vadd.f32 1e-05, %v1118_v55  ;;  %v1255_v55 = vld [vmem:[%s2667_s15 + $0x328] sm:$0xff] }
 0x5ef   : > { %1895 = vrsqrt.f32 %v1119_v56  ;;  %v1222_v56 = vld [vmem:[%s2667_s15 + $0x220] sm:$0xff] }
 0x5f8   : > { %v1894_v57 = vpop.eup %1893 }
 0x5f9   : > { %v2420_v58 = vmul.f32 %v1894_v57, %v2213_v27  ;;  %v1270_v57 = vld [vmem:[%s2667_s15 + $0x3a0] sm:$0xff] }
 0x5fb   : > { %v1075_v59 = vrot.slane %v2420_v58, 1  ;;  %v1079_v16 = vrot.slane %v2420_v58, 3  ;;  %v1077_v18 = vrot.slane %v2420_v58, 2  ;;  %v1083_v28 = vrot.slane %v2420_v58, 5 }
 0x5fc   : > { %v1896_v11 = vpop.eup %1895  ;;  %v1087_v62 = vrot.slane %v2420_v58, 7 }
 0x5fd   : > { %v2423_v15 = vmul.f32 %v1896_v11, %v2217_v32  ;;  %v1233_v32 = vld [vmem:[%s2667_s15 + $0x278] sm:$0xff] }
 0x5fe   : > { %v1237_v11 = vld [vmem:[%s2667_s15 + $0x298] sm:$0xff] }
 0x5ff   : > { %v1147_v60 = vsel %vm1145_vm3, %v1075_v59, %v2423_v15  ;;  %v1129_v21 = vrot.slane %v2423_v15, 7  ;;  %v1636_v24 = vrot.slane %v2423_v15, 10  ;;  %v1635_v27 = vrot.slane %v2423_v15, 9  ;;  %v1254_v59 = vld [vmem:[%s2667_s15 + $0x320] sm:$0xff] }
 0x600   : > { %1353 = vmatprep.mubr.f32.mxu0 %v1147_v60  ;;  %v1638_v61 = vrot.slane %v2423_v15, 12  ;;  %v1236_v60 = vld [vmem:[%s2667_s15 + $0x290] sm:$0xff] }
 0x601   : > { %v1146_v63 = vsel %vm1145_vm3, %v2420_v58, %v1129_v21  ;;  %v1149_v30 = vsel %vm1145_vm3, %v1079_v16, %v1636_v24  ;;  %v1148_v0 = vsel %vm1145_vm3, %v1077_v18, %v1635_v27  ;;  %v1136_v2 = vrot.slane %v1129_v21, 7  ;;  %v1221_v16 = vld [vmem:[%s2667_s15 + $0x218] sm:$0xff]  ;;  %v1220_v24 = vld [vmem:[%s2667_s15 + $0x210] sm:$0xff] }
 0x602   : > { %1354 = vmatmul.mubr.f32.vlgmr.msra.gmra.mxu0 %v1146_v63  ;;  %1423 = vmatprep.mubr.f32.mxu1 %v1149_v30  ;;  %v1151_v3 = vsel %vm1145_vm3, %v1083_v28, %v1638_v61  ;;  %v1269_v18 = vld [vmem:[%s2667_s15 + $0x398] sm:$0xff]  ;;  %v1268_v27 = vld [vmem:[%s2667_s15 + $0x390] sm:$0xff]  ;;  %v1219_v61 = vld [vmem:[%s2667_s15 + $0x208] sm:$0xff] }
 0x603   : > { %1740 = vmatpush3.msra.mxu0 %v1233_v32  ;;  %1424 = vmatmul.mubr.f32.vlgmr.msra.gmra.mxu1 %v1148_v0  ;;  %v1153_v7 = vsel %vm1145_vm3, %v1087_v62, %v1136_v2  ;;  %v1253_v21 = vld [vmem:[%s2667_s15 + $0x318] sm:$0xff]  ;;  %v1235_v32 = vld [vmem:[%s2667_s15 + $0x288] sm:$0xff]  ;;  %v1252_v28 = vld [vmem:[%s2667_s15 + $0x310] sm:$0xff]  ;;  %v1637_v0 = vrot.slane %v2423_v15, 11 }
 0x604   : > { %1741 = vmatprep.subr.mxu0 %v1248_v33  ;;  %1493 = vmatprep.mubr.f32.mxu0 %v1151_v3  ;;  %v1267_v62 = vld [vmem:[%s2667_s15 + $0x388] sm:$0xff]  ;;  %v1234_v63 = vld [vmem:[%s2667_s15 + $0x280] sm:$0xff]  ;;  %v1639_v3 = vrot.slane %v2423_v15, 13 }
 0x605   : > { %1775 = vmatpush3.msra.mxu1 %v1265_v4  ;;  %1742 = vmatpush3.msra.mxu0 %v1232_v5  ;;  %v1251_v30 = vld [vmem:[%s2667_s15 + $0x308] sm:$0xff]  ;;  %v1218_v33 = vld [vmem:[%s2667_s15 + $0x200] sm:$0xff]  ;;  %v1081_v4 = vrot.slane %v2420_v58, 4 }
 0x606   : > { %1776 = vmatprep.subr.mxu1 %v1280_v6  ;;  %1563 = vmatprep.mubr.f32.mxu1 %v1153_v7  ;;  %v1266_v2 = vld [vmem:[%s2667_s15 + $0x380] sm:$0xff]  ;;  %v1085_v6 = vrot.slane %v2420_v58, 6 }
 0x607   : > { %1743 = vmatprep.subr.mxu0 %v1247_v1  ;;  %1777 = vmatpush3.msra.mxu1 %v1264_v8  ;;  %v1250_v5 = vld [vmem:[%s2667_s15 + $0x300] sm:$0xff]  ;;  %v1150_v7 = vsel %vm1145_vm3, %v1081_v4, %v1637_v0 }
 0x608   : > { %1744 = vmatpush3.msra.mxu0 %v1231_v9  ;;  %1778 = vmatprep.subr.mxu1 %v1279_v10  ;;  %v1152_v15 = vsel %vm1145_vm3, %v1085_v6, %v1639_v3 }
 0x609   : > { %1745 = vmatprep.subr.mxu0 %v1246_v12  ;;  %1779 = vmatpush3.msra.mxu1 %v1263_v13  ;;  %v1640_v12 = vld [vmem:[%s2668_s16] ss:$0 sm:$0xff] }
 0x60a   : > { %1746 = vmatpush3.msra.mxu0 %v1230_v14  ;;  %1780 = vmatprep.subr.mxu1 %v1278_v17 }
 0x60b   : > { %1747 = vmatprep.subr.mxu0 %v1245_v19  ;;  %1781 = vmatpush3.msra.mxu1 %v1262_v20 }
 0x60c   : > { %1748 = vmatpush3.msra.mxu0 %v1229_v22  ;;  %1782 = vmatprep.subr.mxu1 %v1277_v23 }
 0x60d   : > { %1749 = vmatprep.subr.mxu0 %v1244_v25  ;;  %1783 = vmatpush3.msra.mxu1 %v1261_v26 }
 0x60e   : > { %1750 = vmatpush3.msra.mxu0 %v1228_v29  ;;  %1784 = vmatprep.subr.mxu1 %v1276_v31 }
 0x60f   : > { %1751 = vmatprep.subr.mxu0 %v1243_v34  ;;  %1785 = vmatpush3.msra.mxu1 %v1260_v35 }
 0x610   : > { %1752 = vmatpush3.msra.mxu0 %v1227_v36  ;;  %1786 = vmatprep.subr.mxu1 %v1275_v37 }
 0x611   : > { %1753 = vmatprep.subr.mxu0 %v1242_v38  ;;  %1787 = vmatpush3.msra.mxu1 %v1259_v39 }
 0x612   : > { %1754 = vmatpush3.msra.mxu0 %v1226_v40  ;;  %1788 = vmatprep.subr.mxu1 %v1274_v41 }
 0x613   : > { %1755 = vmatprep.subr.mxu0 %v1241_v42  ;;  %1789 = vmatpush3.msra.mxu1 %v1258_v43 }
 0x614   : > { %1756 = vmatpush3.msra.mxu0 %v1225_v44  ;;  %1790 = vmatprep.subr.mxu1 %v1273_v45 }
 0x615   : > { %1757 = vmatprep.subr.mxu0 %v1240_v46  ;;  %1791 = vmatpush3.msra.mxu1 %v1257_v47 }
 0x616   : > { %1758 = vmatpush3.msra.mxu0 %v1224_v48  ;;  %1792 = vmatprep.subr.mxu1 %v1272_v49 }
 0x617   : > { %1759 = vmatprep.subr.mxu0 %v1239_v50  ;;  %1793 = vmatpush3.msra.mxu1 %v1256_v51 }
 0x618   : > { %1760 = vmatpush3.msra.mxu0 %v1223_v52  ;;  %1794 = vmatprep.subr.mxu1 %v1271_v53 }
 0x619   : > { %1761 = vmatprep.subr.mxu0 %v1238_v54  ;;  %1795 = vmatpush3.msra.mxu1 %v1255_v55 }
 0x61a   : > { %1762 = vmatpush3.msra.mxu0 %v1222_v56  ;;  %1796 = vmatprep.subr.mxu1 %v1270_v57 }
 0x61b   : > { %1763 = vmatprep.subr.mxu0 %v1237_v11  ;;  %1797 = vmatpush3.msra.mxu1 %v1254_v59 }
 0x61c   : > { %1764 = vmatpush3.msra.mxu0 %v1221_v16  ;;  %1798 = vmatprep.subr.mxu1 %v1269_v18 }
 0x61d   : > { %1765 = vmatprep.subr.mxu0 %v1236_v60  ;;  %1799 = vmatpush3.msra.mxu1 %v1253_v21 }
 0x61e   : > { %1766 = vmatpush3.msra.mxu0 %v1220_v24  ;;  %1800 = vmatprep.subr.mxu1 %v1268_v27 }
 0x61f   : > { %1767 = vmatprep.subr.mxu0 %v1235_v32  ;;  %1801 = vmatpush3.msra.mxu1 %v1252_v28 }
 0x620   : > { %1768 = vmatpush3.msra.mxu0 %v1219_v61  ;;  %1802 = vmatprep.subr.mxu1 %v1267_v62 }
 0x621   : > { %1769 = vmatprep.subr.mxu0 %v1234_v63  ;;  %1803 = vmatpush3.msra.mxu1 %v1251_v30 }
 0x622   : > { %1770 = vmatpush3.msra.mxu0 %v1218_v33  ;;  %1804 = vmatprep.subr.mxu1 %v1266_v2 }
 0x623   : > { %1494 = vmatmul.mubr.f32.vlgmr.msra.gmra.mxu0 %v1150_v7  ;;  %1805 = vmatpush3.msra.mxu1 %v1250_v5 }
 0x624   : > { %1564 = vmatmul.mubr.f32.vlgmr.msra.gmra.mxu1 %v1152_v15 }
 0x6c2   : > { %v1701_v1 = vpop.f32.mrf.mxu0 }
 0x6c3   : > { %v1736_v8 = vpop.f32.mrf.mxu1 }
 0x6c4   : > { %v1702_v9 = vpop.f32.mrf.mxu0 }
 0x6c5   : > { %v1703_v10 = vadd.f32 %v1702_v9, %v1701_v1  ;;  %v1737_v13 = vpop.f32.mrf.mxu1 }
 0x6c6   : > { %v1738_v58 = vadd.f32 %v1737_v13, %v1736_v8 }
 0x6c7   : > { %v1356_v14 = vadd.f32 %v1703_v10, %v1640_v12 }
 0x6c9   : > { %v1426_v22 = vadd.f32 %v1738_v58, %v1356_v14 }
 0x6e3   : > { %v1771_v17 = vpop.f32.mrf.mxu0 }
 0x6e4   : > { %v1806_v19 = vpop.f32.mrf.mxu1 }
 0x6e5   : > { %v1772_v20 = vpop.f32.mrf.mxu0 }
 0x6e6   : > { %v1773_v23 = vadd.f32 %v1772_v20, %v1771_v17  ;;  %v1807_v25 = vpop.f32.mrf.mxu1 }
 0x6e7   : > { %v1808_v26 = vadd.f32 %v1807_v25, %v1806_v19 }
 0x6e8   : > { %v1496_v29 = vadd.f32 %v1773_v23, %v1426_v22 }
 0x6ea   : > { %v1566_v31 = vadd.f32 %v1808_v26, %v1496_v29 }
 0x6ec   : > { %1570 = vst.msk [vmem:[#allocation3] sm:$0x3] %vm1569_vm4, %v1566_v31 }
 0x6ed PF: > { %p1865_p5 = scmp.eq.s32.totalorder %s2041_s25, 1  ;;  %s1944_s29 = smov [#allocation3]  }
 0x6ee   : > { %s1578_s30 = sshll.u32 %s1944_s29, 4  ;;  %s1579_s30 = int_to_ptr.vmem [resolvable:$true] %s1578_s30 }
 0x6ef   : > { %s1897_s18 = scalar_lea.vmem %s1579_s30, 32  ;;  %p1904_p9 = scmp.lt.s32.totalorder %s1579_s30, %s1579_s30 }
 0x6f0   : > { %p1898_p6 = scmp.ne.s32.totalorder %s1579_s30, %s1897_s18  ;;  %p1905_p10 = scmp.lt.s32.totalorder %s1897_s18, %s1897_s18 }
 0x6f2   : > { %p1899_p7 = pnand %p1898_p6, %p1865_p5  ;;  %p1906_p11 = por %p1905_p10, %p1904_p9 }
 0x6f4   : > { %p1900_p8 = pneg %p1899_p7 }
 0x6f6   : > { %p1907_p12 = pnand %p1906_p11, %p1900_p8 }
 0x6f8   : > { %1910 = shalt.err (!%p1907_p12)
}
 0x6f9   : > { %1862 = dma.vmem_to_hbm [thread:$0]  (%p1865_p5), %s1579_s30, 32, %s2669_s17, [#allocation4]  }
 0x6fa   : > { %1926 = dma.done.wait (%p1865_p5), [#allocation4], 32  }
 0x6fb   : > { %1928 = vsyncadd (%p1865_p5), [#allocation4], 4294967264 }
 0x6fc PF: > { %s28_s24 = sadd.s32 1, %s1931_s24  }
 0x6fd   : > { %p25_p13 = scmp.ge.s32.totalorder %s28_s24, 4  }
 0x6ff   :  { %27 = sbr.rel (!%p25_p13) target bundleno = 4 (0x4), region = 129 }
 0x704   :  { %1591 = vsyncpa [#allocation4], 1 }
 0x705   :  { %1593 = vsyncpa [#allocation4 + $0x1], 1 }

</bundles_post_ra>
